<compile_context>
chip_gen: v7x
topology: tpu7x:2x2x1
jax: 0.10.0
libtpu: 0.0.40
codegen_flags: <defaults>
</compile_context>

<pallas_src>
import math
import functools

import jax
import jax.numpy as jnp
from jax import lax
from jax.experimental import pallas as pl
from jax.experimental.pallas import tpu as pltpu

NEG_BIG = -1e10          # matches torch masked_fill(mask == 0, -1e10)

# packed per-layer vector rows (encoder)
ENC_NVEC = 9             # bq, bk, bv, bo, g1, be1, b2, g2, be2
# packed per-layer vector rows (decoder)
DEC_NVEC = 15            # s_bq, s_bk, s_bv, s_bo, g1, be1, c_bq, c_bk, c_bv, c_bo,
                         # g2, be2, b2, g3, be3


def _pick_vmem_limit():
    """~100 MiB scoped VMEM on 128-MiB chips (v5e/v6e), ~56 MiB on 64-MiB chips (v7x)."""
    try:
        cap = int(pltpu.get_tpu_info().vmem_capacity_bytes)
        return (100 << 20) if cap >= (96 << 20) else (56 << 20)
    except Exception:
        return None


_VMEM_LIMIT = _pick_vmem_limit()


# ----------------------------------------------------------------------------
# In-kernel building blocks (operate on values already loaded from refs)
# ----------------------------------------------------------------------------

def _layer_norm(x, gamma, beta, eps=1e-5):
    """x: (N, D) fp32, gamma/beta: (1, D)."""
    mu = jnp.mean(x, axis=-1, keepdims=True)
    xc = x - mu
    var = jnp.mean(xc * xc, axis=-1, keepdims=True)
    return xc * lax.rsqrt(var + eps) * gamma + beta


def _ffn(x, w1, b1, w2, b2):
    """x: (N, D) fp32; w1:(D,F)/w2:(F,D) bf16; b1:(1,F); b2:(1,D). bf16 MXU, fp32 accum."""
    h = jnp.dot(x.astype(w1.dtype), w1, preferred_element_type=jnp.float32) + b1
    h = jnp.maximum(h, 0.0)                                   # ReLU
    return jnp.dot(h.astype(w2.dtype), w2, preferred_element_type=jnp.float32) + b2


def _qkv_fused(x2, wqkv, bq, bk, bv, B, S, D):
    """One (N, D) @ (D, 3D) matmul, then static slices into q/k/v (biases added after)."""
    qkv = jnp.dot(x2.astype(wqkv.dtype), wqkv, preferred_element_type=jnp.float32)
    q = (qkv[:, 0 * D:1 * D] + bq).reshape(B, S, D)
    k = (qkv[:, 1 * D:2 * D] + bk).reshape(B, S, D)
    v = (qkv[:, 2 * D:3 * D] + bv).reshape(B, S, D)
    return q, k, v


def _attention(q, k, v, bias, wo, bo, num_head):
    """q:(B,Sq,D) k,v:(B,Sk,D) fp32; bias broadcastable to (B,Sq,Sk) additive;
    wo:(D,D) bf16; bo:(1,D). Returns (B*Sq, D) fp32.

    Heads are a short static loop (hd << 128 lanes), but each head's score / prob@V
    contraction is batched over B in one dot_general, and the output projection is
    accumulated per head (no jnp.concatenate and no scatter)."""
    B, Sq, D = q.shape
    Sk = k.shape[1]
    hd = D // num_head
    inv_sqrt_dk = 1.0 / math.sqrt(hd)
    out = None
    for h in range(num_head):
        sl = slice(h * hd, (h + 1) * hd)
        qh, kh, vh = q[:, :, sl], k[:, :, sl], v[:, :, sl]
        # (B,Sq,hd) x (B,Sk,hd) -> (B,Sq,Sk), batched over B.
        s = lax.dot_general(qh, kh, (((2,), (2,)), ((0,), (0,))),
                            preferred_element_type=jnp.float32) * inv_sqrt_dk
        s = s + bias                                           # additive pad/causal mask
        m = jnp.max(s, axis=-1, keepdims=True)
        e = jnp.exp(s - m)
        p = e / jnp.sum(e, axis=-1, keepdims=True)             # exact softmax divide
        # (B,Sq,Sk) x (B,Sk,hd) -> (B,Sq,hd), batched over B.
        oh = lax.dot_general(p, vh, (((2,), (1,)), ((0,), (0,))),
                             preferred_element_type=jnp.float32)
        # accumulate output projection per head: sum_h oh @ wo[h*hd:(h+1)*hd, :]
        c = jnp.dot(oh.reshape(B * Sq, hd).astype(wo.dtype), wo[sl, :],
                    preferred_element_type=jnp.float32)
        out = c if out is None else out + c
    return out + bo


# ----------------------------------------------------------------------------
# Fused encoder-stack kernel:   grid = (L,)   (whole batch resident in the out block)
# ----------------------------------------------------------------------------

def _encoder_kernel(x_ref, src_keep_ref,
                    wqkv_ref, wo_ref, w1_ref, b1_ref, w2_ref, vec_ref,
                    out_ref, *, num_head):
    l = pl.program_id(0)

    @pl.when(l == 0)
    def _():
        out_ref[...] = x_ref[...]            # residual stream lives in the output block

    B, S, D = out_ref.shape
    h2 = out_ref[...].reshape(B * S, D)      # (B*S, D) fp32

    vec = vec_ref[0]                         # (ENC_NVEC, D) packed per-layer vectors
    bq, bk, bv, bo = vec[0:1], vec[1:2], vec[2:3], vec[3:4]
    g1, be1 = vec[4:5], vec[5:6]
    b2, g2, be2 = vec[6:7], vec[7:8], vec[8:9]

    # additive key-pad bias from 1-D keep vector (0 keep, -1e10 pad); O(S) not O(S^2)
    bias = ((src_keep_ref[...] - 1.0) * (-NEG_BIG))[:, None, :]   # (B, 1, S)

    q, k, v = _qkv_fused(h2, wqkv_ref[0], bq, bk, bv, B, S, D)
    a2 = _attention(q, k, v, bias, wo_ref[0], bo, num_head)
    y2 = _layer_norm(a2 + h2, g1, be1)
    f2 = _ffn(y2, w1_ref[0], b1_ref[0], w2_ref[0], b2)
    h_new = _layer_norm(f2 + y2, g2, be2)

    out_ref[...] = h_new.reshape(B, S, D)


def encoder_stack(x0, src_keep, ep, num_head):
    B, S, D = x0.shape
    L = ep["wqkv"].shape[0]
    F = ep["w1"].shape[-1]
    const3 = lambda l: (0, 0, 0)
    const2 = lambda l: (0, 0)
    wmap = lambda l: (l, 0, 0)

    in_specs = [
        pl.BlockSpec((B, S, D), const3),            # x0 (fetched once, index constant)
        pl.BlockSpec((B, S), const2),               # src pad-keep vector
        pl.BlockSpec((1, D, 3 * D), wmap),          # fused QKV weight
        pl.BlockSpec((1, D, D), wmap),              # output projection weight
        pl.BlockSpec((1, D, F), wmap),              # FFN w1
        pl.BlockSpec((1, 1, F), wmap),              # FFN b1
        pl.BlockSpec((1, F, D), wmap),              # FFN w2
        pl.BlockSpec((1, ENC_NVEC, D), wmap),       # packed per-layer small vectors
    ]
    return pl.pallas_call(
        functools.partial(_encoder_kernel, num_head=num_head),
        out_shape=jax.ShapeDtypeStruct((B, S, D), jnp.float32),
        grid=(L,),
        in_specs=in_specs,
        out_specs=pl.BlockSpec((B, S, D), const3),
        compiler_params=pltpu.CompilerParams(
            dimension_semantics=("arbitrary",),
            vmem_limit_bytes=_VMEM_LIMIT),
    )(x0, src_keep, ep["wqkv"], ep["wo"], ep["w1"], ep["b1"], ep["w2"], ep["vec"])


# ----------------------------------------------------------------------------
# Fused decoder-stack kernel (hidden states only):   grid = (L,)
# ----------------------------------------------------------------------------

def _decoder_kernel(y_ref, ctx_ref, src_keep_ref, trg_keep_ref,
                    s_wqkv_ref, s_wo_ref,
                    c_wq_ref, c_wkv_ref, c_wo_ref,
                    w1_ref, b1_ref, w2_ref, vec_ref,
                    out_ref, *, num_head):
    l = pl.program_id(0)

    @pl.when(l == 0)
    def _():
        out_ref[...] = y_ref[...]

    B, St, D = out_ref.shape
    Ss = ctx_ref.shape[1]
    h2 = out_ref[...].reshape(B * St, D)           # (B*St, D) fp32
    ctx2 = ctx_ref[...].reshape(B * Ss, D)         # (B*Ss, D) bf16 (cast once in wrapper)

    vec = vec_ref[0]                               # (DEC_NVEC, D)
    s_bq, s_bk, s_bv, s_bo = vec[0:1], vec[1:2], vec[2:3], vec[3:4]
    g1, be1 = vec[4:5], vec[5:6]
    c_bq, c_bk, c_bv, c_bo = vec[6:7], vec[7:8], vec[8:9], vec[9:10]
    g2, be2 = vec[10:11], vec[11:12]
    b2, g3, be3 = vec[12:13], vec[13:14], vec[14:15]

    # --- masks built in-kernel: causal (iota) + pad-keep vectors, as additive bias ---
    qi = lax.broadcasted_iota(jnp.int32, (St, St), 0)
    ki = lax.broadcasted_iota(jnp.int32, (St, St), 1)
    causal_bias = jnp.where(qi >= ki, 0.0, NEG_BIG)                         # (St, St)
    self_bias = (causal_bias[None, :, :]
                 + ((trg_keep_ref[...] - 1.0) * (-NEG_BIG))[:, :, None])    # (B, St, St)
    cross_bias = ((src_keep_ref[...] - 1.0) * (-NEG_BIG))[:, None, :]       # (B, 1, Ss)

    # --- self-attention + norm1 ---
    q, k, v = _qkv_fused(h2, s_wqkv_ref[0], s_bq, s_bk, s_bv, B, St, D)
    a2 = _attention(q, k, v, self_bias, s_wo_ref[0], s_bo, num_head)
    h2 = _layer_norm(a2 + h2, g1, be1)

    # --- cross-attention (Q from decoder, fused K/V from encoder ctx) + norm2 ---
    cwq = c_wq_ref[0]
    q = (jnp.dot(h2.astype(cwq.dtype), cwq,
                 preferred_element_type=jnp.float32) + c_bq).reshape(B, St, D)
    kv = jnp.dot(ctx2, c_wkv_ref[0], preferred_element_type=jnp.float32)    # (B*Ss, 2D)
    k = (kv[:, :D] + c_bk).reshape(B, Ss, D)
    v = (kv[:, D:] + c_bv).reshape(B, Ss, D)
    a2 = _attention(q, k, v, cross_bias, c_wo_ref[0], c_bo, num_head)
    h2 = _layer_norm(a2 + h2, g2, be2)

    # --- FFN + norm3 ---
    f2 = _ffn(h2, w1_ref[0], b1_ref[0], w2_ref[0], b2)
    h2 = _layer_norm(f2 + h2, g3, be3)

    out_ref[...] = h2.reshape(B, St, D)


def decoder_stack(y0, ctx_bf, src_keep, trg_keep, dp, num_head):
    B, St, D = y0.shape
    Ss = ctx_bf.shape[1]
    L = dp["s_wqkv"].shape[0]
    F = dp["w1"].shape[-1]
    const3 = lambda l: (0, 0, 0)
    const2 = lambda l: (0, 0)
    wmap = lambda l: (l, 0, 0)

    in_specs = [
        pl.BlockSpec((B, St, D), const3),           # y0 (embedded target)
        pl.BlockSpec((B, Ss, D), const3),           # encoder ctx (bf16, resident)
        pl.BlockSpec((B, Ss), const2),              # src pad-keep
        pl.BlockSpec((B, St), const2),              # trg pad-keep
        pl.BlockSpec((1, D, 3 * D), wmap),          # self-attn fused QKV
        pl.BlockSpec((1, D, D), wmap),              # self-attn out proj
        pl.BlockSpec((1, D, D), wmap),              # cross-attn Q
        pl.BlockSpec((1, D, 2 * D), wmap),          # cross-attn fused KV
        pl.BlockSpec((1, D, D), wmap),              # cross-attn out proj
        pl.BlockSpec((1, D, F), wmap),              # FFN w1
        pl.BlockSpec((1, 1, F), wmap),              # FFN b1
        pl.BlockSpec((1, F, D), wmap),              # FFN w2
        pl.BlockSpec((1, DEC_NVEC, D), wmap),       # packed per-layer small vectors
    ]
    return pl.pallas_call(
        functools.partial(_decoder_kernel, num_head=num_head),
        out_shape=jax.ShapeDtypeStruct((B, St, D), jnp.float32),
        grid=(L,),
        in_specs=in_specs,
        out_specs=pl.BlockSpec((B, St, D), const3),
        compiler_params=pltpu.CompilerParams(
            dimension_semantics=("arbitrary",),
            vmem_limit_bytes=_VMEM_LIMIT),
    )(y0, ctx_bf, src_keep, trg_keep,
      dp["s_wqkv"], dp["s_wo"], dp["c_wq"], dp["c_wkv"], dp["c_wo"],
      dp["w1"], dp["b1"], dp["w2"], dp["vec"])


# ----------------------------------------------------------------------------
# Separate V-tiled vocab-projection kernel (un-fused from the decoder stack)
# ----------------------------------------------------------------------------

def _vocab_kernel(h_ref, w_ref, b_ref, o_ref):
    o_ref[...] = (jnp.dot(h_ref[...].astype(w_ref.dtype), w_ref[...],
                          preferred_element_type=jnp.float32) + b_ref[...])


def vocab_projection(h2, fc_w, fc_b):
    """h2: (N, D) fp32; fc_w: (D, V) bf16; fc_b: (1, V) -> (N, V) fp32."""
    N, D = h2.shape
    V = fc_w.shape[-1]
    tm = min(256, N)
    tn = min(512, V)
    return pl.pallas_call(
        _vocab_kernel,
        out_shape=jax.ShapeDtypeStruct((N, V), jnp.float32),
        grid=(pl.cdiv(N, tm), pl.cdiv(V, tn)),
        in_specs=[
            pl.BlockSpec((tm, D), lambda i, j: (i, 0)),
            pl.BlockSpec((D, tn), lambda i, j: (0, j)),
            pl.BlockSpec((1, tn), lambda i, j: (0, j)),
        ],
        out_specs=pl.BlockSpec((tm, tn), lambda i, j: (i, j)),
        compiler_params=pltpu.CompilerParams(
            dimension_semantics=("parallel", "parallel"),
            vmem_limit_bytes=_VMEM_LIMIT),
    )(h2, fc_w, fc_b)


# ----------------------------------------------------------------------------
# JAX glue: pad-keep vectors (masks are finished in-kernel) and embeddings
# ----------------------------------------------------------------------------

def make_keep_vectors(src_ids, trg_ids, src_pad_idx, trg_pad_idx):
    src_keep = (src_ids != src_pad_idx).astype(jnp.float32)   # (B, Ss)
    trg_keep = (trg_ids != trg_pad_idx).astype(jnp.float32)   # (B, St)
    return src_keep, trg_keep


def _embed(tok_emb, pos_emb, ids):
    B, S = ids.shape
    D = tok_emb.shape[1]
    tok = tok_emb[ids] * math.sqrt(D)                         # gather + scale (glue)
    pos = pos_emb[jnp.arange(S)][None, :, :]
    return tok + pos                                          # dropout == identity


def transformer_forward(params, src_ids, trg_ids, *, src_pad_idx, trg_pad_idx, num_head):
    src_keep, trg_keep = make_keep_vectors(src_ids, trg_ids, src_pad_idx, trg_pad_idx)

    x0 = _embed(params["enc_tok"], params["enc_pos"], src_ids)
    ctx = encoder_stack(x0, src_keep, params["enc"], num_head)

    y0 = _embed(params["dec_tok"], params["dec_pos"], trg_ids)
    hid = decoder_stack(y0, ctx.astype(jnp.bfloat16), src_keep, trg_keep,
                        params["dec"], num_head)

    B, St, D = hid.shape
    V = params["dec"]["fc_w"].shape[-1]
    logits = vocab_projection(hid.reshape(B * St, D),
                              params["dec"]["fc_w"], params["dec"]["fc_b"])
    return logits.reshape(B, St, V)


# ----------------------------------------------------------------------------
# Parameter init (synthetic, deterministic). Matmul weights stored in bf16.
# ----------------------------------------------------------------------------

def _dense(key, shape, dtype=jnp.float32, scale=0.02):
    return (jax.random.normal(key, shape, jnp.float32) * scale).astype(dtype)


def init_transformer_params(key, d_model, src_vocab, trg_vocab, n_layers, d_ff=1024):
    D, F, L = d_model, d_ff, n_layers
    bf16 = jnp.bfloat16
    keys = iter(jax.random.split(key, 64))
    nk = lambda: next(keys)
    ones = jnp.ones((L, 1, D), jnp.float32)
    zeros = jnp.zeros((L, 1, D), jnp.float32)
    randD = lambda: _dense(nk(), (L, 1, D))
    pack = lambda rows: jnp.concatenate(rows, axis=1)          # (L, n_vec, D)

    enc = dict(
        wqkv=_dense(nk(), (L, D, 3 * D), bf16),
        wo=_dense(nk(), (L, D, D), bf16),
        w1=_dense(nk(), (L, D, F), bf16),
        b1=_dense(nk(), (L, 1, F)),
        w2=_dense(nk(), (L, F, D), bf16),
        vec=pack([randD(), randD(), randD(),        # bq, bk, bv
                  randD(),                          # bo
                  ones, zeros,                      # g1, be1
                  randD(),                          # b2
                  ones, zeros]),                    # g2, be2
    )

    dec = dict(
        s_wqkv=_dense(nk(), (L, D, 3 * D), bf16),
        s_wo=_dense(nk(), (L, D, D), bf16),
        c_wq=_dense(nk(), (L, D, D), bf16),
        c_wkv=_dense(nk(), (L, D, 2 * D), bf16),
        c_wo=_dense(nk(), (L, D, D), bf16),
        w1=_dense(nk(), (L, D, F), bf16),
        b1=_dense(nk(), (L, 1, F)),
        w2=_dense(nk(), (L, F, D), bf16),
        vec=pack([randD(), randD(), randD(),        # s_bq, s_bk, s_bv
                  randD(),                          # s_bo
                  ones, zeros,                      # g1, be1
                  randD(), randD(), randD(),        # c_bq, c_bk, c_bv
                  randD(),                          # c_bo
                  ones, zeros,                      # g2, be2
                  randD(),                          # b2
                  ones, zeros]),                    # g3, be3
        fc_w=_dense(nk(), (D, trg_vocab), bf16),
        fc_b=_dense(nk(), (1, trg_vocab)),
    )

    return dict(enc_tok=_dense(nk(), (src_vocab, D)), enc_pos=_dense(nk(), (100, D)),
                dec_tok=_dense(nk(), (trg_vocab, D)), dec_pos=_dense(nk(), (100, D)),
                enc=enc, dec=dec)


# ----------------------------------------------------------------------------
# Pure-JAX fp32 reference (torch-equivalent math) for correctness checking
# ----------------------------------------------------------------------------

def _f32(w):
    return w.astype(jnp.float32)


def _ln_ref(x, gamma, beta, eps=1e-5):
    mu = jnp.mean(x, axis=-1, keepdims=True)
    var = jnp.mean((x - mu) ** 2, axis=-1, keepdims=True)
    return (x - mu) / jnp.sqrt(var + eps) * gamma + beta


def _mha_ref(q_in, kv_in, mask, wq, bq, wk, bk, wv, bv, wo, bo, num_head):
    B, Sq, D = q_in.shape
    Sk = kv_in.shape[1]
    hd = D // num_head
    q = q_in @ _f32(wq) + bq
    k = kv_in @ _f32(wk) + bk
    v = kv_in @ _f32(wv) + bv
    q = q.reshape(B, Sq, num_head, hd).transpose(0, 2, 1, 3)
    k = k.reshape(B, Sk, num_head, hd).transpose(0, 2, 1, 3)
    v = v.reshape(B, Sk, num_head, hd).transpose(0, 2, 1, 3)
    s = jnp.einsum("bhqd,bhkd->bhqk", q, k) / math.sqrt(hd)
    s = jnp.where(mask[:, None, :, :] == 0.0, NEG_BIG, s)
    p = jax.nn.softmax(s, axis=-1)
    o = jnp.einsum("bhqk,bhkd->bhqd", p, v).transpose(0, 2, 1, 3).reshape(B, Sq, D)
    return o @ _f32(wo) + bo


def _ffn_ref(x, w1, b1, w2, b2):
    return jnp.maximum(x @ _f32(w1) + b1, 0.0) @ _f32(w2) + b2


def transformer_forward_ref(params, src_ids, trg_ids, *, src_pad_idx, trg_pad_idx, num_head):
    B, Ss = src_ids.shape
    St = trg_ids.shape[1]
    src_keep = (src_ids != src_pad_idx).astype(jnp.float32)
    trg_keep = (trg_ids != trg_pad_idx).astype(jnp.float32)
    causal = jnp.tril(jnp.ones((St, St), jnp.float32))
    enc_mask = jnp.broadcast_to(src_keep[:, None, :], (B, Ss, Ss))
    dec_self = causal[None, :, :] * trg_keep[:, :, None]
    dec_cross = jnp.broadcast_to(src_keep[:, None, :], (B, St, Ss))

    ep, dp = params["enc"], params["dec"]
    D = params["enc_tok"].shape[1]
    L = ep["wqkv"].shape[0]

    h = _embed(params["enc_tok"], params["enc_pos"], src_ids)
    for l in range(L):
        wqkv, vv = ep["wqkv"][l], ep["vec"][l]
        a = _mha_ref(h, h, enc_mask,
                     wqkv[:, :D], vv[0], wqkv[:, D:2 * D], vv[1], wqkv[:, 2 * D:], vv[2],
                     ep["wo"][l], vv[3], num_head)
        y = _ln_ref(a + h, vv[4], vv[5])
        f = _ffn_ref(y, ep["w1"][l], ep["b1"][l], ep["w2"][l], vv[6])
        h = _ln_ref(f + y, vv[7], vv[8])
    ctx = h

    h = _embed(params["dec_tok"], params["dec_pos"], trg_ids)
    for l in range(L):
        sw, cw, vv = dp["s_wqkv"][l], dp["c_wkv"][l], dp["vec"][l]
        a = _mha_ref(h, h, dec_self,
                     sw[:, :D], vv[0], sw[:, D:2 * D], vv[1], sw[:, 2 * D:], vv[2],
                     dp["s_wo"][l], vv[3], num_head)
        h = _ln_ref(a + h, vv[4], vv[5])
        a = _mha_ref(h, ctx, dec_cross,
                     dp["c_wq"][l], vv[6], cw[:, :D], vv[7], cw[:, D:], vv[8],
                     dp["c_wo"][l], vv[9], num_head)
        h = _ln_ref(a + h, vv[10], vv[11])
        f = _ffn_ref(h, dp["w1"][l], dp["b1"][l], dp["w2"][l], vv[12])
        h = _ln_ref(f + h, vv[13], vv[14])
    return h @ _f32(dp["fc_w"]) + dp["fc_b"]


# ----------------------------------------------------------------------------
# Main
# ----------------------------------------------------------------------------

if __name__ == "__main__":
    B, S_SRC, S_TRG = 2, 8, 8
    D_MODEL, N_LAYERS, NUM_HEAD = 128, 2, 4      # num_head=4 is hard-coded in the module
    SRC_VOCAB, TRG_VOCAB = 256, 256              # lane-dense D / V (multiples of 128)
    SRC_PAD, TRG_PAD = 0, 0

    key = jax.random.PRNGKey(0)
    k_par, k_src, k_trg = jax.random.split(key, 3)

    params = init_transformer_params(k_par, D_MODEL, SRC_VOCAB, TRG_VOCAB, N_LAYERS)

    # tokens drawn from [1, vocab) so no pad positions (masks still exercised via tril)
    src_ids = jax.random.randint(k_src, (B, S_SRC), 1, SRC_VOCAB, jnp.int32)
    trg_ids = jax.random.randint(k_trg, (B, S_TRG), 1, TRG_VOCAB, jnp.int32)

    fwd = jax.jit(functools.partial(transformer_forward,
                                    src_pad_idx=SRC_PAD, trg_pad_idx=TRG_PAD,
                                    num_head=NUM_HEAD))
    out = jax.block_until_ready(fwd(params, src_ids, trg_ids))
    assert out.shape == (B, S_TRG, TRG_VOCAB) and out.dtype == jnp.float32

    ref = transformer_forward_ref(params, src_ids, trg_ids,
                                  src_pad_idx=SRC_PAD, trg_pad_idx=TRG_PAD,
                                  num_head=NUM_HEAD)
    max_err = float(jnp.max(jnp.abs(out - ref)))
    assert jnp.allclose(out, ref, atol=2e-2, rtol=2e-2), f"mismatch vs reference: {max_err}"

    print("KERNEL_OK")
</pallas_src>

<mosaic_0001>
module attributes {stable_mosaic.version = 11 : i64} {
  func.func @_vocab_kernel(%arg0: i32, %arg1: i32, %arg2: memref<16x128xf32, #tpu.memory_space<vmem>>, %arg3: memref<128x256xbf16, #tpu.memory_space<vmem>>, %arg4: memref<1x256xf32, #tpu.memory_space<vmem>>, %arg5: memref<16x256xf32, #tpu.memory_space<vmem>>) attributes {dimension_semantics = [#tpu.dimension_semantics<parallel>, #tpu.dimension_semantics<parallel>], iteration_bounds = array<i64: 1, 1>, scalar_prefetch = 0 : i64, scratch_operands = 0 : i64, tpu.core_type = #tpu.core_type<tc>, window_params = [{transform_indices = @transform_0, window_bounds = array<i64: 16, 128>}, {transform_indices = @transform_1, window_bounds = array<i64: 128, 256>}, {transform_indices = @transform_2, window_bounds = array<i64: 1, 256>}, {transform_indices = @transform_3, window_bounds = array<i64: 16, 256>}]} {
    %c0 = arith.constant 0 : index
    %c0_0 = arith.constant 0 : index
    %0 = vector.load %arg2[%c0, %c0_0] : memref<16x128xf32, #tpu.memory_space<vmem>>, vector<16x128xf32>
    %1 = arith.truncf %0 : vector<16x128xf32> to vector<16x128xbf16>
    %c0_1 = arith.constant 0 : index
    %c0_2 = arith.constant 0 : index
    %2 = vector.load %arg3[%c0_1, %c0_2] : memref<128x256xbf16, #tpu.memory_space<vmem>>, vector<128x256xbf16>
    %cst = arith.constant dense<0.000000e+00> : vector<16x256xf32>
    %3 = tpu.matmul %1, %2, %cst {dimension_numbers = #tpu.dot_dimension_numbers<[1], [0], [0], [1], [0, 0, 1, 1], [], []>} : vector<16x128xbf16>, vector<128x256xbf16>, vector<16x256xf32> -> vector<16x256xf32>
    %c0_3 = arith.constant 0 : index
    %c0_4 = arith.constant 0 : index
    %4 = vector.load %arg4[%c0_3, %c0_4] : memref<1x256xf32, #tpu.memory_space<vmem>>, vector<1x256xf32>
    %5 = vector.broadcast %4 : vector<1x256xf32> to vector<16x256xf32>
    %6 = arith.addf %3, %5 : vector<16x256xf32>
    %c0_5 = arith.constant 0 : index
    %c0_6 = arith.constant 0 : index
    %7 = vector.load %arg5[%c0_5, %c0_6] : memref<16x256xf32, #tpu.memory_space<vmem>>, vector<16x256xf32>
    tpu.vector_store %arg5[%c0_5, %c0_6], %6 {strides = array<i32>} : memref<16x256xf32, #tpu.memory_space<vmem>>, vector<16x256xf32>,
    return
  }
  func.func @transform_0(%arg0: i32, %arg1: i32) -> (i32, i32) {
    %c0_i32 = arith.constant 0 : i32
    %c0_i32_0 = arith.constant 0 : i32
    return %arg0, %c0_i32 : i32, i32
  }
  func.func @transform_1(%arg0: i32, %arg1: i32) -> (i32, i32) {
    %c0_i32 = arith.constant 0 : i32
    %c0_i32_0 = arith.constant 0 : i32
    return %c0_i32, %arg1 : i32, i32
  }
  func.func @transform_2(%arg0: i32, %arg1: i32) -> (i32, i32) {
    %c0_i32 = arith.constant 0 : i32
    %c0_i32_0 = arith.constant 0 : i32
    return %c0_i32, %arg1 : i32, i32
  }
  func.func @transform_3(%arg0: i32, %arg1: i32) -> (i32, i32) {
    %c0_i32 = arith.constant 0 : i32
    return %arg0, %arg1 : i32, i32
  }
}

module attributes {stable_mosaic.version = 11 : i64} {
  func.func @_encoder_kernel(%arg0: i32, %arg1: memref<2x8x128xf32, #tpu.memory_space<vmem>>, %arg2: memref<2x8xf32, #tpu.memory_space<vmem>>, %arg3: memref<1x128x384xbf16, #tpu.memory_space<vmem>>, %arg4: memref<1x128x128xbf16, #tpu.memory_space<vmem>>, %arg5: memref<1x128x1024xbf16, #tpu.memory_space<vmem>>, %arg6: memref<1x1x1024xf32, #tpu.memory_space<vmem>>, %arg7: memref<1x1024x128xbf16, #tpu.memory_space<vmem>>, %arg8: memref<1x9x128xf32, #tpu.memory_space<vmem>>, %arg9: memref<2x8x128xf32, #tpu.memory_space<vmem>>) attributes {dimension_semantics = [#tpu.dimension_semantics<arbitrary>], iteration_bounds = array<i64: 2>, scalar_prefetch = 0 : i64, scratch_operands = 0 : i64, tpu.core_type = #tpu.core_type<tc>, window_params = [{pipeline_mode = #tpu.pipeline_mode<synchronous>, transform_indices = @transform_0, window_bounds = array<i64: 2, 8, 128>}, {pipeline_mode = #tpu.pipeline_mode<synchronous>, transform_indices = @transform_1, window_bounds = array<i64: 2, 8>}, {transform_indices = @transform_2, window_bounds = array<i64: 1, 128, 384>}, {transform_indices = @transform_3, window_bounds = array<i64: 1, 128, 128>}, {transform_indices = @transform_4, window_bounds = array<i64: 1, 128, 1024>}, {transform_indices = @transform_5, window_bounds = array<i64: 1, 1, 1024>}, {transform_indices = @transform_6, window_bounds = array<i64: 1, 1024, 128>}, {transform_indices = @transform_7, window_bounds = array<i64: 1, 9, 128>}, {pipeline_mode = #tpu.pipeline_mode<synchronous>, transform_indices = @transform_8, window_bounds = array<i64: 2, 8, 128>}]} {
    %c0_i32 = arith.constant 0 : i32
    %0 = arith.cmpi eq, %arg0, %c0_i32 : i32
    %1 = arith.extui %0 : i1 to i32
    %c0_i32_0 = arith.constant 0 : i32
    %2 = arith.cmpi ne, %1, %c0_i32_0 : i32
    scf.if %2 {
      %c0_65 = arith.constant 0 : index
      %c0_66 = arith.constant 0 : index
      %c0_67 = arith.constant 0 : index
      %193 = vector.load %arg1[%c0_65, %c0_66, %c0_67] : memref<2x8x128xf32, #tpu.memory_space<vmem>>, vector<2x8x128xf32>
      %c0_68 = arith.constant 0 : index
      %c0_69 = arith.constant 0 : index
      %c0_70 = arith.constant 0 : index
      %194 = vector.load %arg9[%c0_68, %c0_69, %c0_70] : memref<2x8x128xf32, #tpu.memory_space<vmem>>, vector<2x8x128xf32>
      tpu.vector_store %arg9[%c0_68, %c0_69, %c0_70], %193 {strides = array<i32>} : memref<2x8x128xf32, #tpu.memory_space<vmem>>, vector<2x8x128xf32>,
    } else {
    }
    %c0 = arith.constant 0 : index
    %c0_1 = arith.constant 0 : index
    %c0_2 = arith.constant 0 : index
    %3 = vector.load %arg9[%c0, %c0_1, %c0_2] : memref<2x8x128xf32, #tpu.memory_space<vmem>>, vector<2x8x128xf32>
    %4 = vector.shape_cast %3 : vector<2x8x128xf32> to vector<16x128xf32>
    %c0_3 = arith.constant 0 : index
    %c0_4 = arith.constant 0 : index
    %c0_5 = arith.constant 0 : index
    %5 = vector.load %arg8[%c0_3, %c0_4, %c0_5] : memref<1x9x128xf32, #tpu.memory_space<vmem>>, vector<1x9x128xf32>
    %6 = vector.shape_cast %5 : vector<1x9x128xf32> to vector<9x128xf32>
    %7 = vector.extract_strided_slice %6 {offsets = [0, 0], sizes = [1, 128], strides = [1, 1]} : vector<9x128xf32> to vector<1x128xf32>
    %8 = vector.extract_strided_slice %6 {offsets = [1, 0], sizes = [1, 128], strides = [1, 1]} : vector<9x128xf32> to vector<1x128xf32>
    %9 = vector.extract_strided_slice %6 {offsets = [2, 0], sizes = [1, 128], strides = [1, 1]} : vector<9x128xf32> to vector<1x128xf32>
    %10 = vector.extract_strided_slice %6 {offsets = [3, 0], sizes = [1, 128], strides = [1, 1]} : vector<9x128xf32> to vector<1x128xf32>
    %11 = vector.extract_strided_slice %6 {offsets = [4, 0], sizes = [1, 128], strides = [1, 1]} : vector<9x128xf32> to vector<1x128xf32>
    %12 = vector.extract_strided_slice %6 {offsets = [5, 0], sizes = [1, 128], strides = [1, 1]} : vector<9x128xf32> to vector<1x128xf32>
    %13 = vector.extract_strided_slice %6 {offsets = [6, 0], sizes = [1, 128], strides = [1, 1]} : vector<9x128xf32> to vector<1x128xf32>
    %14 = vector.extract_strided_slice %6 {offsets = [7, 0], sizes = [1, 128], strides = [1, 1]} : vector<9x128xf32> to vector<1x128xf32>
    %15 = vector.extract_strided_slice %6 {offsets = [8, 0], sizes = [1, 128], strides = [1, 1]} : vector<9x128xf32> to vector<1x128xf32>
    %c0_6 = arith.constant 0 : index
    %c0_7 = arith.constant 0 : index
    %16 = vector.load %arg2[%c0_6, %c0_7] : memref<2x8xf32, #tpu.memory_space<vmem>>, vector<2x8xf32>
    %cst = arith.constant 1.000000e+00 : f32
    %17 = vector.broadcast %cst : f32 to vector<2x8xf32>
    %18 = arith.subf %16, %17 : vector<2x8xf32>
    %cst_8 = arith.constant 1.000000e+10 : f32
    %19 = vector.broadcast %cst_8 : f32 to vector<2x8xf32>
    %20 = arith.mulf %18, %19 : vector<2x8xf32>
    %21 = vector.shape_cast %20 : vector<2x8xf32> to vector<2x1x8xf32>
    %c0_9 = arith.constant 0 : index
    %c0_10 = arith.constant 0 : index
    %c0_11 = arith.constant 0 : index
    %22 = vector.load %arg3[%c0_9, %c0_10, %c0_11] : memref<1x128x384xbf16, #tpu.memory_space<vmem>>, vector<1x128x384xbf16>
    %23 = vector.shape_cast %22 : vector<1x128x384xbf16> to vector<128x384xbf16>
    %24 = arith.truncf %4 : vector<16x128xf32> to vector<16x128xbf16>
    %cst_12 = arith.constant dense<0.000000e+00> : vector<16x384xf32>
    %25 = tpu.matmul %24, %23, %cst_12 {dimension_numbers = #tpu.dot_dimension_numbers<[1], [0], [0], [1], [0, 0, 1, 1], [], []>} : vector<16x128xbf16>, vector<128x384xbf16>, vector<16x384xf32> -> vector<16x384xf32>
    %26 = vector.extract_strided_slice %25 {offsets = [0, 0], sizes = [16, 128], strides = [1, 1]} : vector<16x384xf32> to vector<16x128xf32>
    %27 = vector.broadcast %7 : vector<1x128xf32> to vector<16x128xf32>
    %28 = arith.addf %26, %27 : vector<16x128xf32>
    %29 = vector.shape_cast %28 : vector<16x128xf32> to vector<2x8x128xf32>
    %30 = vector.extract_strided_slice %25 {offsets = [0, 128], sizes = [16, 128], strides = [1, 1]} : vector<16x384xf32> to vector<16x128xf32>
    %31 = vector.broadcast %8 : vector<1x128xf32> to vector<16x128xf32>
    %32 = arith.addf %30, %31 : vector<16x128xf32>
    %33 = vector.shape_cast %32 : vector<16x128xf32> to vector<2x8x128xf32>
    %34 = vector.extract_strided_slice %25 {offsets = [0, 256], sizes = [16, 128], strides = [1, 1]} : vector<16x384xf32> to vector<16x128xf32>
    %35 = vector.broadcast %9 : vector<1x128xf32> to vector<16x128xf32>
    %36 = arith.addf %34, %35 : vector<16x128xf32>
    %37 = vector.shape_cast %36 : vector<16x128xf32> to vector<2x8x128xf32>
    %c0_13 = arith.constant 0 : index
    %c0_14 = arith.constant 0 : index
    %c0_15 = arith.constant 0 : index
    %38 = vector.load %arg4[%c0_13, %c0_14, %c0_15] : memref<1x128x128xbf16, #tpu.memory_space<vmem>>, vector<1x128x128xbf16>
    %39 = vector.shape_cast %38 : vector<1x128x128xbf16> to vector<128x128xbf16>
    %40 = vector.extract_strided_slice %29 {offsets = [0, 0, 0], sizes = [2, 8, 32], strides = [1, 1, 1]} : vector<2x8x128xf32> to vector<2x8x32xf32>
    %41 = vector.extract_strided_slice %33 {offsets = [0, 0, 0], sizes = [2, 8, 32], strides = [1, 1, 1]} : vector<2x8x128xf32> to vector<2x8x32xf32>
    %42 = vector.extract_strided_slice %37 {offsets = [0, 0, 0], sizes = [2, 8, 32], strides = [1, 1, 1]} : vector<2x8x128xf32> to vector<2x8x32xf32>
    %cst_16 = arith.constant dense<0.000000e+00> : vector<2x8x8xf32>
    %43 = tpu.matmul %40, %41, %cst_16 {dimension_numbers = #tpu.dot_dimension_numbers<[2], [2], [1], [1], [0, 0, 0, 1, 1, 1], [0], [0]>} : vector<2x8x32xf32>, vector<2x8x32xf32>, vector<2x8x8xf32> -> vector<2x8x8xf32>
    %cst_17 = arith.constant 0.176776692 : f32
    %44 = vector.broadcast %cst_17 : f32 to vector<2x8x8xf32>
    %45 = arith.mulf %43, %44 : vector<2x8x8xf32>
    %46 = vector.broadcast %21 : vector<2x1x8xf32> to vector<2x8x8xf32>
    %47 = arith.addf %45, %46 : vector<2x8x8xf32>
    %cst_18 = arith.constant dense<0xFF800000> : vector<2x8xf32>
    %48 = vector.multi_reduction <maximumf>, %47, %cst_18 [2] : vector<2x8x8xf32> to vector<2x8xf32>
    %49 = vector.shape_cast %48 : vector<2x8xf32> to vector<2x8x1xf32>
    %50 = vector.broadcast %49 : vector<2x8x1xf32> to vector<2x8x8xf32>
    %51 = arith.subf %47, %50 : vector<2x8x8xf32>
    %52 = math.exp %51 : vector<2x8x8xf32>
    %cst_19 = arith.constant dense<0.000000e+00> : vector<2x8xf32>
    %53 = vector.multi_reduction <add>, %52, %cst_19 [2] : vector<2x8x8xf32> to vector<2x8xf32>
    %54 = vector.shape_cast %53 : vector<2x8xf32> to vector<2x8x1xf32>
    %55 = vector.broadcast %54 : vector<2x8x1xf32> to vector<2x8x8xf32>
    %56 = arith.divf %52, %55 : vector<2x8x8xf32>
    %cst_20 = arith.constant dense<0.000000e+00> : vector<2x8x32xf32>
    %57 = tpu.matmul %56, %42, %cst_20 {dimension_numbers = #tpu.dot_dimension_numbers<[2], [1], [1], [2], [0, 0, 0, 1, 1, 2], [0], [0]>} : vector<2x8x8xf32>, vector<2x8x32xf32>, vector<2x8x32xf32> -> vector<2x8x32xf32>
    %58 = vector.shape_cast %57 : vector<2x8x32xf32> to vector<16x32xf32>
    %59 = arith.truncf %58 : vector<16x32xf32> to vector<16x32xbf16>
    %60 = vector.extract_strided_slice %39 {offsets = [0, 0], sizes = [32, 128], strides = [1, 1]} : vector<128x128xbf16> to vector<32x128xbf16>
    %cst_21 = arith.constant dense<0.000000e+00> : vector<16x128xf32>
    %61 = tpu.matmul %59, %60, %cst_21 {dimension_numbers = #tpu.dot_dimension_numbers<[1], [0], [0], [1], [0, 0, 1, 1], [], []>} : vector<16x32xbf16>, vector<32x128xbf16>, vector<16x128xf32> -> vector<16x128xf32>
    %62 = vector.extract_strided_slice %29 {offsets = [0, 0, 32], sizes = [2, 8, 32], strides = [1, 1, 1]} : vector<2x8x128xf32> to vector<2x8x32xf32>
    %63 = vector.extract_strided_slice %33 {offsets = [0, 0, 32], sizes = [2, 8, 32], strides = [1, 1, 1]} : vector<2x8x128xf32> to vector<2x8x32xf32>
    %64 = vector.extract_strided_slice %37 {offsets = [0, 0, 32], sizes = [2, 8, 32], strides = [1, 1, 1]} : vector<2x8x128xf32> to vector<2x8x32xf32>
    %cst_22 = arith.constant dense<0.000000e+00> : vector<2x8x8xf32>
    %65 = tpu.matmul %62, %63, %cst_22 {dimension_numbers = #tpu.dot_dimension_numbers<[2], [2], [1], [1], [0, 0, 0, 1, 1, 1], [0], [0]>} : vector<2x8x32xf32>, vector<2x8x32xf32>, vector<2x8x8xf32> -> vector<2x8x8xf32>
    %cst_23 = arith.constant 0.176776692 : f32
    %66 = vector.broadcast %cst_23 : f32 to vector<2x8x8xf32>
    %67 = arith.mulf %65, %66 : vector<2x8x8xf32>
    %68 = vector.broadcast %21 : vector<2x1x8xf32> to vector<2x8x8xf32>
    %69 = arith.addf %67, %68 : vector<2x8x8xf32>
    %cst_24 = arith.constant dense<0xFF800000> : vector<2x8xf32>
    %70 = vector.multi_reduction <maximumf>, %69, %cst_24 [2] : vector<2x8x8xf32> to vector<2x8xf32>
    %71 = vector.shape_cast %70 : vector<2x8xf32> to vector<2x8x1xf32>
    %72 = vector.broadcast %71 : vector<2x8x1xf32> to vector<2x8x8xf32>
    %73 = arith.subf %69, %72 : vector<2x8x8xf32>
    %74 = math.exp %73 : vector<2x8x8xf32>
    %cst_25 = arith.constant dense<0.000000e+00> : vector<2x8xf32>
    %75 = vector.multi_reduction <add>, %74, %cst_25 [2] : vector<2x8x8xf32> to vector<2x8xf32>
    %76 = vector.shape_cast %75 : vector<2x8xf32> to vector<2x8x1xf32>
    %77 = vector.broadcast %76 : vector<2x8x1xf32> to vector<2x8x8xf32>
    %78 = arith.divf %74, %77 : vector<2x8x8xf32>
    %cst_26 = arith.constant dense<0.000000e+00> : vector<2x8x32xf32>
    %79 = tpu.matmul %78, %64, %cst_26 {dimension_numbers = #tpu.dot_dimension_numbers<[2], [1], [1], [2], [0, 0, 0, 1, 1, 2], [0], [0]>} : vector<2x8x8xf32>, vector<2x8x32xf32>, vector<2x8x32xf32> -> vector<2x8x32xf32>
    %80 = vector.shape_cast %79 : vector<2x8x32xf32> to vector<16x32xf32>
    %81 = arith.truncf %80 : vector<16x32xf32> to vector<16x32xbf16>
    %82 = vector.extract_strided_slice %39 {offsets = [32, 0], sizes = [32, 128], strides = [1, 1]} : vector<128x128xbf16> to vector<32x128xbf16>
    %cst_27 = arith.constant dense<0.000000e+00> : vector<16x128xf32>
    %83 = tpu.matmul %81, %82, %cst_27 {dimension_numbers = #tpu.dot_dimension_numbers<[1], [0], [0], [1], [0, 0, 1, 1], [], []>} : vector<16x32xbf16>, vector<32x128xbf16>, vector<16x128xf32> -> vector<16x128xf32>
    %84 = arith.addf %61, %83 : vector<16x128xf32>
    %85 = vector.extract_strided_slice %29 {offsets = [0, 0, 64], sizes = [2, 8, 32], strides = [1, 1, 1]} : vector<2x8x128xf32> to vector<2x8x32xf32>
    %86 = vector.extract_strided_slice %33 {offsets = [0, 0, 64], sizes = [2, 8, 32], strides = [1, 1, 1]} : vector<2x8x128xf32> to vector<2x8x32xf32>
    %87 = vector.extract_strided_slice %37 {offsets = [0, 0, 64], sizes = [2, 8, 32], strides = [1, 1, 1]} : vector<2x8x128xf32> to vector<2x8x32xf32>
    %cst_28 = arith.constant dense<0.000000e+00> : vector<2x8x8xf32>
    %88 = tpu.matmul %85, %86, %cst_28 {dimension_numbers = #tpu.dot_dimension_numbers<[2], [2], [1], [1], [0, 0, 0, 1, 1, 1], [0], [0]>} : vector<2x8x32xf32>, vector<2x8x32xf32>, vector<2x8x8xf32> -> vector<2x8x8xf32>
    %cst_29 = arith.constant 0.176776692 : f32
    %89 = vector.broadcast %cst_29 : f32 to vector<2x8x8xf32>
    %90 = arith.mulf %88, %89 : vector<2x8x8xf32>
    %91 = vector.broadcast %21 : vector<2x1x8xf32> to vector<2x8x8xf32>
    %92 = arith.addf %90, %91 : vector<2x8x8xf32>
    %cst_30 = arith.constant dense<0xFF800000> : vector<2x8xf32>
    %93 = vector.multi_reduction <maximumf>, %92, %cst_30 [2] : vector<2x8x8xf32> to vector<2x8xf32>
    %94 = vector.shape_cast %93 : vector<2x8xf32> to vector<2x8x1xf32>
    %95 = vector.broadcast %94 : vector<2x8x1xf32> to vector<2x8x8xf32>
    %96 = arith.subf %92, %95 : vector<2x8x8xf32>
    %97 = math.exp %96 : vector<2x8x8xf32>
    %cst_31 = arith.constant dense<0.000000e+00> : vector<2x8xf32>
    %98 = vector.multi_reduction <add>, %97, %cst_31 [2] : vector<2x8x8xf32> to vector<2x8xf32>
    %99 = vector.shape_cast %98 : vector<2x8xf32> to vector<2x8x1xf32>
    %100 = vector.broadcast %99 : vector<2x8x1xf32> to vector<2x8x8xf32>
    %101 = arith.divf %97, %100 : vector<2x8x8xf32>
    %cst_32 = arith.constant dense<0.000000e+00> : vector<2x8x32xf32>
    %102 = tpu.matmul %101, %87, %cst_32 {dimension_numbers = #tpu.dot_dimension_numbers<[2], [1], [1], [2], [0, 0, 0, 1, 1, 2], [0], [0]>} : vector<2x8x8xf32>, vector<2x8x32xf32>, vector<2x8x32xf32> -> vector<2x8x32xf32>
    %103 = vector.shape_cast %102 : vector<2x8x32xf32> to vector<16x32xf32>
    %104 = arith.truncf %103 : vector<16x32xf32> to vector<16x32xbf16>
    %105 = vector.extract_strided_slice %39 {offsets = [64, 0], sizes = [32, 128], strides = [1, 1]} : vector<128x128xbf16> to vector<32x128xbf16>
    %cst_33 = arith.constant dense<0.000000e+00> : vector<16x128xf32>
    %106 = tpu.matmul %104, %105, %cst_33 {dimension_numbers = #tpu.dot_dimension_numbers<[1], [0], [0], [1], [0, 0, 1, 1], [], []>} : vector<16x32xbf16>, vector<32x128xbf16>, vector<16x128xf32> -> vector<16x128xf32>
    %107 = arith.addf %84, %106 : vector<16x128xf32>
    %108 = vector.extract_strided_slice %29 {offsets = [0, 0, 96], sizes = [2, 8, 32], strides = [1, 1, 1]} : vector<2x8x128xf32> to vector<2x8x32xf32>
    %109 = vector.extract_strided_slice %33 {offsets = [0, 0, 96], sizes = [2, 8, 32], strides = [1, 1, 1]} : vector<2x8x128xf32> to vector<2x8x32xf32>
    %110 = vector.extract_strided_slice %37 {offsets = [0, 0, 96], sizes = [2, 8, 32], strides = [1, 1, 1]} : vector<2x8x128xf32> to vector<2x8x32xf32>
    %cst_34 = arith.constant dense<0.000000e+00> : vector<2x8x8xf32>
    %111 = tpu.matmul %108, %109, %cst_34 {dimension_numbers = #tpu.dot_dimension_numbers<[2], [2], [1], [1], [0, 0, 0, 1, 1, 1], [0], [0]>} : vector<2x8x32xf32>, vector<2x8x32xf32>, vector<2x8x8xf32> -> vector<2x8x8xf32>
    %cst_35 = arith.constant 0.176776692 : f32
    %112 = vector.broadcast %cst_35 : f32 to vector<2x8x8xf32>
    %113 = arith.mulf %111, %112 : vector<2x8x8xf32>
    %114 = vector.broadcast %21 : vector<2x1x8xf32> to vector<2x8x8xf32>
    %115 = arith.addf %113, %114 : vector<2x8x8xf32>
    %cst_36 = arith.constant dense<0xFF800000> : vector<2x8xf32>
    %116 = vector.multi_reduction <maximumf>, %115, %cst_36 [2] : vector<2x8x8xf32> to vector<2x8xf32>
    %117 = vector.shape_cast %116 : vector<2x8xf32> to vector<2x8x1xf32>
    %118 = vector.broadcast %117 : vector<2x8x1xf32> to vector<2x8x8xf32>
    %119 = arith.subf %115, %118 : vector<2x8x8xf32>
    %120 = math.exp %119 : vector<2x8x8xf32>
    %cst_37 = arith.constant dense<0.000000e+00> : vector<2x8xf32>
    %121 = vector.multi_reduction <add>, %120, %cst_37 [2] : vector<2x8x8xf32> to vector<2x8xf32>
    %122 = vector.shape_cast %121 : vector<2x8xf32> to vector<2x8x1xf32>
    %123 = vector.broadcast %122 : vector<2x8x1xf32> to vector<2x8x8xf32>
    %124 = arith.divf %120, %123 : vector<2x8x8xf32>
    %cst_38 = arith.constant dense<0.000000e+00> : vector<2x8x32xf32>
    %125 = tpu.matmul %124, %110, %cst_38 {dimension_numbers = #tpu.dot_dimension_numbers<[2], [1], [1], [2], [0, 0, 0, 1, 1, 2], [0], [0]>} : vector<2x8x8xf32>, vector<2x8x32xf32>, vector<2x8x32xf32> -> vector<2x8x32xf32>
    %126 = vector.shape_cast %125 : vector<2x8x32xf32> to vector<16x32xf32>
    %127 = arith.truncf %126 : vector<16x32xf32> to vector<16x32xbf16>
    %128 = vector.extract_strided_slice %39 {offsets = [96, 0], sizes = [32, 128], strides = [1, 1]} : vector<128x128xbf16> to vector<32x128xbf16>
    %cst_39 = arith.constant dense<0.000000e+00> : vector<16x128xf32>
    %129 = tpu.matmul %127, %128, %cst_39 {dimension_numbers = #tpu.dot_dimension_numbers<[1], [0], [0], [1], [0, 0, 1, 1], [], []>} : vector<16x32xbf16>, vector<32x128xbf16>, vector<16x128xf32> -> vector<16x128xf32>
    %130 = arith.addf %107, %129 : vector<16x128xf32>
    %131 = vector.broadcast %10 : vector<1x128xf32> to vector<16x128xf32>
    %132 = arith.addf %130, %131 : vector<16x128xf32>
    %133 = arith.addf %132, %4 : vector<16x128xf32>
    %cst_40 = arith.constant dense<0.000000e+00> : vector<16xf32>
    %134 = vector.multi_reduction <add>, %133, %cst_40 [1] : vector<16x128xf32> to vector<16xf32>
    %135 = vector.shape_cast %134 : vector<16xf32> to vector<16x1xf32>
    %cst_41 = arith.constant 1.280000e+02 : f32
    %136 = vector.broadcast %cst_41 : f32 to vector<16x1xf32>
    %137 = arith.divf %135, %136 : vector<16x1xf32>
    %138 = vector.broadcast %137 : vector<16x1xf32> to vector<16x128xf32>
    %139 = arith.subf %133, %138 : vector<16x128xf32>
    %140 = arith.mulf %139, %139 : vector<16x128xf32>
    %cst_42 = arith.constant dense<0.000000e+00> : vector<16xf32>
    %141 = vector.multi_reduction <add>, %140, %cst_42 [1] : vector<16x128xf32> to vector<16xf32>
    %142 = vector.shape_cast %141 : vector<16xf32> to vector<16x1xf32>
    %cst_43 = arith.constant 1.280000e+02 : f32
    %143 = vector.broadcast %cst_43 : f32 to vector<16x1xf32>
    %144 = arith.divf %142, %143 : vector<16x1xf32>
    %cst_44 = arith.constant 9.99999974E-6 : f32
    %145 = vector.broadcast %cst_44 : f32 to vector<16x1xf32>
    %146 = arith.addf %144, %145 : vector<16x1xf32>
    %147 = math.rsqrt %146 : vector<16x1xf32>
    %148 = vector.broadcast %147 : vector<16x1xf32> to vector<16x128xf32>
    %149 = arith.mulf %139, %148 : vector<16x128xf32>
    %150 = vector.broadcast %11 : vector<1x128xf32> to vector<16x128xf32>
    %151 = arith.mulf %149, %150 : vector<16x128xf32>
    %152 = vector.broadcast %12 : vector<1x128xf32> to vector<16x128xf32>
    %153 = arith.addf %151, %152 : vector<16x128xf32>
    %c0_45 = arith.constant 0 : index
    %c0_46 = arith.constant 0 : index
    %c0_47 = arith.constant 0 : index
    %154 = vector.load %arg5[%c0_45, %c0_46, %c0_47] : memref<1x128x1024xbf16, #tpu.memory_space<vmem>>, vector<1x128x1024xbf16>
    %155 = vector.shape_cast %154 : vector<1x128x1024xbf16> to vector<128x1024xbf16>
    %c0_48 = arith.constant 0 : index
    %c0_49 = arith.constant 0 : index
    %c0_50 = arith.constant 0 : index
    %156 = vector.load %arg6[%c0_48, %c0_49, %c0_50] : memref<1x1x1024xf32, #tpu.memory_space<vmem>>, vector<1x1x1024xf32>
    %157 = vector.shape_cast %156 : vector<1x1x1024xf32> to vector<1x1024xf32>
    %c0_51 = arith.constant 0 : index
    %c0_52 = arith.constant 0 : index
    %c0_53 = arith.constant 0 : index
    %158 = vector.load %arg7[%c0_51, %c0_52, %c0_53] : memref<1x1024x128xbf16, #tpu.memory_space<vmem>>, vector<1x1024x128xbf16>
    %159 = vector.shape_cast %158 : vector<1x1024x128xbf16> to vector<1024x128xbf16>
    %160 = arith.truncf %153 : vector<16x128xf32> to vector<16x128xbf16>
    %cst_54 = arith.constant dense<0.000000e+00> : vector<16x1024xf32>
    %161 = tpu.matmul %160, %155, %cst_54 {dimension_numbers = #tpu.dot_dimension_numbers<[1], [0], [0], [1], [0, 0, 1, 1], [], []>} : vector<16x128xbf16>, vector<128x1024xbf16>, vector<16x1024xf32> -> vector<16x1024xf32>
    %162 = vector.broadcast %157 : vector<1x1024xf32> to vector<16x1024xf32>
    %163 = arith.addf %161, %162 : vector<16x1024xf32>
    %cst_55 = arith.constant 0.000000e+00 : f32
    %164 = vector.broadcast %cst_55 : f32 to vector<16x1024xf32>
    %165 = arith.maximumf %163, %164 : vector<16x1024xf32>
    %166 = arith.truncf %165 : vector<16x1024xf32> to vector<16x1024xbf16>
    %cst_56 = arith.constant dense<0.000000e+00> : vector<16x128xf32>
    %167 = tpu.matmul %166, %159, %cst_56 {dimension_numbers = #tpu.dot_dimension_numbers<[1], [0], [0], [1], [0, 0, 1, 1], [], []>} : vector<16x1024xbf16>, vector<1024x128xbf16>, vector<16x128xf32> -> vector<16x128xf32>
    %168 = vector.broadcast %13 : vector<1x128xf32> to vector<16x128xf32>
    %169 = arith.addf %167, %168 : vector<16x128xf32>
    %170 = arith.addf %169, %153 : vector<16x128xf32>
    %cst_57 = arith.constant dense<0.000000e+00> : vector<16xf32>
    %171 = vector.multi_reduction <add>, %170, %cst_57 [1] : vector<16x128xf32> to vector<16xf32>
    %172 = vector.shape_cast %171 : vector<16xf32> to vector<16x1xf32>
    %cst_58 = arith.constant 1.280000e+02 : f32
    %173 = vector.broadcast %cst_58 : f32 to vector<16x1xf32>
    %174 = arith.divf %172, %173 : vector<16x1xf32>
    %175 = vector.broadcast %174 : vector<16x1xf32> to vector<16x128xf32>
    %176 = arith.subf %170, %175 : vector<16x128xf32>
    %177 = arith.mulf %176, %176 : vector<16x128xf32>
    %cst_59 = arith.constant dense<0.000000e+00> : vector<16xf32>
    %178 = vector.multi_reduction <add>, %177, %cst_59 [1] : vector<16x128xf32> to vector<16xf32>
    %179 = vector.shape_cast %178 : vector<16xf32> to vector<16x1xf32>
    %cst_60 = arith.constant 1.280000e+02 : f32
    %180 = vector.broadcast %cst_60 : f32 to vector<16x1xf32>
    %181 = arith.divf %179, %180 : vector<16x1xf32>
    %cst_61 = arith.constant 9.99999974E-6 : f32
    %182 = vector.broadcast %cst_61 : f32 to vector<16x1xf32>
    %183 = arith.addf %181, %182 : vector<16x1xf32>
    %184 = math.rsqrt %183 : vector<16x1xf32>
    %185 = vector.broadcast %184 : vector<16x1xf32> to vector<16x128xf32>
    %186 = arith.mulf %176, %185 : vector<16x128xf32>
    %187 = vector.broadcast %14 : vector<1x128xf32> to vector<16x128xf32>
    %188 = arith.mulf %186, %187 : vector<16x128xf32>
    %189 = vector.broadcast %15 : vector<1x128xf32> to vector<16x128xf32>
    %190 = arith.addf %188, %189 : vector<16x128xf32>
    %191 = vector.shape_cast %190 : vector<16x128xf32> to vector<2x8x128xf32>
    %c0_62 = arith.constant 0 : index
    %c0_63 = arith.constant 0 : index
    %c0_64 = arith.constant 0 : index
    %192 = vector.load %arg9[%c0_62, %c0_63, %c0_64] : memref<2x8x128xf32, #tpu.memory_space<vmem>>, vector<2x8x128xf32>
    tpu.vector_store %arg9[%c0_62, %c0_63, %c0_64], %191 {strides = array<i32>} : memref<2x8x128xf32, #tpu.memory_space<vmem>>, vector<2x8x128xf32>,
    return
  }
  func.func @transform_0(%arg0: i32) -> (i32, i32, i32) {
    %c0_i32 = arith.constant 0 : i32
    %c0_i32_0 = arith.constant 0 : i32
    %c0_i32_1 = arith.constant 0 : i32
    %c0_i32_2 = arith.constant 0 : i32
    return %c0_i32, %c0_i32_0, %c0_i32_1 : i32, i32, i32
  }
  func.func @transform_1(%arg0: i32) -> (i32, i32) {
    %c0_i32 = arith.constant 0 : i32
    %c0_i32_0 = arith.constant 0 : i32
    %c0_i32_1 = arith.constant 0 : i32
    return %c0_i32, %c0_i32_0 : i32, i32
  }
  func.func @transform_2(%arg0: i32) -> (i32, i32, i32) {
    %c0_i32 = arith.constant 0 : i32
    %c0_i32_0 = arith.constant 0 : i32
    %c0_i32_1 = arith.constant 0 : i32
    return %arg0, %c0_i32, %c0_i32_0 : i32, i32, i32
  }
  func.func @transform_3(%arg0: i32) -> (i32, i32, i32) {
    %c0_i32 = arith.constant 0 : i32
    %c0_i32_0 = arith.constant 0 : i32
    %c0_i32_1 = arith.constant 0 : i32
    return %arg0, %c0_i32, %c0_i32_0 : i32, i32, i32
  }
  func.func @transform_4(%arg0: i32) -> (i32, i32, i32) {
    %c0_i32 = arith.constant 0 : i32
    %c0_i32_0 = arith.constant 0 : i32
    %c0_i32_1 = arith.constant 0 : i32
    return %arg0, %c0_i32, %c0_i32_0 : i32, i32, i32
  }
  func.func @transform_5(%arg0: i32) -> (i32, i32, i32) {
    %c0_i32 = arith.constant 0 : i32
    %c0_i32_0 = arith.constant 0 : i32
    %c0_i32_1 = arith.constant 0 : i32
    return %arg0, %c0_i32, %c0_i32_0 : i32, i32, i32
  }
  func.func @transform_6(%arg0: i32) -> (i32, i32, i32) {
    %c0_i32 = arith.constant 0 : i32
    %c0_i32_0 = arith.constant 0 : i32
    %c0_i32_1 = arith.constant 0 : i32
    return %arg0, %c0_i32, %c0_i32_0 : i32, i32, i32
  }
  func.func @transform_7(%arg0: i32) -> (i32, i32, i32) {
    %c0_i32 = arith.constant 0 : i32
    %c0_i32_0 = arith.constant 0 : i32
    %c0_i32_1 = arith.constant 0 : i32
    return %arg0, %c0_i32, %c0_i32_0 : i32, i32, i32
  }
  func.func @transform_8(%arg0: i32) -> (i32, i32, i32) {
    %c0_i32 = arith.constant 0 : i32
    %c0_i32_0 = arith.constant 0 : i32
    %c0_i32_1 = arith.constant 0 : i32
    %c0_i32_2 = arith.constant 0 : i32
    return %c0_i32, %c0_i32_0, %c0_i32_1 : i32, i32, i32
  }
}

module attributes {stable_mosaic.version = 11 : i64} {
  func.func @_decoder_kernel(%arg0: i32, %arg1: memref<2x8x128xf32, #tpu.memory_space<vmem>>, %arg2: memref<2x8x128xbf16, #tpu.memory_space<vmem>>, %arg3: memref<2x8xf32, #tpu.memory_space<vmem>>, %arg4: memref<2x8xf32, #tpu.memory_space<vmem>>, %arg5: memref<1x128x384xbf16, #tpu.memory_space<vmem>>, %arg6: memref<1x128x128xbf16, #tpu.memory_space<vmem>>, %arg7: memref<1x128x128xbf16, #tpu.memory_space<vmem>>, %arg8: memref<1x128x256xbf16, #tpu.memory_space<vmem>>, %arg9: memref<1x128x128xbf16, #tpu.memory_space<vmem>>, %arg10: memref<1x128x1024xbf16, #tpu.memory_space<vmem>>, %arg11: memref<1x1x1024xf32, #tpu.memory_space<vmem>>, %arg12: memref<1x1024x128xbf16, #tpu.memory_space<vmem>>, %arg13: memref<1x15x128xf32, #tpu.memory_space<vmem>>, %arg14: memref<2x8x128xf32, #tpu.memory_space<vmem>>) attributes {dimension_semantics = [#tpu.dimension_semantics<arbitrary>], iteration_bounds = array<i64: 2>, scalar_prefetch = 0 : i64, scratch_operands = 0 : i64, tpu.core_type = #tpu.core_type<tc>, window_params = [{pipeline_mode = #tpu.pipeline_mode<synchronous>, transform_indices = @transform_0, window_bounds = array<i64: 2, 8, 128>}, {pipeline_mode = #tpu.pipeline_mode<synchronous>, transform_indices = @transform_1, window_bounds = array<i64: 2, 8, 128>}, {pipeline_mode = #tpu.pipeline_mode<synchronous>, transform_indices = @transform_2, window_bounds = array<i64: 2, 8>}, {pipeline_mode = #tpu.pipeline_mode<synchronous>, transform_indices = @transform_3, window_bounds = array<i64: 2, 8>}, {transform_indices = @transform_4, window_bounds = array<i64: 1, 128, 384>}, {transform_indices = @transform_5, window_bounds = array<i64: 1, 128, 128>}, {transform_indices = @transform_6, window_bounds = array<i64: 1, 128, 128>}, {transform_indices = @transform_7, window_bounds = array<i64: 1, 128, 256>}, {transform_indices = @transform_8, window_bounds = array<i64: 1, 128, 128>}, {transform_indices = @transform_9, window_bounds = array<i64: 1, 128, 1024>}, {transform_indices = @transform_10, window_bounds = array<i64: 1, 1, 1024>}, {transform_indices = @transform_11, window_bounds = array<i64: 1, 1024, 128>}, {transform_indices = @transform_12, window_bounds = array<i64: 1, 15, 128>}, {pipeline_mode = #tpu.pipeline_mode<synchronous>, transform_indices = @transform_13, window_bounds = array<i64: 2, 8, 128>}]} {
    %c0_i32 = arith.constant 0 : i32
    %0 = arith.cmpi eq, %arg0, %c0_i32 : i32
    %1 = arith.extui %0 : i1 to i32
    %c0_i32_0 = arith.constant 0 : i32
    %2 = arith.cmpi ne, %1, %c0_i32_0 : i32
    scf.if %2 {
      %c0_114 = arith.constant 0 : index
      %c0_115 = arith.constant 0 : index
      %c0_116 = arith.constant 0 : index
      %347 = vector.load %arg1[%c0_114, %c0_115, %c0_116] : memref<2x8x128xf32, #tpu.memory_space<vmem>>, vector<2x8x128xf32>
      %c0_117 = arith.constant 0 : index
      %c0_118 = arith.constant 0 : index
      %c0_119 = arith.constant 0 : index
      %348 = vector.load %arg14[%c0_117, %c0_118, %c0_119] : memref<2x8x128xf32, #tpu.memory_space<vmem>>, vector<2x8x128xf32>
      tpu.vector_store %arg14[%c0_117, %c0_118, %c0_119], %347 {strides = array<i32>} : memref<2x8x128xf32, #tpu.memory_space<vmem>>, vector<2x8x128xf32>,
    } else {
    }
    %c0 = arith.constant 0 : index
    %c0_1 = arith.constant 0 : index
    %c0_2 = arith.constant 0 : index
    %3 = vector.load %arg14[%c0, %c0_1, %c0_2] : memref<2x8x128xf32, #tpu.memory_space<vmem>>, vector<2x8x128xf32>
    %4 = vector.shape_cast %3 : vector<2x8x128xf32> to vector<16x128xf32>
    %c0_3 = arith.constant 0 : index
    %c0_4 = arith.constant 0 : index
    %c0_5 = arith.constant 0 : index
    %5 = vector.load %arg2[%c0_3, %c0_4, %c0_5] : memref<2x8x128xbf16, #tpu.memory_space<vmem>>, vector<2x8x128xbf16>
    %6 = vector.shape_cast %5 : vector<2x8x128xbf16> to vector<16x128xbf16>
    %c0_6 = arith.constant 0 : index
    %c0_7 = arith.constant 0 : index
    %c0_8 = arith.constant 0 : index
    %7 = vector.load %arg13[%c0_6, %c0_7, %c0_8] : memref<1x15x128xf32, #tpu.memory_space<vmem>>, vector<1x15x128xf32>
    %8 = vector.shape_cast %7 : vector<1x15x128xf32> to vector<15x128xf32>
    %9 = vector.extract_strided_slice %8 {offsets = [0, 0], sizes = [1, 128], strides = [1, 1]} : vector<15x128xf32> to vector<1x128xf32>
    %10 = vector.extract_strided_slice %8 {offsets = [1, 0], sizes = [1, 128], strides = [1, 1]} : vector<15x128xf32> to vector<1x128xf32>
    %11 = vector.extract_strided_slice %8 {offsets = [2, 0], sizes = [1, 128], strides = [1, 1]} : vector<15x128xf32> to vector<1x128xf32>
    %12 = vector.extract_strided_slice %8 {offsets = [3, 0], sizes = [1, 128], strides = [1, 1]} : vector<15x128xf32> to vector<1x128xf32>
    %13 = vector.extract_strided_slice %8 {offsets = [4, 0], sizes = [1, 128], strides = [1, 1]} : vector<15x128xf32> to vector<1x128xf32>
    %14 = vector.extract_strided_slice %8 {offsets = [5, 0], sizes = [1, 128], strides = [1, 1]} : vector<15x128xf32> to vector<1x128xf32>
    %15 = vector.extract_strided_slice %8 {offsets = [6, 0], sizes = [1, 128], strides = [1, 1]} : vector<15x128xf32> to vector<1x128xf32>
    %16 = vector.extract_strided_slice %8 {offsets = [7, 0], sizes = [1, 128], strides = [1, 1]} : vector<15x128xf32> to vector<1x128xf32>
    %17 = vector.extract_strided_slice %8 {offsets = [8, 0], sizes = [1, 128], strides = [1, 1]} : vector<15x128xf32> to vector<1x128xf32>
    %18 = vector.extract_strided_slice %8 {offsets = [9, 0], sizes = [1, 128], strides = [1, 1]} : vector<15x128xf32> to vector<1x128xf32>
    %19 = vector.extract_strided_slice %8 {offsets = [10, 0], sizes = [1, 128], strides = [1, 1]} : vector<15x128xf32> to vector<1x128xf32>
    %20 = vector.extract_strided_slice %8 {offsets = [11, 0], sizes = [1, 128], strides = [1, 1]} : vector<15x128xf32> to vector<1x128xf32>
    %21 = vector.extract_strided_slice %8 {offsets = [12, 0], sizes = [1, 128], strides = [1, 1]} : vector<15x128xf32> to vector<1x128xf32>
    %22 = vector.extract_strided_slice %8 {offsets = [13, 0], sizes = [1, 128], strides = [1, 1]} : vector<15x128xf32> to vector<1x128xf32>
    %23 = vector.extract_strided_slice %8 {offsets = [14, 0], sizes = [1, 128], strides = [1, 1]} : vector<15x128xf32> to vector<1x128xf32>
    %24 = tpu.iota {dimensions = array<i32: 0>} : vector<8x8xi32>
    %25 = tpu.iota {dimensions = array<i32: 1>} : vector<8x8xi32>
    %26 = arith.cmpi sge, %24, %25 : vector<8x8xi32>
    %cst = arith.constant 0.000000e+00 : f32
    %cst_9 = arith.constant -1.000000e+10 : f32
    %27 = vector.broadcast %cst : f32 to vector<8x8xf32>
    %28 = vector.broadcast %cst_9 : f32 to vector<8x8xf32>
    %29 = arith.select %26, %27, %28 : vector<8x8xi1>, vector<8x8xf32>
    %30 = vector.shape_cast %29 : vector<8x8xf32> to vector<1x8x8xf32>
    %c0_10 = arith.constant 0 : index
    %c0_11 = arith.constant 0 : index
    %31 = vector.load %arg4[%c0_10, %c0_11] : memref<2x8xf32, #tpu.memory_space<vmem>>, vector<2x8xf32>
    %cst_12 = arith.constant 1.000000e+00 : f32
    %32 = vector.broadcast %cst_12 : f32 to vector<2x8xf32>
    %33 = arith.subf %31, %32 : vector<2x8xf32>
    %cst_13 = arith.constant 1.000000e+10 : f32
    %34 = vector.broadcast %cst_13 : f32 to vector<2x8xf32>
    %35 = arith.mulf %33, %34 : vector<2x8xf32>
    %36 = vector.shape_cast %35 : vector<2x8xf32> to vector<2x8x1xf32>
    %37 = vector.broadcast %30 : vector<1x8x8xf32> to vector<2x8x8xf32>
    %38 = vector.broadcast %36 : vector<2x8x1xf32> to vector<2x8x8xf32>
    %39 = arith.addf %37, %38 : vector<2x8x8xf32>
    %c0_14 = arith.constant 0 : index
    %c0_15 = arith.constant 0 : index
    %40 = vector.load %arg3[%c0_14, %c0_15] : memref<2x8xf32, #tpu.memory_space<vmem>>, vector<2x8xf32>
    %cst_16 = arith.constant 1.000000e+00 : f32
    %41 = vector.broadcast %cst_16 : f32 to vector<2x8xf32>
    %42 = arith.subf %40, %41 : vector<2x8xf32>
    %cst_17 = arith.constant 1.000000e+10 : f32
    %43 = vector.broadcast %cst_17 : f32 to vector<2x8xf32>
    %44 = arith.mulf %42, %43 : vector<2x8xf32>
    %45 = vector.shape_cast %44 : vector<2x8xf32> to vector<2x1x8xf32>
    %c0_18 = arith.constant 0 : index
    %c0_19 = arith.constant 0 : index
    %c0_20 = arith.constant 0 : index
    %46 = vector.load %arg5[%c0_18, %c0_19, %c0_20] : memref<1x128x384xbf16, #tpu.memory_space<vmem>>, vector<1x128x384xbf16>
    %47 = vector.shape_cast %46 : vector<1x128x384xbf16> to vector<128x384xbf16>
    %48 = arith.truncf %4 : vector<16x128xf32> to vector<16x128xbf16>
    %cst_21 = arith.constant dense<0.000000e+00> : vector<16x384xf32>
    %49 = tpu.matmul %48, %47, %cst_21 {dimension_numbers = #tpu.dot_dimension_numbers<[1], [0], [0], [1], [0, 0, 1, 1], [], []>} : vector<16x128xbf16>, vector<128x384xbf16>, vector<16x384xf32> -> vector<16x384xf32>
    %50 = vector.extract_strided_slice %49 {offsets = [0, 0], sizes = [16, 128], strides = [1, 1]} : vector<16x384xf32> to vector<16x128xf32>
    %51 = vector.broadcast %9 : vector<1x128xf32> to vector<16x128xf32>
    %52 = arith.addf %50, %51 : vector<16x128xf32>
    %53 = vector.shape_cast %52 : vector<16x128xf32> to vector<2x8x128xf32>
    %54 = vector.extract_strided_slice %49 {offsets = [0, 128], sizes = [16, 128], strides = [1, 1]} : vector<16x384xf32> to vector<16x128xf32>
    %55 = vector.broadcast %10 : vector<1x128xf32> to vector<16x128xf32>
    %56 = arith.addf %54, %55 : vector<16x128xf32>
    %57 = vector.shape_cast %56 : vector<16x128xf32> to vector<2x8x128xf32>
    %58 = vector.extract_strided_slice %49 {offsets = [0, 256], sizes = [16, 128], strides = [1, 1]} : vector<16x384xf32> to vector<16x128xf32>
    %59 = vector.broadcast %11 : vector<1x128xf32> to vector<16x128xf32>
    %60 = arith.addf %58, %59 : vector<16x128xf32>
    %61 = vector.shape_cast %60 : vector<16x128xf32> to vector<2x8x128xf32>
    %c0_22 = arith.constant 0 : index
    %c0_23 = arith.constant 0 : index
    %c0_24 = arith.constant 0 : index
    %62 = vector.load %arg6[%c0_22, %c0_23, %c0_24] : memref<1x128x128xbf16, #tpu.memory_space<vmem>>, vector<1x128x128xbf16>
    %63 = vector.shape_cast %62 : vector<1x128x128xbf16> to vector<128x128xbf16>
    %64 = vector.extract_strided_slice %53 {offsets = [0, 0, 0], sizes = [2, 8, 32], strides = [1, 1, 1]} : vector<2x8x128xf32> to vector<2x8x32xf32>
    %65 = vector.extract_strided_slice %57 {offsets = [0, 0, 0], sizes = [2, 8, 32], strides = [1, 1, 1]} : vector<2x8x128xf32> to vector<2x8x32xf32>
    %66 = vector.extract_strided_slice %61 {offsets = [0, 0, 0], sizes = [2, 8, 32], strides = [1, 1, 1]} : vector<2x8x128xf32> to vector<2x8x32xf32>
    %cst_25 = arith.constant dense<0.000000e+00> : vector<2x8x8xf32>
    %67 = tpu.matmul %64, %65, %cst_25 {dimension_numbers = #tpu.dot_dimension_numbers<[2], [2], [1], [1], [0, 0, 0, 1, 1, 1], [0], [0]>} : vector<2x8x32xf32>, vector<2x8x32xf32>, vector<2x8x8xf32> -> vector<2x8x8xf32>
    %cst_26 = arith.constant 0.176776692 : f32
    %68 = vector.broadcast %cst_26 : f32 to vector<2x8x8xf32>
    %69 = arith.mulf %67, %68 : vector<2x8x8xf32>
    %70 = arith.addf %69, %39 : vector<2x8x8xf32>
    %cst_27 = arith.constant dense<0xFF800000> : vector<2x8xf32>
    %71 = vector.multi_reduction <maximumf>, %70, %cst_27 [2] : vector<2x8x8xf32> to vector<2x8xf32>
    %72 = vector.shape_cast %71 : vector<2x8xf32> to vector<2x8x1xf32>
    %73 = vector.broadcast %72 : vector<2x8x1xf32> to vector<2x8x8xf32>
    %74 = arith.subf %70, %73 : vector<2x8x8xf32>
    %75 = math.exp %74 : vector<2x8x8xf32>
    %cst_28 = arith.constant dense<0.000000e+00> : vector<2x8xf32>
    %76 = vector.multi_reduction <add>, %75, %cst_28 [2] : vector<2x8x8xf32> to vector<2x8xf32>
    %77 = vector.shape_cast %76 : vector<2x8xf32> to vector<2x8x1xf32>
    %78 = vector.broadcast %77 : vector<2x8x1xf32> to vector<2x8x8xf32>
    %79 = arith.divf %75, %78 : vector<2x8x8xf32>
    %cst_29 = arith.constant dense<0.000000e+00> : vector<2x8x32xf32>
    %80 = tpu.matmul %79, %66, %cst_29 {dimension_numbers = #tpu.dot_dimension_numbers<[2], [1], [1], [2], [0, 0, 0, 1, 1, 2], [0], [0]>} : vector<2x8x8xf32>, vector<2x8x32xf32>, vector<2x8x32xf32> -> vector<2x8x32xf32>
    %81 = vector.shape_cast %80 : vector<2x8x32xf32> to vector<16x32xf32>
    %82 = arith.truncf %81 : vector<16x32xf32> to vector<16x32xbf16>
    %83 = vector.extract_strided_slice %63 {offsets = [0, 0], sizes = [32, 128], strides = [1, 1]} : vector<128x128xbf16> to vector<32x128xbf16>
    %cst_30 = arith.constant dense<0.000000e+00> : vector<16x128xf32>
    %84 = tpu.matmul %82, %83, %cst_30 {dimension_numbers = #tpu.dot_dimension_numbers<[1], [0], [0], [1], [0, 0, 1, 1], [], []>} : vector<16x32xbf16>, vector<32x128xbf16>, vector<16x128xf32> -> vector<16x128xf32>
    %85 = vector.extract_strided_slice %53 {offsets = [0, 0, 32], sizes = [2, 8, 32], strides = [1, 1, 1]} : vector<2x8x128xf32> to vector<2x8x32xf32>
    %86 = vector.extract_strided_slice %57 {offsets = [0, 0, 32], sizes = [2, 8, 32], strides = [1, 1, 1]} : vector<2x8x128xf32> to vector<2x8x32xf32>
    %87 = vector.extract_strided_slice %61 {offsets = [0, 0, 32], sizes = [2, 8, 32], strides = [1, 1, 1]} : vector<2x8x128xf32> to vector<2x8x32xf32>
    %cst_31 = arith.constant dense<0.000000e+00> : vector<2x8x8xf32>
    %88 = tpu.matmul %85, %86, %cst_31 {dimension_numbers = #tpu.dot_dimension_numbers<[2], [2], [1], [1], [0, 0, 0, 1, 1, 1], [0], [0]>} : vector<2x8x32xf32>, vector<2x8x32xf32>, vector<2x8x8xf32> -> vector<2x8x8xf32>
    %cst_32 = arith.constant 0.176776692 : f32
    %89 = vector.broadcast %cst_32 : f32 to vector<2x8x8xf32>
    %90 = arith.mulf %88, %89 : vector<2x8x8xf32>
    %91 = arith.addf %90, %39 : vector<2x8x8xf32>
    %cst_33 = arith.constant dense<0xFF800000> : vector<2x8xf32>
    %92 = vector.multi_reduction <maximumf>, %91, %cst_33 [2] : vector<2x8x8xf32> to vector<2x8xf32>
    %93 = vector.shape_cast %92 : vector<2x8xf32> to vector<2x8x1xf32>
    %94 = vector.broadcast %93 : vector<2x8x1xf32> to vector<2x8x8xf32>
    %95 = arith.subf %91, %94 : vector<2x8x8xf32>
    %96 = math.exp %95 : vector<2x8x8xf32>
    %cst_34 = arith.constant dense<0.000000e+00> : vector<2x8xf32>
    %97 = vector.multi_reduction <add>, %96, %cst_34 [2] : vector<2x8x8xf32> to vector<2x8xf32>
    %98 = vector.shape_cast %97 : vector<2x8xf32> to vector<2x8x1xf32>
    %99 = vector.broadcast %98 : vector<2x8x1xf32> to vector<2x8x8xf32>
    %100 = arith.divf %96, %99 : vector<2x8x8xf32>
    %cst_35 = arith.constant dense<0.000000e+00> : vector<2x8x32xf32>
    %101 = tpu.matmul %100, %87, %cst_35 {dimension_numbers = #tpu.dot_dimension_numbers<[2], [1], [1], [2], [0, 0, 0, 1, 1, 2], [0], [0]>} : vector<2x8x8xf32>, vector<2x8x32xf32>, vector<2x8x32xf32> -> vector<2x8x32xf32>
    %102 = vector.shape_cast %101 : vector<2x8x32xf32> to vector<16x32xf32>
    %103 = arith.truncf %102 : vector<16x32xf32> to vector<16x32xbf16>
    %104 = vector.extract_strided_slice %63 {offsets = [32, 0], sizes = [32, 128], strides = [1, 1]} : vector<128x128xbf16> to vector<32x128xbf16>
    %cst_36 = arith.constant dense<0.000000e+00> : vector<16x128xf32>
    %105 = tpu.matmul %103, %104, %cst_36 {dimension_numbers = #tpu.dot_dimension_numbers<[1], [0], [0], [1], [0, 0, 1, 1], [], []>} : vector<16x32xbf16>, vector<32x128xbf16>, vector<16x128xf32> -> vector<16x128xf32>
    %106 = arith.addf %84, %105 : vector<16x128xf32>
    %107 = vector.extract_strided_slice %53 {offsets = [0, 0, 64], sizes = [2, 8, 32], strides = [1, 1, 1]} : vector<2x8x128xf32> to vector<2x8x32xf32>
    %108 = vector.extract_strided_slice %57 {offsets = [0, 0, 64], sizes = [2, 8, 32], strides = [1, 1, 1]} : vector<2x8x128xf32> to vector<2x8x32xf32>
    %109 = vector.extract_strided_slice %61 {offsets = [0, 0, 64], sizes = [2, 8, 32], strides = [1, 1, 1]} : vector<2x8x128xf32> to vector<2x8x32xf32>
    %cst_37 = arith.constant dense<0.000000e+00> : vector<2x8x8xf32>
    %110 = tpu.matmul %107, %108, %cst_37 {dimension_numbers = #tpu.dot_dimension_numbers<[2], [2], [1], [1], [0, 0, 0, 1, 1, 1], [0], [0]>} : vector<2x8x32xf32>, vector<2x8x32xf32>, vector<2x8x8xf32> -> vector<2x8x8xf32>
    %cst_38 = arith.constant 0.176776692 : f32
    %111 = vector.broadcast %cst_38 : f32 to vector<2x8x8xf32>
    %112 = arith.mulf %110, %111 : vector<2x8x8xf32>
    %113 = arith.addf %112, %39 : vector<2x8x8xf32>
    %cst_39 = arith.constant dense<0xFF800000> : vector<2x8xf32>
    %114 = vector.multi_reduction <maximumf>, %113, %cst_39 [2] : vector<2x8x8xf32> to vector<2x8xf32>
    %115 = vector.shape_cast %114 : vector<2x8xf32> to vector<2x8x1xf32>
    %116 = vector.broadcast %115 : vector<2x8x1xf32> to vector<2x8x8xf32>
    %117 = arith.subf %113, %116 : vector<2x8x8xf32>
    %118 = math.exp %117 : vector<2x8x8xf32>
    %cst_40 = arith.constant dense<0.000000e+00> : vector<2x8xf32>
    %119 = vector.multi_reduction <add>, %118, %cst_40 [2] : vector<2x8x8xf32> to vector<2x8xf32>
    %120 = vector.shape_cast %119 : vector<2x8xf32> to vector<2x8x1xf32>
    %121 = vector.broadcast %120 : vector<2x8x1xf32> to vector<2x8x8xf32>
    %122 = arith.divf %118, %121 : vector<2x8x8xf32>
    %cst_41 = arith.constant dense<0.000000e+00> : vector<2x8x32xf32>
    %123 = tpu.matmul %122, %109, %cst_41 {dimension_numbers = #tpu.dot_dimension_numbers<[2], [1], [1], [2], [0, 0, 0, 1, 1, 2], [0], [0]>} : vector<2x8x8xf32>, vector<2x8x32xf32>, vector<2x8x32xf32> -> vector<2x8x32xf32>
    %124 = vector.shape_cast %123 : vector<2x8x32xf32> to vector<16x32xf32>
    %125 = arith.truncf %124 : vector<16x32xf32> to vector<16x32xbf16>
    %126 = vector.extract_strided_slice %63 {offsets = [64, 0], sizes = [32, 128], strides = [1, 1]} : vector<128x128xbf16> to vector<32x128xbf16>
    %cst_42 = arith.constant dense<0.000000e+00> : vector<16x128xf32>
    %127 = tpu.matmul %125, %126, %cst_42 {dimension_numbers = #tpu.dot_dimension_numbers<[1], [0], [0], [1], [0, 0, 1, 1], [], []>} : vector<16x32xbf16>, vector<32x128xbf16>, vector<16x128xf32> -> vector<16x128xf32>
    %128 = arith.addf %106, %127 : vector<16x128xf32>
    %129 = vector.extract_strided_slice %53 {offsets = [0, 0, 96], sizes = [2, 8, 32], strides = [1, 1, 1]} : vector<2x8x128xf32> to vector<2x8x32xf32>
    %130 = vector.extract_strided_slice %57 {offsets = [0, 0, 96], sizes = [2, 8, 32], strides = [1, 1, 1]} : vector<2x8x128xf32> to vector<2x8x32xf32>
    %131 = vector.extract_strided_slice %61 {offsets = [0, 0, 96], sizes = [2, 8, 32], strides = [1, 1, 1]} : vector<2x8x128xf32> to vector<2x8x32xf32>
    %cst_43 = arith.constant dense<0.000000e+00> : vector<2x8x8xf32>
    %132 = tpu.matmul %129, %130, %cst_43 {dimension_numbers = #tpu.dot_dimension_numbers<[2], [2], [1], [1], [0, 0, 0, 1, 1, 1], [0], [0]>} : vector<2x8x32xf32>, vector<2x8x32xf32>, vector<2x8x8xf32> -> vector<2x8x8xf32>
    %cst_44 = arith.constant 0.176776692 : f32
    %133 = vector.broadcast %cst_44 : f32 to vector<2x8x8xf32>
    %134 = arith.mulf %132, %133 : vector<2x8x8xf32>
    %135 = arith.addf %134, %39 : vector<2x8x8xf32>
    %cst_45 = arith.constant dense<0xFF800000> : vector<2x8xf32>
    %136 = vector.multi_reduction <maximumf>, %135, %cst_45 [2] : vector<2x8x8xf32> to vector<2x8xf32>
    %137 = vector.shape_cast %136 : vector<2x8xf32> to vector<2x8x1xf32>
    %138 = vector.broadcast %137 : vector<2x8x1xf32> to vector<2x8x8xf32>
    %139 = arith.subf %135, %138 : vector<2x8x8xf32>
    %140 = math.exp %139 : vector<2x8x8xf32>
    %cst_46 = arith.constant dense<0.000000e+00> : vector<2x8xf32>
    %141 = vector.multi_reduction <add>, %140, %cst_46 [2] : vector<2x8x8xf32> to vector<2x8xf32>
    %142 = vector.shape_cast %141 : vector<2x8xf32> to vector<2x8x1xf32>
    %143 = vector.broadcast %142 : vector<2x8x1xf32> to vector<2x8x8xf32>
    %144 = arith.divf %140, %143 : vector<2x8x8xf32>
    %cst_47 = arith.constant dense<0.000000e+00> : vector<2x8x32xf32>
    %145 = tpu.matmul %144, %131, %cst_47 {dimension_numbers = #tpu.dot_dimension_numbers<[2], [1], [1], [2], [0, 0, 0, 1, 1, 2], [0], [0]>} : vector<2x8x8xf32>, vector<2x8x32xf32>, vector<2x8x32xf32> -> vector<2x8x32xf32>
    %146 = vector.shape_cast %145 : vector<2x8x32xf32> to vector<16x32xf32>
    %147 = arith.truncf %146 : vector<16x32xf32> to vector<16x32xbf16>
    %148 = vector.extract_strided_slice %63 {offsets = [96, 0], sizes = [32, 128], strides = [1, 1]} : vector<128x128xbf16> to vector<32x128xbf16>
    %cst_48 = arith.constant dense<0.000000e+00> : vector<16x128xf32>
    %149 = tpu.matmul %147, %148, %cst_48 {dimension_numbers = #tpu.dot_dimension_numbers<[1], [0], [0], [1], [0, 0, 1, 1], [], []>} : vector<16x32xbf16>, vector<32x128xbf16>, vector<16x128xf32> -> vector<16x128xf32>
    %150 = arith.addf %128, %149 : vector<16x128xf32>
    %151 = vector.broadcast %12 : vector<1x128xf32> to vector<16x128xf32>
    %152 = arith.addf %150, %151 : vector<16x128xf32>
    %153 = arith.addf %152, %4 : vector<16x128xf32>
    %cst_49 = arith.constant dense<0.000000e+00> : vector<16xf32>
    %154 = vector.multi_reduction <add>, %153, %cst_49 [1] : vector<16x128xf32> to vector<16xf32>
    %155 = vector.shape_cast %154 : vector<16xf32> to vector<16x1xf32>
    %cst_50 = arith.constant 1.280000e+02 : f32
    %156 = vector.broadcast %cst_50 : f32 to vector<16x1xf32>
    %157 = arith.divf %155, %156 : vector<16x1xf32>
    %158 = vector.broadcast %157 : vector<16x1xf32> to vector<16x128xf32>
    %159 = arith.subf %153, %158 : vector<16x128xf32>
    %160 = arith.mulf %159, %159 : vector<16x128xf32>
    %cst_51 = arith.constant dense<0.000000e+00> : vector<16xf32>
    %161 = vector.multi_reduction <add>, %160, %cst_51 [1] : vector<16x128xf32> to vector<16xf32>
    %162 = vector.shape_cast %161 : vector<16xf32> to vector<16x1xf32>
    %cst_52 = arith.constant 1.280000e+02 : f32
    %163 = vector.broadcast %cst_52 : f32 to vector<16x1xf32>
    %164 = arith.divf %162, %163 : vector<16x1xf32>
    %cst_53 = arith.constant 9.99999974E-6 : f32
    %165 = vector.broadcast %cst_53 : f32 to vector<16x1xf32>
    %166 = arith.addf %164, %165 : vector<16x1xf32>
    %167 = math.rsqrt %166 : vector<16x1xf32>
    %168 = vector.broadcast %167 : vector<16x1xf32> to vector<16x128xf32>
    %169 = arith.mulf %159, %168 : vector<16x128xf32>
    %170 = vector.broadcast %13 : vector<1x128xf32> to vector<16x128xf32>
    %171 = arith.mulf %169, %170 : vector<16x128xf32>
    %172 = vector.broadcast %14 : vector<1x128xf32> to vector<16x128xf32>
    %173 = arith.addf %171, %172 : vector<16x128xf32>
    %c0_54 = arith.constant 0 : index
    %c0_55 = arith.constant 0 : index
    %c0_56 = arith.constant 0 : index
    %174 = vector.load %arg7[%c0_54, %c0_55, %c0_56] : memref<1x128x128xbf16, #tpu.memory_space<vmem>>, vector<1x128x128xbf16>
    %175 = vector.shape_cast %174 : vector<1x128x128xbf16> to vector<128x128xbf16>
    %176 = arith.truncf %173 : vector<16x128xf32> to vector<16x128xbf16>
    %cst_57 = arith.constant dense<0.000000e+00> : vector<16x128xf32>
    %177 = tpu.matmul %176, %175, %cst_57 {dimension_numbers = #tpu.dot_dimension_numbers<[1], [0], [0], [1], [0, 0, 1, 1], [], []>} : vector<16x128xbf16>, vector<128x128xbf16>, vector<16x128xf32> -> vector<16x128xf32>
    %178 = vector.broadcast %15 : vector<1x128xf32> to vector<16x128xf32>
    %179 = arith.addf %177, %178 : vector<16x128xf32>
    %180 = vector.shape_cast %179 : vector<16x128xf32> to vector<2x8x128xf32>
    %c0_58 = arith.constant 0 : index
    %c0_59 = arith.constant 0 : index
    %c0_60 = arith.constant 0 : index
    %181 = vector.load %arg8[%c0_58, %c0_59, %c0_60] : memref<1x128x256xbf16, #tpu.memory_space<vmem>>, vector<1x128x256xbf16>
    %182 = vector.shape_cast %181 : vector<1x128x256xbf16> to vector<128x256xbf16>
    %cst_61 = arith.constant dense<0.000000e+00> : vector<16x256xf32>
    %183 = tpu.matmul %6, %182, %cst_61 {dimension_numbers = #tpu.dot_dimension_numbers<[1], [0], [0], [1], [0, 0, 1, 1], [], []>} : vector<16x128xbf16>, vector<128x256xbf16>, vector<16x256xf32> -> vector<16x256xf32>
    %184 = vector.extract_strided_slice %183 {offsets = [0, 0], sizes = [16, 128], strides = [1, 1]} : vector<16x256xf32> to vector<16x128xf32>
    %185 = vector.broadcast %16 : vector<1x128xf32> to vector<16x128xf32>
    %186 = arith.addf %184, %185 : vector<16x128xf32>
    %187 = vector.shape_cast %186 : vector<16x128xf32> to vector<2x8x128xf32>
    %188 = vector.extract_strided_slice %183 {offsets = [0, 128], sizes = [16, 128], strides = [1, 1]} : vector<16x256xf32> to vector<16x128xf32>
    %189 = vector.broadcast %17 : vector<1x128xf32> to vector<16x128xf32>
    %190 = arith.addf %188, %189 : vector<16x128xf32>
    %191 = vector.shape_cast %190 : vector<16x128xf32> to vector<2x8x128xf32>
    %c0_62 = arith.constant 0 : index
    %c0_63 = arith.constant 0 : index
    %c0_64 = arith.constant 0 : index
    %192 = vector.load %arg9[%c0_62, %c0_63, %c0_64] : memref<1x128x128xbf16, #tpu.memory_space<vmem>>, vector<1x128x128xbf16>
    %193 = vector.shape_cast %192 : vector<1x128x128xbf16> to vector<128x128xbf16>
    %194 = vector.extract_strided_slice %180 {offsets = [0, 0, 0], sizes = [2, 8, 32], strides = [1, 1, 1]} : vector<2x8x128xf32> to vector<2x8x32xf32>
    %195 = vector.extract_strided_slice %187 {offsets = [0, 0, 0], sizes = [2, 8, 32], strides = [1, 1, 1]} : vector<2x8x128xf32> to vector<2x8x32xf32>
    %196 = vector.extract_strided_slice %191 {offsets = [0, 0, 0], sizes = [2, 8, 32], strides = [1, 1, 1]} : vector<2x8x128xf32> to vector<2x8x32xf32>
    %cst_65 = arith.constant dense<0.000000e+00> : vector<2x8x8xf32>
    %197 = tpu.matmul %194, %195, %cst_65 {dimension_numbers = #tpu.dot_dimension_numbers<[2], [2], [1], [1], [0, 0, 0, 1, 1, 1], [0], [0]>} : vector<2x8x32xf32>, vector<2x8x32xf32>, vector<2x8x8xf32> -> vector<2x8x8xf32>
    %cst_66 = arith.constant 0.176776692 : f32
    %198 = vector.broadcast %cst_66 : f32 to vector<2x8x8xf32>
    %199 = arith.mulf %197, %198 : vector<2x8x8xf32>
    %200 = vector.broadcast %45 : vector<2x1x8xf32> to vector<2x8x8xf32>
    %201 = arith.addf %199, %200 : vector<2x8x8xf32>
    %cst_67 = arith.constant dense<0xFF800000> : vector<2x8xf32>
    %202 = vector.multi_reduction <maximumf>, %201, %cst_67 [2] : vector<2x8x8xf32> to vector<2x8xf32>
    %203 = vector.shape_cast %202 : vector<2x8xf32> to vector<2x8x1xf32>
    %204 = vector.broadcast %203 : vector<2x8x1xf32> to vector<2x8x8xf32>
    %205 = arith.subf %201, %204 : vector<2x8x8xf32>
    %206 = math.exp %205 : vector<2x8x8xf32>
    %cst_68 = arith.constant dense<0.000000e+00> : vector<2x8xf32>
    %207 = vector.multi_reduction <add>, %206, %cst_68 [2] : vector<2x8x8xf32> to vector<2x8xf32>
    %208 = vector.shape_cast %207 : vector<2x8xf32> to vector<2x8x1xf32>
    %209 = vector.broadcast %208 : vector<2x8x1xf32> to vector<2x8x8xf32>
    %210 = arith.divf %206, %209 : vector<2x8x8xf32>
    %cst_69 = arith.constant dense<0.000000e+00> : vector<2x8x32xf32>
    %211 = tpu.matmul %210, %196, %cst_69 {dimension_numbers = #tpu.dot_dimension_numbers<[2], [1], [1], [2], [0, 0, 0, 1, 1, 2], [0], [0]>} : vector<2x8x8xf32>, vector<2x8x32xf32>, vector<2x8x32xf32> -> vector<2x8x32xf32>
    %212 = vector.shape_cast %211 : vector<2x8x32xf32> to vector<16x32xf32>
    %213 = arith.truncf %212 : vector<16x32xf32> to vector<16x32xbf16>
    %214 = vector.extract_strided_slice %193 {offsets = [0, 0], sizes = [32, 128], strides = [1, 1]} : vector<128x128xbf16> to vector<32x128xbf16>
    %cst_70 = arith.constant dense<0.000000e+00> : vector<16x128xf32>
    %215 = tpu.matmul %213, %214, %cst_70 {dimension_numbers = #tpu.dot_dimension_numbers<[1], [0], [0], [1], [0, 0, 1, 1], [], []>} : vector<16x32xbf16>, vector<32x128xbf16>, vector<16x128xf32> -> vector<16x128xf32>
    %216 = vector.extract_strided_slice %180 {offsets = [0, 0, 32], sizes = [2, 8, 32], strides = [1, 1, 1]} : vector<2x8x128xf32> to vector<2x8x32xf32>
    %217 = vector.extract_strided_slice %187 {offsets = [0, 0, 32], sizes = [2, 8, 32], strides = [1, 1, 1]} : vector<2x8x128xf32> to vector<2x8x32xf32>
    %218 = vector.extract_strided_slice %191 {offsets = [0, 0, 32], sizes = [2, 8, 32], strides = [1, 1, 1]} : vector<2x8x128xf32> to vector<2x8x32xf32>
    %cst_71 = arith.constant dense<0.000000e+00> : vector<2x8x8xf32>
    %219 = tpu.matmul %216, %217, %cst_71 {dimension_numbers = #tpu.dot_dimension_numbers<[2], [2], [1], [1], [0, 0, 0, 1, 1, 1], [0], [0]>} : vector<2x8x32xf32>, vector<2x8x32xf32>, vector<2x8x8xf32> -> vector<2x8x8xf32>
    %cst_72 = arith.constant 0.176776692 : f32
    %220 = vector.broadcast %cst_72 : f32 to vector<2x8x8xf32>
    %221 = arith.mulf %219, %220 : vector<2x8x8xf32>
    %222 = vector.broadcast %45 : vector<2x1x8xf32> to vector<2x8x8xf32>
    %223 = arith.addf %221, %222 : vector<2x8x8xf32>
    %cst_73 = arith.constant dense<0xFF800000> : vector<2x8xf32>
    %224 = vector.multi_reduction <maximumf>, %223, %cst_73 [2] : vector<2x8x8xf32> to vector<2x8xf32>
    %225 = vector.shape_cast %224 : vector<2x8xf32> to vector<2x8x1xf32>
    %226 = vector.broadcast %225 : vector<2x8x1xf32> to vector<2x8x8xf32>
    %227 = arith.subf %223, %226 : vector<2x8x8xf32>
    %228 = math.exp %227 : vector<2x8x8xf32>
    %cst_74 = arith.constant dense<0.000000e+00> : vector<2x8xf32>
    %229 = vector.multi_reduction <add>, %228, %cst_74 [2] : vector<2x8x8xf32> to vector<2x8xf32>
    %230 = vector.shape_cast %229 : vector<2x8xf32> to vector<2x8x1xf32>
    %231 = vector.broadcast %230 : vector<2x8x1xf32> to vector<2x8x8xf32>
    %232 = arith.divf %228, %231 : vector<2x8x8xf32>
    %cst_75 = arith.constant dense<0.000000e+00> : vector<2x8x32xf32>
    %233 = tpu.matmul %232, %218, %cst_75 {dimension_numbers = #tpu.dot_dimension_numbers<[2], [1], [1], [2], [0, 0, 0, 1, 1, 2], [0], [0]>} : vector<2x8x8xf32>, vector<2x8x32xf32>, vector<2x8x32xf32> -> vector<2x8x32xf32>
    %234 = vector.shape_cast %233 : vector<2x8x32xf32> to vector<16x32xf32>
    %235 = arith.truncf %234 : vector<16x32xf32> to vector<16x32xbf16>
    %236 = vector.extract_strided_slice %193 {offsets = [32, 0], sizes = [32, 128], strides = [1, 1]} : vector<128x128xbf16> to vector<32x128xbf16>
    %cst_76 = arith.constant dense<0.000000e+00> : vector<16x128xf32>
    %237 = tpu.matmul %235, %236, %cst_76 {dimension_numbers = #tpu.dot_dimension_numbers<[1], [0], [0], [1], [0, 0, 1, 1], [], []>} : vector<16x32xbf16>, vector<32x128xbf16>, vector<16x128xf32> -> vector<16x128xf32>
    %238 = arith.addf %215, %237 : vector<16x128xf32>
    %239 = vector.extract_strided_slice %180 {offsets = [0, 0, 64], sizes = [2, 8, 32], strides = [1, 1, 1]} : vector<2x8x128xf32> to vector<2x8x32xf32>
    %240 = vector.extract_strided_slice %187 {offsets = [0, 0, 64], sizes = [2, 8, 32], strides = [1, 1, 1]} : vector<2x8x128xf32> to vector<2x8x32xf32>
    %241 = vector.extract_strided_slice %191 {offsets = [0, 0, 64], sizes = [2, 8, 32], strides = [1, 1, 1]} : vector<2x8x128xf32> to vector<2x8x32xf32>
    %cst_77 = arith.constant dense<0.000000e+00> : vector<2x8x8xf32>
    %242 = tpu.matmul %239, %240, %cst_77 {dimension_numbers = #tpu.dot_dimension_numbers<[2], [2], [1], [1], [0, 0, 0, 1, 1, 1], [0], [0]>} : vector<2x8x32xf32>, vector<2x8x32xf32>, vector<2x8x8xf32> -> vector<2x8x8xf32>
    %cst_78 = arith.constant 0.176776692 : f32
    %243 = vector.broadcast %cst_78 : f32 to vector<2x8x8xf32>
    %244 = arith.mulf %242, %243 : vector<2x8x8xf32>
    %245 = vector.broadcast %45 : vector<2x1x8xf32> to vector<2x8x8xf32>
    %246 = arith.addf %244, %245 : vector<2x8x8xf32>
    %cst_79 = arith.constant dense<0xFF800000> : vector<2x8xf32>
    %247 = vector.multi_reduction <maximumf>, %246, %cst_79 [2] : vector<2x8x8xf32> to vector<2x8xf32>
    %248 = vector.shape_cast %247 : vector<2x8xf32> to vector<2x8x1xf32>
    %249 = vector.broadcast %248 : vector<2x8x1xf32> to vector<2x8x8xf32>
    %250 = arith.subf %246, %249 : vector<2x8x8xf32>
    %251 = math.exp %250 : vector<2x8x8xf32>
    %cst_80 = arith.constant dense<0.000000e+00> : vector<2x8xf32>
    %252 = vector.multi_reduction <add>, %251, %cst_80 [2] : vector<2x8x8xf32> to vector<2x8xf32>
    %253 = vector.shape_cast %252 : vector<2x8xf32> to vector<2x8x1xf32>
    %254 = vector.broadcast %253 : vector<2x8x1xf32> to vector<2x8x8xf32>
    %255 = arith.divf %251, %254 : vector<2x8x8xf32>
    %cst_81 = arith.constant dense<0.000000e+00> : vector<2x8x32xf32>
    %256 = tpu.matmul %255, %241, %cst_81 {dimension_numbers = #tpu.dot_dimension_numbers<[2], [1], [1], [2], [0, 0, 0, 1, 1, 2], [0], [0]>} : vector<2x8x8xf32>, vector<2x8x32xf32>, vector<2x8x32xf32> -> vector<2x8x32xf32>
    %257 = vector.shape_cast %256 : vector<2x8x32xf32> to vector<16x32xf32>
    %258 = arith.truncf %257 : vector<16x32xf32> to vector<16x32xbf16>
    %259 = vector.extract_strided_slice %193 {offsets = [64, 0], sizes = [32, 128], strides = [1, 1]} : vector<128x128xbf16> to vector<32x128xbf16>
    %cst_82 = arith.constant dense<0.000000e+00> : vector<16x128xf32>
    %260 = tpu.matmul %258, %259, %cst_82 {dimension_numbers = #tpu.dot_dimension_numbers<[1], [0], [0], [1], [0, 0, 1, 1], [], []>} : vector<16x32xbf16>, vector<32x128xbf16>, vector<16x128xf32> -> vector<16x128xf32>
    %261 = arith.addf %238, %260 : vector<16x128xf32>
    %262 = vector.extract_strided_slice %180 {offsets = [0, 0, 96], sizes = [2, 8, 32], strides = [1, 1, 1]} : vector<2x8x128xf32> to vector<2x8x32xf32>
    %263 = vector.extract_strided_slice %187 {offsets = [0, 0, 96], sizes = [2, 8, 32], strides = [1, 1, 1]} : vector<2x8x128xf32> to vector<2x8x32xf32>
    %264 = vector.extract_strided_slice %191 {offsets = [0, 0, 96], sizes = [2, 8, 32], strides = [1, 1, 1]} : vector<2x8x128xf32> to vector<2x8x32xf32>
    %cst_83 = arith.constant dense<0.000000e+00> : vector<2x8x8xf32>
    %265 = tpu.matmul %262, %263, %cst_83 {dimension_numbers = #tpu.dot_dimension_numbers<[2], [2], [1], [1], [0, 0, 0, 1, 1, 1], [0], [0]>} : vector<2x8x32xf32>, vector<2x8x32xf32>, vector<2x8x8xf32> -> vector<2x8x8xf32>
    %cst_84 = arith.constant 0.176776692 : f32
    %266 = vector.broadcast %cst_84 : f32 to vector<2x8x8xf32>
    %267 = arith.mulf %265, %266 : vector<2x8x8xf32>
    %268 = vector.broadcast %45 : vector<2x1x8xf32> to vector<2x8x8xf32>
    %269 = arith.addf %267, %268 : vector<2x8x8xf32>
    %cst_85 = arith.constant dense<0xFF800000> : vector<2x8xf32>
    %270 = vector.multi_reduction <maximumf>, %269, %cst_85 [2] : vector<2x8x8xf32> to vector<2x8xf32>
    %271 = vector.shape_cast %270 : vector<2x8xf32> to vector<2x8x1xf32>
    %272 = vector.broadcast %271 : vector<2x8x1xf32> to vector<2x8x8xf32>
    %273 = arith.subf %269, %272 : vector<2x8x8xf32>
    %274 = math.exp %273 : vector<2x8x8xf32>
    %cst_86 = arith.constant dense<0.000000e+00> : vector<2x8xf32>
    %275 = vector.multi_reduction <add>, %274, %cst_86 [2] : vector<2x8x8xf32> to vector<2x8xf32>
    %276 = vector.shape_cast %275 : vector<2x8xf32> to vector<2x8x1xf32>
    %277 = vector.broadcast %276 : vector<2x8x1xf32> to vector<2x8x8xf32>
    %278 = arith.divf %274, %277 : vector<2x8x8xf32>
    %cst_87 = arith.constant dense<0.000000e+00> : vector<2x8x32xf32>
    %279 = tpu.matmul %278, %264, %cst_87 {dimension_numbers = #tpu.dot_dimension_numbers<[2], [1], [1], [2], [0, 0, 0, 1, 1, 2], [0], [0]>} : vector<2x8x8xf32>, vector<2x8x32xf32>, vector<2x8x32xf32> -> vector<2x8x32xf32>
    %280 = vector.shape_cast %279 : vector<2x8x32xf32> to vector<16x32xf32>
    %281 = arith.truncf %280 : vector<16x32xf32> to vector<16x32xbf16>
    %282 = vector.extract_strided_slice %193 {offsets = [96, 0], sizes = [32, 128], strides = [1, 1]} : vector<128x128xbf16> to vector<32x128xbf16>
    %cst_88 = arith.constant dense<0.000000e+00> : vector<16x128xf32>
    %283 = tpu.matmul %281, %282, %cst_88 {dimension_numbers = #tpu.dot_dimension_numbers<[1], [0], [0], [1], [0, 0, 1, 1], [], []>} : vector<16x32xbf16>, vector<32x128xbf16>, vector<16x128xf32> -> vector<16x128xf32>
    %284 = arith.addf %261, %283 : vector<16x128xf32>
    %285 = vector.broadcast %18 : vector<1x128xf32> to vector<16x128xf32>
    %286 = arith.addf %284, %285 : vector<16x128xf32>
    %287 = arith.addf %286, %173 : vector<16x128xf32>
    %cst_89 = arith.constant dense<0.000000e+00> : vector<16xf32>
    %288 = vector.multi_reduction <add>, %287, %cst_89 [1] : vector<16x128xf32> to vector<16xf32>
    %289 = vector.shape_cast %288 : vector<16xf32> to vector<16x1xf32>
    %cst_90 = arith.constant 1.280000e+02 : f32
    %290 = vector.broadcast %cst_90 : f32 to vector<16x1xf32>
    %291 = arith.divf %289, %290 : vector<16x1xf32>
    %292 = vector.broadcast %291 : vector<16x1xf32> to vector<16x128xf32>
    %293 = arith.subf %287, %292 : vector<16x128xf32>
    %294 = arith.mulf %293, %293 : vector<16x128xf32>
    %cst_91 = arith.constant dense<0.000000e+00> : vector<16xf32>
    %295 = vector.multi_reduction <add>, %294, %cst_91 [1] : vector<16x128xf32> to vector<16xf32>
    %296 = vector.shape_cast %295 : vector<16xf32> to vector<16x1xf32>
    %cst_92 = arith.constant 1.280000e+02 : f32
    %297 = vector.broadcast %cst_92 : f32 to vector<16x1xf32>
    %298 = arith.divf %296, %297 : vector<16x1xf32>
    %cst_93 = arith.constant 9.99999974E-6 : f32
    %299 = vector.broadcast %cst_93 : f32 to vector<16x1xf32>
    %300 = arith.addf %298, %299 : vector<16x1xf32>
    %301 = math.rsqrt %300 : vector<16x1xf32>
    %302 = vector.broadcast %301 : vector<16x1xf32> to vector<16x128xf32>
    %303 = arith.mulf %293, %302 : vector<16x128xf32>
    %304 = vector.broadcast %19 : vector<1x128xf32> to vector<16x128xf32>
    %305 = arith.mulf %303, %304 : vector<16x128xf32>
    %306 = vector.broadcast %20 : vector<1x128xf32> to vector<16x128xf32>
    %307 = arith.addf %305, %306 : vector<16x128xf32>
    %c0_94 = arith.constant 0 : index
    %c0_95 = arith.constant 0 : index
    %c0_96 = arith.constant 0 : index
    %308 = vector.load %arg10[%c0_94, %c0_95, %c0_96] : memref<1x128x1024xbf16, #tpu.memory_space<vmem>>, vector<1x128x1024xbf16>
    %309 = vector.shape_cast %308 : vector<1x128x1024xbf16> to vector<128x1024xbf16>
    %c0_97 = arith.constant 0 : index
    %c0_98 = arith.constant 0 : index
    %c0_99 = arith.constant 0 : index
    %310 = vector.load %arg11[%c0_97, %c0_98, %c0_99] : memref<1x1x1024xf32, #tpu.memory_space<vmem>>, vector<1x1x1024xf32>
    %311 = vector.shape_cast %310 : vector<1x1x1024xf32> to vector<1x1024xf32>
    %c0_100 = arith.constant 0 : index
    %c0_101 = arith.constant 0 : index
    %c0_102 = arith.constant 0 : index
    %312 = vector.load %arg12[%c0_100, %c0_101, %c0_102] : memref<1x1024x128xbf16, #tpu.memory_space<vmem>>, vector<1x1024x128xbf16>
    %313 = vector.shape_cast %312 : vector<1x1024x128xbf16> to vector<1024x128xbf16>
    %314 = arith.truncf %307 : vector<16x128xf32> to vector<16x128xbf16>
    %cst_103 = arith.constant dense<0.000000e+00> : vector<16x1024xf32>
    %315 = tpu.matmul %314, %309, %cst_103 {dimension_numbers = #tpu.dot_dimension_numbers<[1], [0], [0], [1], [0, 0, 1, 1], [], []>} : vector<16x128xbf16>, vector<128x1024xbf16>, vector<16x1024xf32> -> vector<16x1024xf32>
    %316 = vector.broadcast %311 : vector<1x1024xf32> to vector<16x1024xf32>
    %317 = arith.addf %315, %316 : vector<16x1024xf32>
    %cst_104 = arith.constant 0.000000e+00 : f32
    %318 = vector.broadcast %cst_104 : f32 to vector<16x1024xf32>
    %319 = arith.maximumf %317, %318 : vector<16x1024xf32>
    %320 = arith.truncf %319 : vector<16x1024xf32> to vector<16x1024xbf16>
    %cst_105 = arith.constant dense<0.000000e+00> : vector<16x128xf32>
    %321 = tpu.matmul %320, %313, %cst_105 {dimension_numbers = #tpu.dot_dimension_numbers<[1], [0], [0], [1], [0, 0, 1, 1], [], []>} : vector<16x1024xbf16>, vector<1024x128xbf16>, vector<16x128xf32> -> vector<16x128xf32>
    %322 = vector.broadcast %21 : vector<1x128xf32> to vector<16x128xf32>
    %323 = arith.addf %321, %322 : vector<16x128xf32>
    %324 = arith.addf %323, %307 : vector<16x128xf32>
    %cst_106 = arith.constant dense<0.000000e+00> : vector<16xf32>
    %325 = vector.multi_reduction <add>, %324, %cst_106 [1] : vector<16x128xf32> to vector<16xf32>
    %326 = vector.shape_cast %325 : vector<16xf32> to vector<16x1xf32>
    %cst_107 = arith.constant 1.280000e+02 : f32
    %327 = vector.broadcast %cst_107 : f32 to vector<16x1xf32>
    %328 = arith.divf %326, %327 : vector<16x1xf32>
    %329 = vector.broadcast %328 : vector<16x1xf32> to vector<16x128xf32>
    %330 = arith.subf %324, %329 : vector<16x128xf32>
    %331 = arith.mulf %330, %330 : vector<16x128xf32>
    %cst_108 = arith.constant dense<0.000000e+00> : vector<16xf32>
    %332 = vector.multi_reduction <add>, %331, %cst_108 [1] : vector<16x128xf32> to vector<16xf32>
    %333 = vector.shape_cast %332 : vector<16xf32> to vector<16x1xf32>
    %cst_109 = arith.constant 1.280000e+02 : f32
    %334 = vector.broadcast %cst_109 : f32 to vector<16x1xf32>
    %335 = arith.divf %333, %334 : vector<16x1xf32>
    %cst_110 = arith.constant 9.99999974E-6 : f32
    %336 = vector.broadcast %cst_110 : f32 to vector<16x1xf32>
    %337 = arith.addf %335, %336 : vector<16x1xf32>
    %338 = math.rsqrt %337 : vector<16x1xf32>
    %339 = vector.broadcast %338 : vector<16x1xf32> to vector<16x128xf32>
    %340 = arith.mulf %330, %339 : vector<16x128xf32>
    %341 = vector.broadcast %22 : vector<1x128xf32> to vector<16x128xf32>
    %342 = arith.mulf %340, %341 : vector<16x128xf32>
    %343 = vector.broadcast %23 : vector<1x128xf32> to vector<16x128xf32>
    %344 = arith.addf %342, %343 : vector<16x128xf32>
    %345 = vector.shape_cast %344 : vector<16x128xf32> to vector<2x8x128xf32>
    %c0_111 = arith.constant 0 : index
    %c0_112 = arith.constant 0 : index
    %c0_113 = arith.constant 0 : index
    %346 = vector.load %arg14[%c0_111, %c0_112, %c0_113] : memref<2x8x128xf32, #tpu.memory_space<vmem>>, vector<2x8x128xf32>
    tpu.vector_store %arg14[%c0_111, %c0_112, %c0_113], %345 {strides = array<i32>} : memref<2x8x128xf32, #tpu.memory_space<vmem>>, vector<2x8x128xf32>,
    return
  }
  func.func @transform_0(%arg0: i32) -> (i32, i32, i32) {
    %c0_i32 = arith.constant 0 : i32
    %c0_i32_0 = arith.constant 0 : i32
    %c0_i32_1 = arith.constant 0 : i32
    %c0_i32_2 = arith.constant 0 : i32
    return %c0_i32, %c0_i32_0, %c0_i32_1 : i32, i32, i32
  }
  func.func @transform_1(%arg0: i32) -> (i32, i32, i32) {
    %c0_i32 = arith.constant 0 : i32
    %c0_i32_0 = arith.constant 0 : i32
    %c0_i32_1 = arith.constant 0 : i32
    %c0_i32_2 = arith.constant 0 : i32
    return %c0_i32, %c0_i32_0, %c0_i32_1 : i32, i32, i32
  }
  func.func @transform_2(%arg0: i32) -> (i32, i32) {
    %c0_i32 = arith.constant 0 : i32
    %c0_i32_0 = arith.constant 0 : i32
    %c0_i32_1 = arith.constant 0 : i32
    return %c0_i32, %c0_i32_0 : i32, i32
  }
  func.func @transform_3(%arg0: i32) -> (i32, i32) {
    %c0_i32 = arith.constant 0 : i32
    %c0_i32_0 = arith.constant 0 : i32
    %c0_i32_1 = arith.constant 0 : i32
    return %c0_i32, %c0_i32_0 : i32, i32
  }
  func.func @transform_4(%arg0: i32) -> (i32, i32, i32) {
    %c0_i32 = arith.constant 0 : i32
    %c0_i32_0 = arith.constant 0 : i32
    %c0_i32_1 = arith.constant 0 : i32
    return %arg0, %c0_i32, %c0_i32_0 : i32, i32, i32
  }
  func.func @transform_5(%arg0: i32) -> (i32, i32, i32) {
    %c0_i32 = arith.constant 0 : i32
    %c0_i32_0 = arith.constant 0 : i32
    %c0_i32_1 = arith.constant 0 : i32
    return %arg0, %c0_i32, %c0_i32_0 : i32, i32, i32
  }
  func.func @transform_6(%arg0: i32) -> (i32, i32, i32) {
    %c0_i32 = arith.constant 0 : i32
    %c0_i32_0 = arith.constant 0 : i32
    %c0_i32_1 = arith.constant 0 : i32
    return %arg0, %c0_i32, %c0_i32_0 : i32, i32, i32
  }
  func.func @transform_7(%arg0: i32) -> (i32, i32, i32) {
    %c0_i32 = arith.constant 0 : i32
    %c0_i32_0 = arith.constant 0 : i32
    %c0_i32_1 = arith.constant 0 : i32
    return %arg0, %c0_i32, %c0_i32_0 : i32, i32, i32
  }
  func.func @transform_8(%arg0: i32) -> (i32, i32, i32) {
    %c0_i32 = arith.constant 0 : i32
    %c0_i32_0 = arith.constant 0 : i32
    %c0_i32_1 = arith.constant 0 : i32
    return %arg0, %c0_i32, %c0_i32_0 : i32, i32, i32
  }
  func.func @transform_9(%arg0: i32) -> (i32, i32, i32) {
    %c0_i32 = arith.constant 0 : i32
    %c0_i32_0 = arith.constant 0 : i32
    %c0_i32_1 = arith.constant 0 : i32
    return %arg0, %c0_i32, %c0_i32_0 : i32, i32, i32
  }
  func.func @transform_10(%arg0: i32) -> (i32, i32, i32) {
    %c0_i32 = arith.constant 0 : i32
    %c0_i32_0 = arith.constant 0 : i32
    %c0_i32_1 = arith.constant 0 : i32
    return %arg0, %c0_i32, %c0_i32_0 : i32, i32, i32
  }
  func.func @transform_11(%arg0: i32) -> (i32, i32, i32) {
    %c0_i32 = arith.constant 0 : i32
    %c0_i32_0 = arith.constant 0 : i32
    %c0_i32_1 = arith.constant 0 : i32
    return %arg0, %c0_i32, %c0_i32_0 : i32, i32, i32
  }
  func.func @transform_12(%arg0: i32) -> (i32, i32, i32) {
    %c0_i32 = arith.constant 0 : i32
    %c0_i32_0 = arith.constant 0 : i32
    %c0_i32_1 = arith.constant 0 : i32
    return %arg0, %c0_i32, %c0_i32_0 : i32, i32, i32
  }
  func.func @transform_13(%arg0: i32) -> (i32, i32, i32) {
    %c0_i32 = arith.constant 0 : i32
    %c0_i32_0 = arith.constant 0 : i32
    %c0_i32_1 = arith.constant 0 : i32
    %c0_i32_2 = arith.constant 0 : i32
    return %c0_i32, %c0_i32_0, %c0_i32_1 : i32, i32, i32
  }
}

</mosaic_0001>

<bundles_post_ra>
// kernel: transformer_forward.5
= control target key start
LH: loop header
LB: loop body
LE: loop exit
PB: predicated region body
PF: predicated region fallthrough
CT: control target
= control target key end

     0   :  { %v258_v2 = vmov 0   ;;  %s351_s0 = inlined_call_operand.vmem [shape: f32[16,128], index: 0, kind: input, shape index: {}]   ;;  %s352_s1 = inlined_call_operand.vmem [shape: bf16[128,256], index: 1, kind: input, shape index: {}]   ;;  %s353_s2 = inlined_call_operand.vmem [shape: f32[1,256], index: 2, kind: input, shape index: {}]   ;;  %s354_s3 = inlined_call_operand.hbm [shape: f32[16,256], index: 3, kind: output, shape index: {}]  }
   0x1   :  { %v210_v0 = vld [vmem:[%s352_s1 + $0x4] ss:$8 sps:$4 sm:$0xff]   ;;  %v212_v1 = vld [vmem:[%s352_s1] ss:$8 sps:$4 sm:$0xff]   ;;  %159 = vmatprep.mubr.bf16.mxu0 %v258_v2  ;;  %v213_v3 = vld [vmem:[%s352_s1 + $0x14] ss:$8 sps:$4 sm:$0xff]  }
   0x2   :  { %127 = vmatprep.subr.bf16.mxu0 %v210_v0  ;;  %v215_v4 = vld [vmem:[%s352_s1 + $0x10] ss:$8 sps:$4 sm:$0xff]   ;;  %v216_v5 = vld [vmem:[%s352_s1 + $0x24] ss:$8 sps:$4 sm:$0xff]   ;;  %v218_v6 = vld [vmem:[%s352_s1 + $0x20] ss:$8 sps:$4 sm:$0xff]  }
   0x3   :  { %128 = vmatpush1.bf16.msra.mxu0 %v212_v1  ;;  %v219_v7 = vld [vmem:[%s352_s1 + $0x34] ss:$8 sps:$4 sm:$0xff]   ;;  %v221_v8 = vld [vmem:[%s352_s1 + $0x30] ss:$8 sps:$4 sm:$0xff]  }
   0x4   :  { %129 = vmatprep.subr.bf16.mxu0 %v213_v3 }
   0x7   :  { %130 = vmatpush1.bf16.msra.mxu0 %v215_v4 }
   0x8   :  { %131 = vmatprep.subr.bf16.mxu0 %v216_v5 }
   0xb   :  { %132 = vmatpush1.bf16.msra.mxu0 %v218_v6 }
   0xc   :  { %8 = vsyncpa [#allocation3], 0  ;;  %133 = vmatprep.subr.bf16.mxu0 %v219_v7  ;;  %v222_v9 = vld [vmem:[%s352_s1 + $0x44] ss:$8 sps:$4 sm:$0xff]   ;;  %v224_v10 = vld [vmem:[%s352_s1 + $0x40] ss:$8 sps:$4 sm:$0xff]   ;;  %v37_v20 = vlaneseq }
   0xd   :  { %v225_v11 = vld [vmem:[%s352_s1 + $0x54] ss:$8 sps:$4 sm:$0xff]   ;;  %v227_v12 = vld [vmem:[%s352_s1 + $0x50] ss:$8 sps:$4 sm:$0xff]   ;;  %v228_v13 = vld [vmem:[%s352_s1 + $0x64] ss:$8 sps:$4 sm:$0xff]  }
   0xe   :  { %v230_v14 = vld [vmem:[%s352_s1 + $0x60] ss:$8 sps:$4 sm:$0xff]   ;;  %v231_v15 = vld [vmem:[%s352_s1 + $0x74] ss:$8 sps:$4 sm:$0xff]   ;;  %v233_v16 = vld [vmem:[%s352_s1 + $0x70] ss:$8 sps:$4 sm:$0xff]  }
   0xf   :  { %134 = vmatpush1.bf16.msra.mxu0 %v221_v8  ;;  %v16_v17 = vld [vmem:[%s351_s0] sm:$0xff]  ;;  %v17_v18 = vld [vmem:[%s351_s0 + $0x8] sm:$0xff]  ;;  %v38_v21 = vshrl.u32 %v37_v20, 7  ;;  %s259_s1 = smov [#allocation2]  }
  0x10   :  { %135 = vmatprep.subr.bf16.mxu0 %v222_v9  ;;  %v18_v19 = vpack.c.bf16 %v17_v18, %v16_v17  ;;  %v35_v23 = vld [vmem:[%s353_s2] sm:$0x3]  ;;  %s179_s23 = sshll.u32 %s259_s1, 4  ;;  %s180_s23 = int_to_ptr.vmem [resolvable:$true] %s179_s23 }
  0x11   :  { %v39_v22 = vsub.s32 0, %v38_v21  ;;  %v43_v24 = vsub.s32 1, %v38_v21  ;;  %s234_s0 = scalar_lea.vmem %s180_s23, 512  ;;  %p239_p1 = scmp.lt.s32.totalorder %s180_s23, %s180_s23 }
  0x12   :  { %p235_p0 = scmp.ne.s32.totalorder %s180_s23, %s234_s0  ;;  %p240_p2 = scmp.lt.s32.totalorder %s234_s0, %s234_s0 }
  0x13   :  { %136 = vmatpush1.bf16.msra.mxu0 %v224_v10  ;;  %v40_v25 = vrot.slane %v35_v23, %v39_v22  ;;  %v44_v26 = vrot.slane %v35_v23, %v43_v24 }
  0x14   :  { %137 = vmatprep.subr.bf16.mxu0 %v225_v11  ;;  %p241_p3 = por %p240_p2, %p239_p1 }
  0x16   :  { %p242_p4 = pnand %p241_p3, %p235_p0 }
  0x17   :  { %138 = vmatpush1.bf16.msra.mxu0 %v227_v12 }
  0x18   :  { %139 = vmatprep.subr.bf16.mxu0 %v228_v13 }
  0x1b   :  { %140 = vmatpush1.bf16.msra.mxu0 %v230_v14 }
  0x1c   :  { %141 = vmatprep.subr.bf16.mxu0 %v231_v15 }
  0x1f   :  { %142 = vmatpush1.bf16.msra.mxu0 %v233_v16 }
  0x22   :  { %160 = vmatmul.mubr.bf16.vlgmr.msra.gmra.mrb[0].mxu0 %v18_v19 }
  0xf5   :  { %v161_v27 = vpop.f32.mrb[0].mxu0 }
  0xf6   :  { %v162_v28 = vadd.f32 %v161_v27, %v40_v25  ;;  %v163_v29 = vpop.f32.mrb[1].mxu0 }
  0xf7   :  { %v164_v30 = vadd.f32 %v163_v29, %v44_v26  ;;  %v165_v31 = vpop.f32.mrb[2].mxu0 }
  0xf8   :  { %170 = vst [vmem:[#allocation2] sm:$0xff] %v162_v28  ;;  %v166_v32 = vadd.f32 %v165_v31, %v40_v25  ;;  %v167_v33 = vpop.f32.mrb[3].mxu0 }
  0xf9   :  { %171 = vst [vmem:[#allocation2 + $0x8] sm:$0xff] %v164_v30  ;;  %v168_v34 = vadd.f32 %v167_v33, %v44_v26 }
  0xfa   :  { %172 = vst [vmem:[#allocation2 + $0x10] sm:$0xff] %v166_v32 }
  0xfb   :  { %173 = vst [vmem:[#allocation2 + $0x18] sm:$0xff] %v168_v34 }
  0xfc   :  { %245 = shalt.err (!%p242_p4)
}
  0xfd   :  { %s246_s25 = scalar_lea.hbm %s354_s3, 512 }
  0xfe   :  { %p247_p5 = scmp.ne.s32.totalorder %s354_s3, %s246_s25  ;;  %p250_p6 = scmp.lt.u32.totalorder %s246_s25, %s354_s3 }
 0x100   :  { %p252_p7 = pnand %p250_p6, %p247_p5 }
 0x102   :  { %255 = shalt.err (!%p252_p7)
}
 0x103   :  { %s260_s30 = smov 256   ;;  %s261_s4 = smov 16  }
 0x104   :  { %185 = dma.vmem_to_hbm [thread:$0]  %s180_s23, 512, %s354_s3, [#allocation3], %s260_s30, %s260_s30, %s261_s4  }
 0x105   :  { %256 = dma.done.wait [#allocation3], 512  }
 0x106   :  { %257 = vsyncadd [#allocation3], 4294966784 }
 0x107   :  { %189 = vsyncpa [#allocation3], 1 }

// kernel: transformer_forward.3
= control target key start
LH: loop header
LB: loop body
LE: loop exit
PB: predicated region body
PF: predicated region fallthrough
CT: control target
= control target key end

     0   :  { %s5534_s0 = inlined_call_operand.vmem [shape: f32[2,8,128], index: 0, kind: input, shape index: {}]   ;;  %s5535_s1 = inlined_call_operand.vmem [shape: f32[2,8], index: 1, kind: input, shape index: {}]   ;;  %s5536_s2 = inlined_call_operand.vmem [shape: bf16[2,128,384], index: 2, kind: input, shape index: {}]   ;;  %s5537_s3 = inlined_call_operand.hbm [shape: bf16[2,128,128], index: 3, kind: input, shape index: {}]   ;;  %s5538_s4 = inlined_call_operand.hbm [shape: bf16[2,128,1024], index: 4, kind: input, shape index: {}]   ;;  %s5539_s5 = inlined_call_operand.hbm [shape: f32[2,1,1024], index: 5, kind: input, shape index: {}]   ;;  %s5540_s6 = inlined_call_operand.hbm [shape: bf16[2,1024,128], index: 6, kind: input, shape index: {}]   ;;  %s5541_s7 = inlined_call_operand.vmem [shape: f32[2,9,128], index: 7, kind: input, shape index: {}]   ;;  %s5542_s8 = inlined_call_operand.vmem [shape: f32[2,8,128], index: 8, kind: output, shape index: {}]  }
   0x1   :  { %5549 = sst [smem:[#allocation13_spill]] %s5537_s3 }
   0x2   :  { %5550 = sst [smem:[#allocation14_spill]] %s5538_s4 }
   0x3   :  { %13 = vsyncpa [#allocation3], 0 }
   0x4   :  { %15 = vsyncpa [#allocation3 + $0x1], 0 }
   0x5   :  { %16 = vsyncpa [#allocation5], 0 }
   0x6   :  { %18 = vsyncpa [#allocation5 + $0x1], 0 }
   0x7   :  { %19 = vsyncpa [#allocation8], 0 }
   0x8   :  { %21 = vsyncpa [#allocation8 + $0x1], 0  ;;  %s4798_s27 = smov 0   ;;  %s4800_s28 = smov 0  }
   0x9   :  { %s4802_s29 = smov 0   ;;  %s4804_s30 = smov 0  }
   0xa LB: > { %s4817_s9 = sadd.s32 4294967295, %s4736_s30   ;;  %s4820_s10 = sadd.s32 1, %s4736_s30   ;;  %s4736_s30 = sphi %s4804_s30, %s5568_s30   ;;  %s4732_s29 = sphi %s4802_s29, %s5567_s29   ;;  %s4728_s28 = sphi %s4800_s28, %s5566_s28   ;;  %s4724_s27 = sphi %s4798_s27, %s5565_s27  }
   0xb   : > { %s99_s11 = ssub.s32 %s4736_s30, %s4820_s10  ;;  %s102_s12 = sadd.s32 1, %s4732_s29 }
   0xc   : > { %p100_p0 = scmp.eq.s32.totalorder %s99_s11, 0  ;;  %p109_p1 = scmp.ne.s32.totalorder %s4732_s29, %s4728_s28 }
   0xd   : > { %p110_p2 = scmp.eq.s32.totalorder %s4736_s30, 0  ;;  %p115_p3 = scmp.ne.s32.totalorder %s4728_s28, %s4724_s27 }
   0xe   : > { %s4830_s13 = scalar_select %p100_p0, %s4732_s29, %s102_s12  }
   0xf   : > { %p111_p4 = por %p110_p2, %p109_p1  ;;  %p116_p5 = scmp.eq.s32.totalorder %s4817_s9, 0 }
  0x10   : > { %5551 = sst [smem:[#allocation12_spill]] %s4830_s13  ;;  %p4385_p6 = scmp.lt.s32.totalorder %s4736_s30, 2 }
  0x11   : > { %p4834_p7 = por %p116_p5, %p115_p3  ;;  %s4839_s15 = sand.u32 1, %s4732_s29  }
  0x12   : > { %p4841_p8 = pnand %p4385_p6, %p111_p4  ;;  %s299_s17 = sand.u32 1, %s4736_s30  }
  0x13   : > { %s5552_s14 = scalar_select %p4834_p7, 1, 0 }
  0x14   : > { %s5553_s16 = scalar_select %p4841_p8, 1, 0 }
  0x15   : > { %s5544_s18 = sshll.u32 %s4839_s15, 9  ;;  %s5545_s19 = sshll.u32 %s4736_s30, 13 }
  0x16   : > { %s303_s20 = scalar_lea.vmem [#allocation4], %s5544_s18  ;;  %s5554_s4 = sld [smem:[#allocation14_spill]] }
  0x17   : > { %s310_s21 = sshll.u32 %s303_s20, 4  ;;  %s4859_s25 = scalar_lea.sflag [#allocation5], %s299_s17  ;;  %s4857_s21 = int_to_ptr.vmem [resolvable:$true] %s310_s21 }
  0x18   : > { %p4865_p10 = pneg %p4841_p8 }
  0x1c   : > { %s4855_s24 = scalar_lea.hbm %s5554_s4, %s5545_s19  ;;  %s4579_s20 = scalar_lea.hbm %s5554_s4, 16384 }
  0x1d   : > { %s4574_s26 = scalar_lea.hbm %s4855_s24, 8192  ;;  %p4580_p13 = scmp.lt.u32.totalorder %s4855_s24, %s5554_s4 }
  0x1e   : > { %p4575_p9 = scmp.ne.s32.totalorder %s4855_s24, %s4574_s26  ;;  %p4581_p0 = scmp.lt.u32.totalorder %s4579_s20, %s4574_s26 }
  0x1f   : > { %p4583_p2 = scmp.lt.u32.totalorder %s4574_s26, %s4855_s24 }
  0x20   : > { %p4577_p11 = pnand %p4865_p10, %p4575_p9  ;;  %p4582_p1 = por %p4581_p0, %p4580_p13 }
  0x22   : > { %p4578_p12 = pneg %p4577_p11  ;;  %p4584_p3 = por %p4583_p2, %p4582_p1 }
  0x24   : > { %p4585_p4 = pnand %p4584_p3, %p4578_p12 }
  0x26   : > { %4588 = shalt.err (!%p4585_p4)
}
  0x27   : > { %s4589_s17 = scalar_lea.vmem %s4857_s21, 8192  ;;  %s4738_s11 = smov [#allocation4]  }
  0x28   : > { %p4590_p5 = scmp.ne.s32.totalorder %s4857_s21, %s4589_s17  ;;  %s4594_s12 = sshll.u32 %s4738_s11, 4  ;;  %s4595_s12 = int_to_ptr.vmem [resolvable:$false] %s4594_s12 }
  0x29   : > { %s4596_s22 = scalar_lea.vmem %s4595_s12, 16384  ;;  %p4597_p11 = scmp.lt.s32.totalorder %s4857_s21, %s4595_s12 }
  0x2a   : > { %p4592_p6 = pnand %p4590_p5, %p4865_p10  ;;  %p4598_p7 = scmp.lt.s32.totalorder %s4596_s22, %s4589_s17 }
  0x2c   : > { %p4593_p9 = pneg %p4592_p6  ;;  %p4599_p13 = por %p4598_p7, %p4597_p11 }
  0x2e   : > { %p4600_p0 = pnand %p4599_p13, %p4593_p9 }
  0x30   : > { %4603 = shalt.err (!%p4600_p0)
}
  0x31   : > { %s4739_s26 = smov 512   ;;  %s4740_s20 = smov 32  }
  0x32   : > { %4378 = dma.hbm_to_vmem [thread:$0]  (!%p4841_p8), %s4855_s24, 8192, %s4857_s21, %s4859_s25, %s4739_s26, %s4739_s26, %s4740_s20  }
  0x33   : > { %p3884_p12 = scmp.ge.s32.totalorder %s4736_s30, 1  ;;  %p366_p1 = scmp.lt.s32.totalorder %s4736_s30, 3 }
  0x34   : > { %s3872_s23 = sshll.u32 %s4839_s15, 6  ;;  %s4085_s11 = sshll.u32 %s4736_s30, 10 }
  0x35   : > { %p4892_p7 = pnand %p3884_p12, %p366_p1  ;;  %s282_s12 = scalar_lea.vmem [#allocation2], %s3872_s23 }
  0x36   : > { %s289_s22 = sshll.u32 %s282_s12, 4  ;;  %s5557_s3 = sld [smem:[#allocation13_spill]]  ;;  %s4902_s22 = int_to_ptr.vmem [resolvable:$true] %s289_s22 }
  0x37   : > { %s5556_s17 = scalar_select %p4892_p7, 1, 0 }
  0x38   : > { %s279_s21 = scalar_lea.sflag [#allocation3], %s4839_s15 }
  0x3c   : > { %s4900_s4 = scalar_lea.hbm %s5557_s3, %s4085_s11  ;;  %s4609_s23 = scalar_lea.hbm %s5557_s3, 2048 }
  0x3d   : > { %s4604_s24 = scalar_lea.hbm %s4900_s4, 1024  ;;  %p4610_p5 = scmp.lt.u32.totalorder %s4900_s4, %s5557_s3 }
  0x3e   : > { %p4605_p2 = scmp.ne.s32.totalorder %s4900_s4, %s4604_s24  ;;  %p4611_p6 = scmp.lt.u32.totalorder %s4609_s23, %s4604_s24 }
  0x3f   : > { %p4613_p11 = scmp.lt.u32.totalorder %s4604_s24, %s4900_s4 }
  0x40   : > { %p4607_p3 = pnand %p4605_p2, %p4865_p10  ;;  %p4612_p9 = por %p4611_p6, %p4610_p5 }
  0x42   : > { %p4608_p4 = pneg %p4607_p3  ;;  %p4614_p13 = por %p4613_p11, %p4612_p9 }
  0x44   : > { %p4615_p0 = pnand %p4614_p13, %p4608_p4 }
  0x46   : > { %4618 = shalt.err (!%p4615_p0)
}
  0x47   : > { %s4619_s19 = scalar_lea.vmem %s4902_s22, 1024  ;;  %s4741_s11 = smov [#allocation2]  }
  0x48   : > { %p4620_p12 = scmp.ne.s32.totalorder %s4902_s22, %s4619_s19  ;;  %s4624_s26 = sshll.u32 %s4741_s11, 4  ;;  %s4625_s26 = int_to_ptr.vmem [resolvable:$false] %s4624_s26 }
  0x49   : > { %s4626_s20 = scalar_lea.vmem %s4625_s26, 2048  ;;  %p4627_p3 = scmp.lt.s32.totalorder %s4902_s22, %s4625_s26 }
  0x4a   : > { %p4622_p1 = pnand %p4620_p12, %p4865_p10  ;;  %p4628_p7 = scmp.lt.s32.totalorder %s4626_s20, %s4619_s19 }
  0x4c   : > { %p4623_p2 = pneg %p4622_p1  ;;  %p4629_p5 = por %p4628_p7, %p4627_p3 }
  0x4e   : > { %p4630_p6 = pnand %p4629_p5, %p4623_p2 }
  0x50   : > { %4633 = shalt.err (!%p4630_p6)
}
  0x51   : > { %s5546_s24 = smov 64   ;;  %s4743_s23 = smov 4  }
  0x52   : > { %4375 = dma.hbm_to_vmem [thread:$0]  (!%p4841_p8), %s4900_s4, 1024, %s4902_s22, %s279_s21, %s5546_s24, %s5546_s24, %s4743_s23  }
  0x53   : > { %s3878_s12 = sshll.u32 %s4839_s15, 3  ;;  %s4087_s18 = sshll.u32 %s4736_s30, 7 }
  0x54   : > { %s4936_s26 = scalar_lea.hbm %s5539_s5, %s4087_s18  ;;  %s324_s20 = scalar_lea.vmem [#allocation6], %s3878_s12 }
  0x55   : > { %s332_s3 = sshll.u32 %s324_s20, 4  ;;  %s4634_s13 = scalar_lea.hbm %s4936_s26, 128  ;;  %s333_s3 = int_to_ptr.vmem [resolvable:$true] %s332_s3 }
  0x56   : > { %p4635_p7 = scmp.ne.s32.totalorder %s4936_s26, %s4634_s13  ;;  %s4639_s21 = scalar_lea.hbm %s5539_s5, 256 }
  0x57   : > { %p4640_p11 = scmp.lt.u32.totalorder %s4936_s26, %s5539_s5  ;;  %p4641_p13 = scmp.lt.u32.totalorder %s4639_s21, %s4634_s13 }
  0x58   : > { %p4637_p4 = pnand %p4635_p7, %p4865_p10  ;;  %p4643_p12 = scmp.lt.u32.totalorder %s4634_s13, %s4936_s26 }
  0x59   : > { %p4642_p0 = por %p4641_p13, %p4640_p11 }
  0x5a   : > { %p4638_p9 = pneg %p4637_p4 }
  0x5b   : > { %p4644_p1 = por %p4643_p12, %p4642_p0 }
  0x5d   : > { %p4645_p2 = pnand %p4644_p1, %p4638_p9 }
  0x5f   : > { %4648 = shalt.err (!%p4645_p2)
}
  0x60   : > { %s4649_s12 = scalar_lea.vmem %s333_s3, 128  ;;  %s4744_s18 = smov [#allocation6]  }
  0x61   : > { %p4650_p3 = scmp.ne.s32.totalorder %s333_s3, %s4649_s12  ;;  %s4654_s11 = sshll.u32 %s4744_s18, 4  ;;  %s4655_s11 = int_to_ptr.vmem [resolvable:$false] %s4654_s11 }
  0x62   : > { %s4656_s20 = scalar_lea.vmem %s4655_s11, 256  ;;  %p4657_p7 = scmp.lt.s32.totalorder %s333_s3, %s4655_s11 }
  0x63   : > { %p4652_p5 = pnand %p4650_p3, %p4865_p10  ;;  %p4658_p4 = scmp.lt.s32.totalorder %s4656_s20, %s4649_s12 }
  0x65   : > { %p4653_p6 = pneg %p4652_p5  ;;  %p4659_p8 = por %p4658_p4, %p4657_p7 }
  0x67   : > { %p4660_p11 = pnand %p4659_p8, %p4653_p6 }
  0x69   : > { %4663 = shalt.err (!%p4660_p11)
}
  0x6a   : > { %p5558_p13 = scmp.ne.s32.totalorder %s5553_s16, 0  ;;  %s5559_s13 = sshll.u32 %s4736_s30, 13 }
  0x6b   : > { %s4961_s22 = scalar_lea.hbm %s5540_s6, %s5559_s13  ;;  %s5560_s21 = sshll.u32 %s4839_s15, 9 }
  0x6c   : > { %4381 = dma.hbm_to_vmem [thread:$0]  (!%p5558_p13), %s4936_s26, 128, %s333_s3, %s4859_s25  }
  0x6d   : > { %s343_s19 = scalar_lea.vmem [#allocation7], %s5560_s21  ;;  %s340_s18 = scalar_lea.sflag [#allocation8], %s4839_s15 }
  0x6e   : > { %s350_s12 = sshll.u32 %s343_s19, 4  ;;  %s4664_s11 = scalar_lea.hbm %s4961_s22, 8192  ;;  %s4965_s12 = int_to_ptr.vmem [resolvable:$true] %s350_s12 }
  0x6f   : > { %p4665_p8 = scmp.ne.s32.totalorder %s4961_s22, %s4664_s11  ;;  %s4669_s25 = scalar_lea.hbm %s5540_s6, 16384 }
  0x70   : > { %p4670_p12 = scmp.lt.u32.totalorder %s4961_s22, %s5540_s6  ;;  %p4671_p1 = scmp.lt.u32.totalorder %s4669_s25, %s4664_s11 }
  0x71   : > { %p4667_p9 = pnand %p4665_p8, %p4865_p10  ;;  %p4673_p3 = scmp.lt.u32.totalorder %s4664_s11, %s4961_s22 }
  0x72   : > { %p4672_p2 = por %p4671_p1, %p4670_p12 }
  0x73   : > { %p4668_p0 = pneg %p4667_p9 }
  0x74   : > { %p4674_p5 = por %p4673_p3, %p4672_p2 }
  0x76   : > { %p4675_p6 = pnand %p4674_p5, %p4668_p0 }
  0x78   : > { %4678 = shalt.err (!%p4675_p6)
}
  0x79   : > { %s4679_s13 = scalar_lea.vmem %s4965_s12, 8192  ;;  %s4745_s24 = smov [#allocation7]  }
  0x7a   : > { %p4680_p7 = scmp.ne.s32.totalorder %s4965_s12, %s4679_s13  ;;  %s4684_s4 = sshll.u32 %s4745_s24, 4  ;;  %s4685_s4 = int_to_ptr.vmem [resolvable:$false] %s4684_s4 }
  0x7b   : > { %s4686_s21 = scalar_lea.vmem %s4685_s4, 16384  ;;  %p4687_p8 = scmp.lt.s32.totalorder %s4965_s12, %s4685_s4 }
  0x7c   : > { %p4682_p4 = pnand %p4680_p7, %p4865_p10  ;;  %p4688_p9 = scmp.lt.s32.totalorder %s4686_s21, %s4679_s13 }
  0x7e   : > { %p4683_p11 = pneg %p4682_p4  ;;  %p4689_p12 = por %p4688_p9, %p4687_p8 }
  0x80   : > { %p4690_p1 = pnand %p4689_p12, %p4683_p11 }
  0x82   : > { %4693 = shalt.err (!%p4690_p1)
}
  0x83   : > { %s5561_s19 = smov 64   ;;  %p5562_p10 = scmp.ne.s32.totalorder %s5556_s17, 0 }
  0x84   : > { %4384 = dma.hbm_to_vmem [thread:$0]  (!%p5558_p13), %s4961_s22, 8192, %s4965_s12, %s340_s18, %s5561_s19, %s5561_s19, %s4743_s23  }
  0x85   : > { %370 = sbr.rel (%p5562_p10) target bundleno = 4102 (0x1006), region = 52  ;;  %s372_s27 = sand.u32 (!%p5562_p10), 1, %s4728_s28  }
  0x86   : > { %s3885_s11 = sshll.u32 (!%p5562_p10), %s372_s27, 6  ;;  %s373_s3 = scalar_lea.sflag (!%p5562_p10), [#allocation3], %s372_s27 }
  0x87   : > { %s4997_s30 = scalar_lea.vmem (!%p5562_p10), [#allocation2], %s3885_s11  ;;  %p5563_p0 = scmp.ne.s32.totalorder (!%p5562_p10), %s5552_s14, 0 }
  0x8c   : > { %4711 = dma.done.wait (%p5563_p0), %s373_s3, 1024  }
  0x8d   : > { %4713 = vsyncadd (%p5563_p0), %s373_s3, 4294966272  ;;  %s381_s15 = sand.u32 1, %s4817_s9   ;;  %s3886_s16 = sshll.u32 %s372_s27, 9 }
  0x8e   : > { %s382_s23 = scalar_lea.sflag [#allocation5], %s381_s15  ;;  %s5004_s22 = scalar_lea.vmem [#allocation4], %s3886_s16 }
  0x8f   : > { %4715 = dma.done.wait (%p5563_p0), %s382_s23, 8320  }
  0x90   : > { %4717 = vsyncadd (%p5563_p0), %s382_s23, 4294958976  ;;  %s3887_s17 = sshll.u32 %s372_s27, 3  ;;  %s400_s18 = scalar_lea.sflag [#allocation8], %s372_s27 }
  0x91   : > { %s5010_s12 = scalar_lea.vmem [#allocation6], %s3887_s17  ;;  %s5012_s25 = scalar_lea.vmem [#allocation7], %s3886_s16 }
  0x92   : > { %4719 = dma.done.wait (%p5563_p0), %s400_s18, 8192  }
  0x93   : > { %4721 = vsyncadd (%p5563_p0), %s400_s18, 4294959104  ;;  %p456_p13 = scmp.lt.s32.totalorder %s4817_s9, 1  ;;  %p3892_p2 = scmp.ne.s32.totalorder %s4817_s9, 0 }
  0x94   : > { %v471_v0 = vld [vmem:[%s5534_s0] sm:$0xff] (!%p3892_p2)  ;;  %v472_v1 = vld [vmem:[%s5534_s0 + $0x8] sm:$0xff] (!%p3892_p2) }
  0x95   : > { %s457_s26 = scalar_select %p456_p13, %s4817_s9, 1 }
  0x96   : > { %470 = sbr.rel (%p3892_p2) target bundleno = 157 (0x9d), region = 72  ;;  %473 = vst [vmem:[%s5542_s8] sm:$0xff] (!%p3892_p2), %v471_v0  ;;  %474 = vst [vmem:[%s5542_s8 + $0x8] sm:$0xff] (!%p3892_p2), %v472_v1 }
  0x97   : > { %s4363_s20 = smul.u32 192, %s457_s26  ;;  %s4089_s13 = sshll.u32 %s457_s26, 4 }
  0x98   : > { %s5023_s21 = scalar_lea.vmem %s5541_s7, %s4089_s13 }
  0x99   : > { %s5028_s11 = scalar_lea.vmem %s5536_s2, %s4363_s20 }
  0x9d PF: > { %v4429_v2 = vld [vmem:[%s5028_s11 + $0x4] ss:$12 sps:$4 sm:$0xff]   ;;  %v4431_v3 = vld [vmem:[%s5028_s11] ss:$12 sps:$4 sm:$0xff]   ;;  %v4746_v4 = vmov 0   ;;  %v4747_v5 = vmov 0.0   ;;  %v486_v31 = vlaneseq }
  0x9e   : > { %698 = vmatprep.mubr.bf16.mxu0 %v4746_v4  ;;  %4231 = vmatprep.subr.bf16.mxu1 %v4747_v5  ;;  %v4432_v6 = vld [vmem:[%s5028_s11 + $0x1c] ss:$12 sps:$4 sm:$0xff]   ;;  %vm4748_vm0 = vmmov 0   ;;  %v4434_v7 = vld [vmem:[%s5028_s11 + $0x18] ss:$12 sps:$4 sm:$0xff]   ;;  %vm784_vm1 = vcmask 261120  }
  0x9f   : > { %666 = vmatprep.subr.bf16.mxu0 %v4429_v2  ;;  %4247 = vmatprep.mubr.msk.bf16.mxu1 %vm4748_vm0, %v4747_v5  ;;  %v4435_v8 = vld [vmem:[%s5028_s11 + $0x34] ss:$12 sps:$4 sm:$0xff]   ;;  %v4437_v9 = vld [vmem:[%s5028_s11 + $0x30] ss:$12 sps:$4 sm:$0xff]   ;;  %v4438_v10 = vld [vmem:[%s5028_s11 + $0x4c] ss:$12 sps:$4 sm:$0xff]  }
  0xa0   : > { %667 = vmatpush1.bf16.msra.mxu0 %v4431_v3  ;;  %v4440_v11 = vld [vmem:[%s5028_s11 + $0x48] ss:$12 sps:$4 sm:$0xff]   ;;  %v4441_v12 = vld [vmem:[%s5028_s11 + $0x64] ss:$12 sps:$4 sm:$0xff]   ;;  %v4454_v14 = vld [vmem:[%s5028_s11 + $0x20] ss:$12 sps:$4 sm:$0xff]  }
  0xa1   : > { %668 = vmatprep.subr.bf16.mxu0 %v4432_v6  ;;  %v4453_v13 = vld [vmem:[%s5028_s11 + $0x8] ss:$12 sps:$4 sm:$0xff]   ;;  %v4443_v15 = vld [vmem:[%s5028_s11 + $0x60] ss:$12 sps:$4 sm:$0xff]   ;;  %v4455_v17 = vld [vmem:[%s5028_s11 + $0x38] ss:$12 sps:$4 sm:$0xff]  }
  0xa2   : > { %4232 = vmatpush3.bf16.msra.mxu1 %v4453_v13  ;;  %v4444_v16 = vld [vmem:[%s5028_s11 + $0x7c] ss:$12 sps:$4 sm:$0xff]   ;;  %v4446_v18 = vld [vmem:[%s5028_s11 + $0x78] ss:$12 sps:$4 sm:$0xff]   ;;  %v4447_v19 = vld [vmem:[%s5028_s11 + $0x94] ss:$12 sps:$4 sm:$0xff]  }
  0xa3   : > { %4233 = vmatprep.subr.bf16.mxu1 %v4747_v5  ;;  %v4456_v20 = vld [vmem:[%s5028_s11 + $0x50] ss:$12 sps:$4 sm:$0xff]   ;;  %v4450_v22 = vld [vmem:[%s5028_s11 + $0xac] ss:$12 sps:$4 sm:$0xff]   ;;  %v4457_v23 = vld [vmem:[%s5028_s11 + $0x68] ss:$12 sps:$4 sm:$0xff]  }
  0xa4   : > { %669 = vmatpush1.bf16.msra.mxu0 %v4434_v7  ;;  %v4449_v21 = vld [vmem:[%s5028_s11 + $0x90] ss:$12 sps:$4 sm:$0xff]   ;;  %v4452_v24 = vld [vmem:[%s5028_s11 + $0xa8] ss:$12 sps:$4 sm:$0xff]   ;;  %v5074_v25 = vld [vmem:[%s5542_s8] sm:$0xff]  ;;  %v5096_v32 = vshrl.u32 %v486_v31, 7 }
  0xa5   : > { %670 = vmatprep.subr.bf16.mxu0 %v4435_v8  ;;  %v5079_v26 = vld [vmem:[%s5542_s8 + $0x8] sm:$0xff]  ;;  %v4459_v29 = vld [vmem:[%s5028_s11 + $0x98] ss:$12 sps:$4 sm:$0xff]   ;;  %v4460_v30 = vld [vmem:[%s5028_s11 + $0xb0] ss:$12 sps:$4 sm:$0xff]   ;;  %s4749_s4 = smov 96  }
  0xa6   : > { %4234 = vmatpush3.bf16.msra.mxu1 %v4454_v14  ;;  %v4458_v27 = vld [vmem:[%s5028_s11 + $0x80] ss:$12 sps:$4 sm:$0xff]   ;;  %v537_v28 = vpack.c.bf16 %v5079_v26, %v5074_v25  ;;  %v758_v33 = vsub.s32 1, %v5096_v32  ;;  %v5103_v35 = vsub.s32 0, %v5096_v32  ;;  %v764_v44 = vsub.s32 2, %v5096_v32  ;;  %s4751_s11 = smov 64  }
  0xa7   : > { %4235 = vmatprep.subr.bf16.mxu1 %v4747_v5  ;;  %v5100_v34 = vld [vmem:[%s5023_s21] sm:$0xff]  ;;  %v4750_v54 = vmov 1966171168   ;;  %vm951_vm2 = vcmask 64512   ;;  %s4752_s14 = smov 32  }
  0xa8   : > { %671 = vmatpush1.bf16.msra.mxu0 %v4437_v9  ;;  %v759_v36 = vrot.slane %v5100_v34, %v758_v33  ;;  %v753_v38 = vrot.slane %v5100_v34, %v5103_v35  ;;  %v765_v47 = vrot.slane %v5100_v34, %v764_v44  ;;  %v484_v55 = vunpack.c.l.s4 %v4750_v54  ;;  %v479_v56 = vld [vmem:[%s5535_s1] sm:$0x3] }
  0xa9   : > { %672 = vmatprep.subr.bf16.mxu0 %v4438_v10  ;;  %v3893_v57 = vadd.f32 -1.0, %v479_v56 }
  0xaa   : > { %4236 = vmatpush3.bf16.msra.mxu1 %v4455_v17  ;;  %v485_v58 = vunpack.c.0.s8 %v484_v55 }
  0xab   : > { %4237 = vmatprep.subr.bf16.mxu1 %v4747_v5  ;;  %v481_v59 = vmul.f32 1e+10, %v3893_v57 }
  0xac   : > { %673 = vmatpush1.bf16.msra.mxu0 %v4440_v11  ;;  %v488_v60 = vsub.s32 %v485_v58, %v5096_v32 }
  0xad   : > { %674 = vmatprep.subr.bf16.mxu0 %v4441_v12 }
  0xae   : > { %4238 = vmatpush3.bf16.msra.mxu1 %v4456_v20  ;;  %v489_v61 = vrot.slane %v481_v59, %v488_v60 }
  0xaf   : > { %4239 = vmatprep.subr.bf16.mxu1 %v4747_v5 }
  0xb0   : > { %675 = vmatpush1.bf16.msra.mxu0 %v4443_v15  ;;  %v490_v62 = vcombine.high %v489_v61, %v489_v61  ;;  %v497_v63 = vrot.slane %v489_v61, %v488_v60 }
  0xb1   : > { %676 = vmatprep.subr.bf16.mxu0 %v4444_v16 }
  0xb2   : > { %4240 = vmatpush3.bf16.msra.mxu1 %v4457_v23  ;;  %v504_v0 = vrot.slane %v490_v62, %v488_v60  ;;  %v5153_v1 = vrot.slane %v497_v63, %v5103_v35 }
  0xb3   : > { %4241 = vmatprep.subr.bf16.mxu1 %v4747_v5 }
  0xb4   : > { %677 = vmatpush1.bf16.msra.mxu0 %v4446_v18  ;;  %v5156_v7 = vrot.slane %v504_v0, %v5103_v35 }
  0xb5   : > { %678 = vmatprep.subr.bf16.mxu0 %v4447_v19 }
  0xb6   : > { %4242 = vmatpush3.bf16.msra.mxu1 %v4458_v27 }
  0xb7   : > { %4243 = vmatprep.subr.bf16.mxu1 %v4747_v5 }
  0xb8   : > { %679 = vmatpush1.bf16.msra.mxu0 %v4449_v21 }
  0xb9   : > { %680 = vmatprep.subr.bf16.mxu0 %v4450_v22 }
  0xba   : > { %4244 = vmatpush3.bf16.msra.mxu1 %v4459_v29 }
  0xbb   : > { %4245 = vmatprep.subr.bf16.mxu1 %v4747_v5 }
  0xbc   : > { %681 = vmatpush1.bf16.msra.mxu0 %v4452_v24 }
  0xbd   : > { %4251 = vmatprep.subr.mxu0 %v4747_v5 }
  0xbe   : > { %4246 = vmatpush3.bf16.msra.mxu1 %v4460_v30 }
  0xbf   : > { %699 = vmatmul.mubr.bf16.vlgmr.msra.gmra.mrb[0].mxu0 %v537_v28  ;;  %4256 = vmatprep.subr.mxu1 %v4747_v5 }
  0xc0   : > { %4253 = vmatprep.mubr.msk.f32.mxu0 %vm4748_vm0, %v4747_v5 }
  0xc1   : > { %4248 = vmatmul.mubr.bf16.vlgmr.msra.gmra.mrb[0].mxu1 %v537_v28 }
  0xc2   : > { %4258 = vmatprep.mubr.msk.f32.mxu1 %vm4748_vm0, %v4747_v5 }
 0x192   : > { %v700_v37 = vpop.f32.mrb[0].mxu0 }
 0x193   : > { %v702_v39 = vpop.f32.mrb[1].mxu0  ;;  %v5117_v45 = vadd.f32 %v753_v38, %v700_v37 }
 0x194   : > { %v5110_v40 = vadd.f32 %v759_v36, %v702_v39  ;;  %v704_v41 = vpop.f32.mrb[2].mxu0  ;;  %v743_v48 = vpop.f32.mrb[0].mxu1 }
 0x195   : > { %v706_v42 = vpop.f32.mrb[3].mxu0  ;;  %v5124_v46 = vadd.f32 %v753_v38, %v704_v41  ;;  %v5140_v49 = vadd.f32 %v765_v47, %v743_v48  ;;  %v4249_v50 = vpop.f32.mrb[1].mxu1 }
 0x196   : > { %v5112_v43 = vadd.f32 %v759_v36, %v706_v42  ;;  %4252 = vmatpush3.xpose.msk.msra.mxu0 %vm784_vm1, %v5110_v40  ;;  %v746_v51 = vpop.f32.mrb[2].mxu1 }
 0x197   : > { %4261 = vmatprep.subr.mxu0 %v4747_v5  ;;  %v5142_v52 = vadd.f32 %v765_v47, %v746_v51  ;;  %v4250_v53 = vpop.f32.mrb[3].mxu1 }
 0x198   : > { %1201 = vrot.lane.b32.xlu1 %v5112_v43, %s4749_s4  ;;  %4257 = vmatpush3.xpose.msk.msra.mxu1 %vm784_vm1, %v5112_v43 }
 0x199   : > { %4254 = vmatmul.mubr.msk.f32.vlgmr.msra.gmra.mrb[4].mxu0 %vm784_vm1, %v5117_v45  ;;  %4266 = vmatprep.subr.mxu1 %v4747_v5 }
 0x19a   : > { %4263 = vmatprep.mubr.msk.f32.mxu0 %vm4748_vm0, %v4747_v5  ;;  %4262 = vmatpush3.msra.mxu0 %v5140_v49 }
 0x19b   : > { %4259 = vmatmul.mubr.msk.f32.vlgmr.msra.gmra.mrb[4].mxu1 %vm784_vm1, %v5124_v46  ;;  %4271 = vmatprep.subr.mxu0 %v4747_v5 }
 0x19c   : > { %1121 = vrot.lane.b32.xlu1 %v5117_v45, %s4749_s4  ;;  %4268 = vmatprep.mubr.msk.f32.mxu1 %vm4748_vm0, %v4747_v5 }
 0x19d   : > { %4267 = vmatpush3.msra.mxu1 %v5142_v52 }
 0x19e   : > { %4276 = vmatprep.subr.mxu1 %v4747_v5 }
 0x20a   : > { %v1202_v27 = vpop.permute.xlu1 %1201 }
 0x20e   : > { %v1122_v28 = vpop.permute.xlu1 %1121 }
 0x26c   : > { %v857_v2 = vpop.f32.mrb[4].mxu0 }
 0x26d   : > { %v937_v3 = vmul.f32 0.17677669, %v857_v2  ;;  %v4255_v6 = vpop.f32.mrb[5].mxu0 }
 0x26e   : > { %v933_v8 = vpop.f32.mrb[4].mxu1 }
 0x26f   : > { %v938_v9 = vmul.f32 0.17677669, %v933_v8  ;;  %v4260_v10 = vpop.f32.mrb[5].mxu1  ;;  %v949_v11 = vadd.f32 %v5153_v1, %v937_v3 }
 0x271   : > { %v952_v12 = vsel %vm951_vm2, %v949_v11, -inf  ;;  %v950_v13 = vadd.f32 %v5156_v7, %v938_v9 }
 0x272   : > { %953 = vmax.xlane.f32.xlu0 %v952_v12 }
 0x273   : > { %v955_v14 = vsel %vm951_vm2, %v950_v13, -inf }
 0x276   : > { %956 = vmax.xlane.f32.xlu0 %v955_v14 }
 0x28c   : > { %1123 = vrot.lane.b32.xlu0 %v5110_v40, %s4749_s4 }
 0x2ff   : > { %v954_v15 = vpop.xlane.xlu0 %953 }
 0x300   : > { %v958_v16 = vsub.f32 %v949_v11, %v954_v15 }
 0x302   : > { %v960_v17 = vmul.f32 1.442695, %v958_v16 }
 0x303   : > { %v957_v18 = vpop.xlane.xlu0 %956 }
 0x304   : > { %4533 = vpow2.f32 %v960_v17  ;;  %v959_v19 = vsub.f32 %v950_v13, %v957_v18  ;;  %v4463_v18 = vld [vmem:[%s4997_s30 + $0x10] sm:$0xff]  }
 0x306   : > { %v962_v20 = vmul.f32 1.442695, %v959_v19 }
 0x307   : > { %v1124_v37 = vpop.permute.xlu0 %1123 }
 0x308   : > { %4535 = vpow2.f32 %v962_v20 }
 0x30e   : > { %v4534_v21 = vpop.eup %4533 }
 0x30f   : > { %v964_v22 = vsel %vm951_vm2, %v4534_v21, 0.0 }
 0x310   : > { %965 = vadd.xlane.f32.xlu1 %v964_v22  ;;  %v4464_v22 = vld [vmem:[%s4997_s30 + $0x18] sm:$0xff]  }
 0x312   : > { %v4536_v23 = vpop.eup %4535 }
 0x313   : > { %v967_v24 = vsel %vm951_vm2, %v4536_v23, 0.0 }
 0x314   : > { %968 = vadd.xlane.f32.xlu1 %v967_v24 }
 0x325   : > { %1199 = vrot.lane.b32.xlu1 %v5124_v46, %s4749_s4 }
 0x39d   : > { %v966_v29 = vpop.xlane.xlu1 %965 }
 0x39e   : > { %4537 = vrcp.f32 %v966_v29 }
 0x3a1   : > { %v969_v30 = vpop.xlane.xlu1 %968 }
 0x3a2   : > { %4539 = vrcp.f32 %v969_v30 }
 0x3a5   : > { %v1200_v41 = vpop.permute.xlu1 %1199 }
 0x3a8   : > { %v4538_v31 = vpop.eup %4537 }
 0x3a9   : > { %v971_v36 = vmul.f32 %v4538_v31, %v4534_v21  ;;  %v4461_v21 = vld [vmem:[%s4997_s30] sm:$0xff]  }
 0x3ab   : > { %4264 = vmatmul.mubr.msk.f32.vlgmr.msra.gmra.mrb[6].mxu0 %vm951_vm2, %v971_v36 }
 0x3ac   : > { %v4540_v38 = vpop.eup %4539  ;;  %4272 = vmatpush3.xpose.msk.msra.mxu0 %vm784_vm1, %v1124_v37  ;;  %4273 = vmatprep.mubr.msk.f32.mxu0 %vm4748_vm0, %v4747_v5 }
 0x3ad   : > { %v973_v39 = vmul.f32 %v4540_v38, %v4536_v23  ;;  %4281 = vmatprep.subr.mxu0 %v4747_v5  ;;  %v4462_v23 = vld [vmem:[%s4997_s30 + $0x8] sm:$0xff]  }
 0x3af   : > { %4269 = vmatmul.mubr.msk.f32.vlgmr.msra.gmra.mrb[6].mxu1 %vm951_vm2, %v973_v39  ;;  %4274 = vmatmul.mubr.msk.f32.vlgmr.msra.gmra.mrb[8].mxu0 %vm784_vm1, %v1122_v28 }
 0x3b0   : > { %4277 = vmatpush3.xpose.msk.msra.mxu1 %vm784_vm1, %v1202_v27  ;;  %4278 = vmatprep.mubr.msk.f32.mxu1 %vm4748_vm0, %v4747_v5 }
 0x3b1   : > { %4286 = vmatprep.subr.mxu1 %v4747_v5  ;;  %4283 = vmatprep.mubr.msk.f32.mxu0 %vm4748_vm0, %v4747_v5 }
 0x3b3   : > { %4279 = vmatmul.mubr.msk.f32.vlgmr.msra.gmra.mrb[8].mxu1 %vm784_vm1, %v1200_v41 }
 0x3b4   : > { %4288 = vmatprep.mubr.msk.f32.mxu1 %vm4748_vm0, %v4747_v5 }
 0x47e   : > { %v5184_v42 = vpop.f32.mrb[6].mxu0 }
 0x47f   : > { %v4265_v47 = vpop.f32.mrb[7].mxu0 }
 0x482   : > { %v5186_v48 = vpop.f32.mrb[6].mxu1  ;;  %v1195_v50 = vpop.f32.mrb[8].mxu0 }
 0x483   : > { %v1120_v51 = vpack.c.bf16 %v5186_v48, %v5184_v42  ;;  %v1277_v53 = vmul.f32 0.17677669, %v1195_v50  ;;  %v4270_v54 = vpop.f32.mrb[7].mxu1  ;;  %v4275_v55 = vpop.f32.mrb[9].mxu0 }
 0x485   : > { %v1279_v56 = vadd.f32 %v1277_v53, %v5153_v1 }
 0x486   : > { %v1273_v57 = vpop.f32.mrb[8].mxu1 }
 0x487   : > { %v1278_v58 = vmul.f32 0.17677669, %v1273_v57  ;;  %v4280_v59 = vpop.f32.mrb[9].mxu1  ;;  %v1281_v60 = vsel %vm951_vm2, %v1279_v56, -inf }
 0x488   : > { %1282 = vmax.xlane.f32.xlu0 %v1281_v60 }
 0x489   : > { %v1280_v61 = vadd.f32 %v1278_v58, %v5156_v7 }
 0x48b   : > { %v1284_v62 = vsel %vm951_vm2, %v1280_v61, -inf }
 0x48c   : > { %1285 = vmax.xlane.f32.xlu1 %v1284_v62 }
 0x49d   : > { %1381 = vrot.lane.b32.xlu1 %v5142_v52, %s4749_s4 }
 0x4a1   : > { %1650 = vrot.lane.b32.xlu1 %v5112_v43, %s4751_s11 }
 0x4a5   : > { %1648 = vrot.lane.b32.xlu1 %v5124_v46, %s4751_s11 }
 0x4a9   : > { %1570 = vrot.lane.b32.xlu1 %v5117_v45, %s4751_s11 }
 0x4ad   : > { %1965 = vrot.lane.b32.xlu1 %v5110_v40, %s4752_s14 }
 0x515   : > { %v1283_v63 = vpop.xlane.xlu0 %1282 }
 0x516   : > { %v1287_v0 = vsub.f32 %v1279_v56, %v1283_v63 }
 0x518   : > { %v1289_v2 = vmul.f32 1.442695, %v1287_v0 }
 0x519   : > { %v1286_v3 = vpop.xlane.xlu1 %1285 }
 0x51a   : > { %4541 = vpow2.f32 %v1289_v2  ;;  %v1288_v6 = vsub.f32 %v1280_v61, %v1286_v3 }
 0x51c   : > { %v1291_v8 = vmul.f32 1.442695, %v1288_v6 }
 0x51d   : > { %v1382_v9 = vpop.permute.xlu1 %1381 }
 0x51e   : > { %4543 = vpow2.f32 %v1291_v8  ;;  %4287 = vmatpush3.msra.mxu1 %v1382_v9 }
 0x51f   : > { %4299 = vmatprep.subr.bf16.mxu1 %v4747_v5 }
 0x521   : > { %v1651_v24 = vpop.permute.xlu1 %1650 }
 0x524   : > { %v4542_v10 = vpop.eup %4541 }
 0x525   : > { %v1293_v11 = vsel %vm951_vm2, %v4542_v10, 0.0  ;;  %v1649_v27 = vpop.permute.xlu1 %1648 }
 0x526   : > { %1294 = vadd.xlane.f32.xlu0 %v1293_v11 }
 0x528   : > { %v4544_v12 = vpop.eup %4543 }
 0x529   : > { %v1296_v13 = vsel %vm951_vm2, %v4544_v12, 0.0  ;;  %v1571_v41 = vpop.permute.xlu1 %1570 }
 0x52a   : > { %1297 = vadd.xlane.f32.xlu0 %v1296_v13 }
 0x540   : > { %1304 = vrot.lane.b32.xlu0 %v5140_v49, %s4749_s4 }
 0x544   : > { %1572 = vrot.lane.b32.xlu0 %v5110_v40, %s4751_s11 }
 0x5b3   : > { %v1295_v14 = vpop.xlane.xlu0 %1294 }
 0x5b4   : > { %4545 = vrcp.f32 %v1295_v14 }
 0x5b7   : > { %v1298_v15 = vpop.xlane.xlu0 %1297 }
 0x5b8   : > { %4547 = vrcp.f32 %v1298_v15 }
 0x5bb   : > { %v1305_v16 = vpop.permute.xlu0 %1304 }
 0x5bc   : > { %4282 = vmatpush3.msra.mxu0 %v1305_v16 }
 0x5bd   : > { %4291 = vmatprep.subr.bf16.mxu0 %v4747_v5 }
 0x5be   : > { %v4546_v17 = vpop.eup %4545 }
 0x5bf   : > { %v1300_v19 = vmul.f32 %v4546_v17, %v4542_v10  ;;  %v1573_v37 = vpop.permute.xlu0 %1572  ;;  %v1966_v10 = vpop.permute.xlu1 %1965 }
 0x5c1   : > { %4284 = vmatmul.mubr.msk.f32.vlgmr.msra.gmra.mrb[10].mxu0 %vm951_vm2, %v1300_v19 }
 0x5c2   : > { %v4548_v20 = vpop.eup %4547  ;;  %4292 = vmatpush3.bf16.msra.mxu0 %v4463_v18  ;;  %4295 = vmatprep.mubr.msk.bf16.mxu0 %vm4748_vm0, %v4747_v5 }
 0x5c3   : > { %v1302_v40 = vmul.f32 %v4548_v20, %v4544_v12  ;;  %4293 = vmatprep.subr.bf16.mxu0 %v4747_v5 }
 0x5c5   : > { %4289 = vmatmul.mubr.msk.f32.vlgmr.msra.gmra.mrb[10].mxu1 %vm951_vm2, %v1302_v40 }
 0x5c6   : > { %4300 = vmatpush3.bf16.msra.mxu1 %v4461_v21  ;;  %4303 = vmatprep.mubr.msk.bf16.mxu1 %vm4748_vm0, %v4747_v5 }
 0x5c7   : > { %4301 = vmatprep.subr.bf16.mxu1 %v4747_v5  ;;  %4294 = vmatpush3.bf16.msra.mxu0 %v4464_v22 }
 0x5c8   : > { %4307 = vmatprep.subr.mxu0 %v4747_v5 }
 0x5ca   : > { %4302 = vmatpush3.bf16.msra.mxu1 %v4462_v23 }
 0x5cb   : > { %4312 = vmatprep.subr.mxu1 %v4747_v5 }
 0x5cd   : > { %4304 = vmatmul.mubr.msk.bf16.vlgmr.msra.gmra.mrb[12].mxu1 %vm784_vm1, %v1120_v51 }
 0x5ce   : > { %4314 = vmatprep.mubr.msk.f32.mxu1 %vm4748_vm0, %v4747_v5 }
 0x5d3   : > { %4313 = vmatpush3.xpose.msk.msra.mxu1 %vm784_vm1, %v1651_v24 }
 0x5d4   : > { %4322 = vmatprep.subr.mxu1 %v4747_v5 }
 0x5d6   : > { %4315 = vmatmul.mubr.msk.f32.vlgmr.msra.gmra.mrb[16].mxu1 %vm784_vm1, %v1649_v27 }
 0x5d7   : > { %4324 = vmatprep.mubr.msk.f32.mxu1 %vm4748_vm0, %v4747_v5 }
 0x694   : > { %v1376_v28 = vpop.f32.mrb[10].mxu0 }
 0x695   : > { %v4285_v29 = vpop.f32.mrb[11].mxu0 }
 0x698   : > { %v1453_v30 = vpop.f32.mrb[10].mxu1 }
 0x699   : > { %v1457_v31 = vpack.c.bf16 %v1453_v30, %v1376_v28  ;;  %v4290_v36 = vpop.f32.mrb[11].mxu1 }
 0x69b   : > { %4296 = vmatmul.mubr.msk.bf16.vlgmr.msra.gmra.mrb[12].mxu0 %vm784_vm1, %v1457_v31 }
 0x69c   : > { %4308 = vmatpush3.xpose.msk.msra.mxu0 %vm784_vm1, %v1573_v37  ;;  %4309 = vmatprep.mubr.msk.f32.mxu0 %vm4748_vm0, %v4747_v5 }
 0x69d   : > { %4317 = vmatprep.subr.mxu0 %v4747_v5 }
 0x6a0   : > { %v1563_v38 = vpop.f32.mrb[12].mxu1 }
 0x6a1   : > { %v4305_v39 = vpop.f32.mrb[13].mxu1 }
 0x6a2   : > { %v1566_v42 = vpop.f32.mrb[14].mxu1 }
 0x6a3   : > { %v4306_v47 = vpop.f32.mrb[15].mxu1  ;;  %4310 = vmatmul.mubr.msk.f32.vlgmr.msra.gmra.mrb[16].mxu0 %vm784_vm1, %v1571_v41 }
 0x6a4   : > { %4319 = vmatprep.mubr.msk.f32.mxu0 %vm4748_vm0, %v4747_v5  ;;  %v4466_v47 = vld [vmem:[%s4997_s30 + $0x28] sm:$0xff]  }
 0x6a9   : > { %v1722_v48 = vpop.f32.mrb[16].mxu1 }
 0x6aa   : > { %v1727_v50 = vmul.f32 0.17677669, %v1722_v48  ;;  %v4316_v51 = vpop.f32.mrb[17].mxu1 }
 0x6ac   : > { %v1729_v53 = vadd.f32 %v1727_v50, %v5156_v7 }
 0x6ae   : > { %v1733_v54 = vsel %vm951_vm2, %v1729_v53, -inf }
 0x6af   : > { %1734 = vmax.xlane.f32.xlu0 %v1733_v54 }
 0x6c5   : > { %1828 = vrot.lane.b32.xlu0 %v5142_v52, %s4751_s11 }
 0x6c9   : > { %1963 = vrot.lane.b32.xlu0 %v5117_v45, %s4752_s14 }
 0x6cd   : > { %2041 = vrot.lane.b32.xlu0 %v5124_v46, %s4752_s14 }
 0x73c   : > { %v1735_v55 = vpop.xlane.xlu0 %1734 }
 0x73d   : > { %v1737_v56 = vsub.f32 %v1729_v53, %v1735_v55 }
 0x73f   : > { %v1740_v57 = vmul.f32 1.442695, %v1737_v56 }
 0x740   : > { %v1829_v58 = vpop.permute.xlu0 %1828 }
 0x741   : > { %4549 = vpow2.f32 %v1740_v57  ;;  %4323 = vmatpush3.msra.mxu1 %v1829_v58 }
 0x742   : > { %4335 = vmatprep.subr.mxu1 %v4747_v5 }
 0x744   : > { %v1964_v13 = vpop.permute.xlu0 %1963 }
 0x748   : > { %v2042_v15 = vpop.permute.xlu0 %2041 }
 0x74b   : > { %v4550_v59 = vpop.eup %4549 }
 0x74c   : > { %v1745_v60 = vsel %vm951_vm2, %v4550_v59, 0.0 }
 0x74d   : > { %1746 = vadd.xlane.f32.xlu1 %v1745_v60 }
 0x75e   : > { %2043 = vrot.lane.b32.xlu1 %v5112_v43, %s4752_s14 }
 0x76e   : > { %v1507_v61 = vpop.f32.mrb[12].mxu0 }
 0x76f   : > { %v5257_v45 = vadd.f32 %v1563_v38, %v1507_v61  ;;  %v4297_v62 = vpop.f32.mrb[13].mxu0 }
 0x770   : > { %v1510_v46 = vpop.f32.mrb[14].mxu0 }
 0x771   : > { %v5259_v63 = vadd.f32 %v1566_v42, %v1510_v46  ;;  %v4298_v0 = vpop.f32.mrb[15].mxu0  ;;  %v4465_v42 = vld [vmem:[%s4997_s30 + $0x20] sm:$0xff]  }
 0x776   : > { %v1644_v2 = vpop.f32.mrb[16].mxu0 }
 0x777   : > { %v4311_v3 = vpop.f32.mrb[17].mxu0  ;;  %v1726_v6 = vmul.f32 0.17677669, %v1644_v2 }
 0x779   : > { %v1728_v8 = vadd.f32 %v1726_v6, %v5153_v1 }
 0x77b   : > { %v1730_v9 = vsel %vm951_vm2, %v1728_v8, -inf }
 0x782   : > { %1731 = vmax.xlane.f32.xlu1 %v1730_v9  ;;  %v4468_v9 = vld [vmem:[%s4997_s30 + $0x38] sm:$0xff]  }
 0x7da   : > { %v1747_v11 = vpop.xlane.xlu1 %1746 }
 0x7db   : > { %4551 = vrcp.f32 %v1747_v11 }
 0x7de   : > { %v2044_v14 = vpop.permute.xlu1 %2043 }
 0x7e5   : > { %v4552_v43 = vpop.eup %4551 }
 0x7e6   : > { %v1751_v12 = vmul.f32 %v4552_v43, %v4550_v59 }
 0x7e8   : > { %4325 = vmatmul.mubr.msk.f32.vlgmr.msra.gmra.mrb[18].mxu1 %vm951_vm2, %v1751_v12 }
 0x7e9   : > { %4336 = vmatpush3.xpose.msk.msra.mxu1 %vm784_vm1, %v1966_v10  ;;  %4337 = vmatprep.mubr.msk.f32.mxu1 %vm4748_vm0, %v4747_v5 }
 0x7ea   : > { %4340 = vmatprep.subr.mxu1 %v4747_v5 }
 0x7ec   : > { %4338 = vmatmul.mubr.msk.f32.vlgmr.msra.gmra.mrb[20].mxu1 %vm784_vm1, %v1964_v13 }
 0x7ed   : > { %4341 = vmatpush3.xpose.msk.msra.mxu1 %vm784_vm1, %v2044_v14  ;;  %4342 = vmatprep.mubr.msk.f32.mxu1 %vm4748_vm0, %v4747_v5 }
 0x7ee   : > { %4345 = vmatprep.subr.mxu1 %v4747_v5 }
 0x7f0   : > { %4343 = vmatmul.mubr.msk.f32.vlgmr.msra.gmra.mrb[22].mxu1 %vm784_vm1, %v2042_v15 }
 0x7f1   : > { %4347 = vmatprep.mubr.msk.f32.mxu1 %vm4748_vm0, %v4747_v5 }
 0x80f   : > { %v1732_v16 = vpop.xlane.xlu1 %1731 }
 0x810   : > { %v1736_v17 = vsub.f32 %v1728_v8, %v1732_v16  ;;  %v4467_v8 = vld [vmem:[%s4997_s30 + $0x30] sm:$0xff]  }
 0x812   : > { %v1738_v18 = vmul.f32 1.442695, %v1736_v17 }
 0x814   : > { %4553 = vpow2.f32 %v1738_v18 }
 0x81e   : > { %v4554_v19 = vpop.eup %4553 }
 0x81f   : > { %v1742_v20 = vsel %vm951_vm2, %v4554_v19, 0.0 }
 0x820   : > { %1743 = vadd.xlane.f32.xlu0 %v1742_v20 }
 0x836   : > { %1752 = vrot.lane.b32.xlu0 %v5140_v49, %s4751_s11 }
 0x83a   : > { %2221 = vrot.lane.b32.xlu0 %v5142_v52, %s4752_s14 }
 0x8ad   : > { %v1744_v21 = vpop.xlane.xlu0 %1743 }
 0x8ae   : > { %4555 = vrcp.f32 %v1744_v21 }
 0x8b1   : > { %v1753_v40 = vpop.permute.xlu0 %1752 }
 0x8b2   : > { %4318 = vmatpush3.msra.mxu0 %v1753_v40 }
 0x8b3   : > { %4327 = vmatprep.subr.bf16.mxu0 %v4747_v5 }
 0x8b5   : > { %v2222_v61 = vpop.permute.xlu0 %2221 }
 0x8b8   : > { %v4556_v22 = vpop.eup %4555 }
 0x8b9   : > { %v1749_v23 = vmul.f32 %v4556_v22, %v4554_v19 }
 0x8bb   : > { %4320 = vmatmul.mubr.msk.f32.vlgmr.msra.gmra.mrb[18].mxu0 %vm951_vm2, %v1749_v23  ;;  %v1900_v24 = vpop.f32.mrb[18].mxu1 }
 0x8bc   : > { %v4326_v27 = vpop.f32.mrb[19].mxu1  ;;  %4331 = vmatprep.mubr.msk.bf16.mxu0 %vm4748_vm0, %v4747_v5  ;;  %4328 = vmatpush3.bf16.msra.mxu0 %v4465_v42 }
 0x8bd   : > { %4329 = vmatprep.subr.bf16.mxu0 %v4747_v5 }
 0x8bf   : > { %v2037_v28 = vpop.f32.mrb[20].mxu1 }
 0x8c0   : > { %v2119_v29 = vmul.f32 0.17677669, %v2037_v28  ;;  %v4339_v52 = vpop.f32.mrb[21].mxu1  ;;  %4330 = vmatpush3.bf16.msra.mxu0 %v4466_v47 }
 0x8c1   : > { %4350 = vmatprep.subr.mxu0 %v4747_v5  ;;  %v2399_v52 = vld [vmem:[%s5004_s22] sm:$0xff] }
 0x8c2   : > { %v2121_v30 = vadd.f32 %v2119_v29, %v5153_v1 }
 0x8c3   : > { %v2115_v31 = vpop.f32.mrb[22].mxu1 }
 0x8c4   : > { %v2120_v36 = vmul.f32 0.17677669, %v2115_v31  ;;  %v4344_v37 = vpop.f32.mrb[23].mxu1  ;;  %v2123_v38 = vsel %vm951_vm2, %v2121_v30, -inf  ;;  %v2400_v31 = vld [vmem:[%s5004_s22 + $0x8] sm:$0xff] }
 0x8c5   : > { %2124 = vmax.xlane.f32.xlu1 %v2123_v38  ;;  %v2404_v38 = vld [vmem:[%s5004_s22 + $0x28] sm:$0xff] }
 0x8c6   : > { %v2122_v39 = vadd.f32 %v2120_v36, %v5156_v7  ;;  %v3956_v42 = vcombine.low %v2400_v31, %v2404_v38  ;;  %v3957_v47 = vcombine.high %v2400_v31, %v2404_v38 }
 0x8c8   : > { %v2126_v41 = vsel %vm951_vm2, %v2122_v39, -inf }
 0x8c9   : > { %2127 = vmax.xlane.f32.xlu1 %v2126_v41  ;;  %v2411_v41 = vld [vmem:[%s5004_s22 + $0x60] sm:$0xff] }
 0x952   : > { %v2125_v1 = vpop.xlane.xlu1 %2124 }
 0x953   : > { %v2129_v48 = vsub.f32 %v2121_v30, %v2125_v1  ;;  %v2403_v30 = vld [vmem:[%s5004_s22 + $0x20] sm:$0xff] }
 0x954   : > { %v3954_v36 = vcombine.low %v2399_v52, %v2403_v30  ;;  %v3955_v37 = vcombine.high %v2399_v52, %v2403_v30  ;;  %v2451_v52 = vld [vmem:[%s5004_s22 + $0x1a0] sm:$0xff]  ;;  %v2448_v30 = vld [vmem:[%s5004_s22 + $0x188] sm:$0xff] }
 0x955   : > { %v2131_v50 = vmul.f32 1.442695, %v2129_v48  ;;  %v2408_v48 = vld [vmem:[%s5004_s22 + $0x48] sm:$0xff] }
 0x956   : > { %v2128_v51 = vpop.xlane.xlu1 %2127 }
 0x957   : > { %4557 = vpow2.f32 %v2131_v50  ;;  %v2130_v53 = vsub.f32 %v2122_v39, %v2128_v51  ;;  %v2407_v39 = vld [vmem:[%s5004_s22 + $0x40] sm:$0xff]  ;;  %v2412_v50 = vld [vmem:[%s5004_s22 + $0x68] sm:$0xff] }
 0x958   : > { %v3963_v1 = vcombine.high %v2407_v39, %v2411_v41  ;;  %v3962_v51 = vcombine.low %v2407_v39, %v2411_v41  ;;  %v2455_v41 = vld [vmem:[%s5004_s22 + $0x1c0] sm:$0xff] }
 0x959   : > { %v2133_v54 = vmul.f32 1.442695, %v2130_v53 }
 0x95b   : > { %4559 = vpow2.f32 %v2133_v54 }
 0x961   : > { %v4558_v7 = vpop.eup %4557 }
 0x962   : > { %v2135_v55 = vsel %vm951_vm2, %v4558_v7, 0.0 }
 0x963   : > { %2136 = vadd.xlane.f32.xlu1 %v2135_v55 }
 0x965   : > { %v4560_v56 = vpop.eup %4559 }
 0x966   : > { %v2138_v57 = vsel %vm951_vm2, %v4560_v56, 0.0 }
 0x967   : > { %2139 = vadd.xlane.f32.xlu1 %v2138_v57 }
 0x978   : > { %2145 = vrot.lane.b32.xlu1 %v5140_v49, %s4752_s14 }
 0x98e   : > { %v1824_v58 = vpop.f32.mrb[18].mxu0 }
 0x98f   : > { %v1904_v59 = vpack.c.bf16 %v1900_v24, %v1824_v58  ;;  %v4321_v60 = vpop.f32.mrb[19].mxu0 }
 0x990   : > { %v2415_v60 = vld [vmem:[%s5004_s22 + $0x80] sm:$0xff] }
 0x991   : > { %4332 = vmatmul.mubr.msk.bf16.vlgmr.msra.gmra.mrb[20].mxu0 %vm784_vm1, %v1904_v59 }
 0x992   : > { %4351 = vmatpush3.msra.mxu0 %v2222_v61  ;;  %4352 = vmatprep.mubr.msk.f32.mxu0 %vm4748_vm0, %v4747_v5  ;;  %v2419_v61 = vld [vmem:[%s5004_s22 + $0xa0] sm:$0xff] }
 0x993   : > { %2954 = vmatprep.subr.bf16.mxu0 %v3955_v37 }
 0x9f0   : > { %v2137_v62 = vpop.xlane.xlu1 %2136 }
 0x9f1   : > { %4561 = vrcp.f32 %v2137_v62  ;;  %v2416_v62 = vld [vmem:[%s5004_s22 + $0x88] sm:$0xff] }
 0x9f4   : > { %v2140_v46 = vpop.xlane.xlu1 %2139 }
 0x9f5   : > { %4563 = vrcp.f32 %v2140_v46  ;;  %v3971_v46 = vcombine.high %v2415_v60, %v2419_v61 }
 0x9f8   : > { %v2146_v0 = vpop.permute.xlu1 %2145 }
 0x9f9   : > { %4346 = vmatpush3.msra.mxu1 %v2146_v0  ;;  %v2420_v0 = vld [vmem:[%s5004_s22 + $0xa8] sm:$0xff] }
 0x9fa   : > { %4355 = vmatprep.subr.bf16.mxu1 %v4747_v5 }
 0x9fb   : > { %v4562_v49 = vpop.eup %4561 }
 0x9fc   : > { %v2142_v2 = vmul.f32 %v4562_v49, %v4558_v7  ;;  %v3970_v49 = vcombine.low %v2415_v60, %v2419_v61 }
 0x9fe   : > { %4348 = vmatmul.mubr.msk.f32.vlgmr.msra.gmra.mrb[24].mxu1 %vm951_vm2, %v2142_v2  ;;  %v3972_v2 = vcombine.low %v2416_v62, %v2420_v0 }
 0x9ff   : > { %v4564_v3 = vpop.eup %4563  ;;  %4359 = vmatprep.mubr.msk.bf16.mxu1 %vm4748_vm0, %v4747_v5  ;;  %4356 = vmatpush3.bf16.msra.mxu1 %v4467_v8  ;;  %v2427_v8 = vld [vmem:[%s5004_s22 + $0xe0] sm:$0xff] }
 0xa00   : > { %v2144_v6 = vmul.f32 %v4564_v3, %v4560_v56  ;;  %4357 = vmatprep.subr.bf16.mxu1 %v4747_v5  ;;  %v2358_v5 = vsub.s32 3, %v5096_v32  ;;  %v3973_v3 = vcombine.high %v2416_v62, %v2420_v0 }
 0xa02   : > { %4353 = vmatmul.mubr.msk.f32.vlgmr.msra.gmra.mrb[24].mxu0 %vm951_vm2, %v2144_v6  ;;  %v2423_v6 = vld [vmem:[%s5004_s22 + $0xc0] sm:$0xff] }
 0xa03   : > { %2986 = vmatprep.mubr.bf16.mxu0 %v4746_v4  ;;  %4358 = vmatpush3.bf16.msra.mxu1 %v4468_v9  ;;  %v2424_v9 = vld [vmem:[%s5004_s22 + $0xc8] sm:$0xff] }
 0xa04   : > { %2997 = vmatprep.subr.bf16.mxu1 %v3957_v47  ;;  %2955 = vmatpush1.bf16.msra.mxu0 %v3954_v36  ;;  %v2452_v36 = vld [vmem:[%s5004_s22 + $0x1a8] sm:$0xff] }
 0xa05   : > { %2956 = vmatprep.subr.bf16.mxu0 %v3963_v1  ;;  %v4004_v38 = vcombine.low %v2448_v30, %v2452_v36  ;;  %v4005_v39 = vcombine.high %v2448_v30, %v2452_v36  ;;  %v2456_v47 = vld [vmem:[%s5004_s22 + $0x1c8] sm:$0xff]  ;;  %v2430_v30 = vld [vmem:[%s5004_s22 + $0xf8] sm:$0xff] }
 0xa08   : > { %2957 = vmatpush1.bf16.msra.mxu0 %v3962_v51  ;;  %v2405_v51 = vld [vmem:[%s5004_s22 + $0x30] sm:$0xff] }
 0xa09   : > { %2958 = vmatprep.subr.bf16.mxu0 %v3971_v46 }
 0xa0c   : > { %2959 = vmatpush1.bf16.msra.mxu0 %v3970_v49 }
 0xa64   : > { %v1954_v10 = vpop.f32.mrb[20].mxu0 }
 0xa65   : > { %v1961_v11 = vadd.f32 %v1954_v10, %v5257_v45  ;;  %v4333_v43 = vpop.f32.mrb[21].mxu0  ;;  %v2359_v45 = vrot.slane %v5100_v34, %v2358_v5  ;;  %v3979_v10 = vcombine.high %v2423_v6, %v2427_v8 }
 0xa66   : > { %v1957_v12 = vpop.f32.mrb[22].mxu0  ;;  %v3978_v43 = vcombine.low %v2423_v6, %v2427_v8 }
 0xa67   : > { %v1962_v13 = vadd.f32 %v1957_v12, %v5259_v63  ;;  %v4334_v14 = vpop.f32.mrb[23].mxu0  ;;  %2960 = vmatprep.subr.bf16.mxu0 %v3979_v10  ;;  %v2395_v10 = vsub.s32 5, %v5096_v32 }
 0xa68   : > { %2961 = vmatpush1.bf16.msra.mxu0 %v3978_v43  ;;  %v2431_v14 = vld [vmem:[%s5004_s22 + $0x100] sm:$0xff] }
 0xad1   : > { %v2217_v15 = vpop.f32.mrb[24].mxu1 }
 0xad2   : > { %v4349_v16 = vpop.f32.mrb[25].mxu1 }
 0xad3   : > { %v2432_v16 = vld [vmem:[%s5004_s22 + $0x108] sm:$0xff] }
 0xad5   : > { %v2293_v17 = vpop.f32.mrb[24].mxu0 }
 0xad6   : > { %v2297_v18 = vpack.c.bf16 %v2293_v17, %v2217_v15  ;;  %v4354_v19 = vpop.f32.mrb[25].mxu0  ;;  %v2435_v15 = vld [vmem:[%s5004_s22 + $0x120] sm:$0xff] }
 0xad7   : > { %v3987_v17 = vcombine.high %v2431_v14, %v2435_v15  ;;  %v3986_v19 = vcombine.low %v2431_v14, %v2435_v15  ;;  %v2413_v15 = vld [vmem:[%s5004_s22 + $0x70] sm:$0xff] }
 0xad8   : > { %4360 = vmatmul.mubr.msk.bf16.vlgmr.msra.gmra.mrb[28].mxu1 %vm784_vm1, %v2297_v18  ;;  %v2436_v18 = vld [vmem:[%s5004_s22 + $0x128] sm:$0xff] }
 0xad9   : > { %3029 = vmatprep.mubr.bf16.mxu1 %v4746_v4  ;;  %2998 = vmatpush1.bf16.msra.mxu1 %v3956_v42  ;;  %v2459_v42 = vld [vmem:[%s5004_s22 + $0x1e0] sm:$0xff] }
 0xada   : > { %2962 = vmatprep.subr.bf16.mxu0 %v3987_v17  ;;  %v4010_v1 = vcombine.low %v2455_v41, %v2459_v42  ;;  %v2414_v17 = vld [vmem:[%s5004_s22 + $0x78] sm:$0xff] }
 0xadb   : > { %2963 = vmatpush1.bf16.msra.mxu0 %v3986_v19 }
 0xbab   : > { %v2347_v63 = vpop.f32.mrb[28].mxu1 }
 0xbac   : > { %v2354_v20 = vadd.f32 %v2347_v63, %v1961_v11  ;;  %v4361_v21 = vpop.f32.mrb[29].mxu1  ;;  %v2428_v11 = vld [vmem:[%s5004_s22 + $0xe8] sm:$0xff]  ;;  %v3989_v63 = vcombine.high %v2432_v16, %v2436_v18 }
 0xbad   : > { %v2350_v40 = vpop.f32.mrb[30].mxu1  ;;  %v3980_v12 = vcombine.low %v2424_v9, %v2428_v11  ;;  %v2443_v21 = vld [vmem:[%s5004_s22 + $0x160] sm:$0xff] }
 0xbae   : > { %v2360_v22 = vadd.f32 %v2359_v45, %v2354_v20  ;;  %v2355_v23 = vadd.f32 %v2350_v40, %v1962_v13  ;;  %v4362_v24 = vpop.f32.mrb[31].mxu1  ;;  %v3981_v13 = vcombine.high %v2424_v9, %v2428_v11  ;;  %v2439_v20 = vld [vmem:[%s5004_s22 + $0x140] sm:$0xff]  ;;  %v2440_v40 = vld [vmem:[%s5004_s22 + $0x148] sm:$0xff] }
 0xbaf   : > { %v3994_v24 = vcombine.low %v2439_v20, %v2443_v21 }
 0xbb0   : > { %v2361_v27 = vadd.f32 %v2359_v45, %v2355_v23  ;;  %v2362_v28 = vadd.f32 %v2360_v22, %v5074_v25  ;;  %v3965_v25 = vcombine.high %v2408_v48, %v2412_v50  ;;  %v3988_v45 = vcombine.low %v2432_v16, %v2436_v18  ;;  %v2444_v23 = vld [vmem:[%s5004_s22 + $0x168] sm:$0xff]  ;;  %v2410_v16 = vld [vmem:[%s5004_s22 + $0x58] sm:$0xff] }
 0xbb1   : > { %v3995_v22 = vcombine.high %v2439_v20, %v2443_v21  ;;  %v2417_v20 = vld [vmem:[%s5004_s22 + $0x90] sm:$0xff]  ;;  %v2418_v21 = vld [vmem:[%s5004_s22 + $0x98] sm:$0xff] }
 0xbb2   : > { %2364 = vadd.xlane.f32.xlu0 %v2362_v28  ;;  %v2363_v29 = vadd.f32 %v2361_v27, %v5079_v26  ;;  %v3964_v26 = vcombine.low %v2408_v48, %v2412_v50  ;;  %2999 = vmatprep.subr.bf16.mxu1 %v3965_v25  ;;  %v3996_v27 = vcombine.low %v2440_v40, %v2444_v23  ;;  %v2460_v50 = vld [vmem:[%s5004_s22 + $0x1e8] sm:$0xff]  ;;  %v2401_v25 = vld [vmem:[%s5004_s22 + $0x10] sm:$0xff] }
 0xbb3   : > { %2964 = vmatprep.subr.bf16.mxu0 %v3995_v22  ;;  %v4011_v48 = vcombine.high %v2455_v41, %v2459_v42  ;;  %v2437_v41 = vld [vmem:[%s5004_s22 + $0x130] sm:$0xff]  ;;  %v2434_v42 = vld [vmem:[%s5004_s22 + $0x118] sm:$0xff] }
 0xbb4   : > { %2366 = vadd.xlane.f32.xlu1 %v2363_v29  ;;  %3000 = vmatpush1.bf16.msra.mxu1 %v3964_v26  ;;  %v4012_v26 = vcombine.low %v2456_v47, %v2460_v50 }
 0xbb5   : > { %3001 = vmatprep.subr.bf16.mxu1 %v3973_v3  ;;  %2965 = vmatpush1.bf16.msra.mxu0 %v3994_v24  ;;  %v2389_v3 = vsub.s32 4, %v5096_v32 }
 0xbb7   : > { %v2390_v9 = vrot.slane %v5100_v34, %v2389_v3 }
 0xbb8   : > { %3002 = vmatpush1.bf16.msra.mxu1 %v3972_v2 }
 0xbb9   : > { %3003 = vmatprep.subr.bf16.mxu1 %v3981_v13  ;;  %v2396_v13 = vrot.slane %v5100_v34, %v2395_v10  ;;  %v2421_v34 = vld [vmem:[%s5004_s22 + $0xb0] sm:$0xff] }
 0xbba   : > { %v3975_v24 = vcombine.high %v2417_v20, %v2421_v34 }
 0xbbc   : > { %3004 = vmatpush1.bf16.msra.mxu1 %v3980_v12 }
 0xbbd   : > { %3005 = vmatprep.subr.bf16.mxu1 %v3989_v63  ;;  %v3969_v63 = vcombine.high %v2410_v16, %v2414_v17 }
 0xbc0   : > { %3006 = vmatpush1.bf16.msra.mxu1 %v3988_v45 }
 0xc3f   : > { %v2365_v53 = vpop.xlane.xlu0 %2364 }
 0xc40   : > { %v2369_v54 = vmul.f32 0.0078125, %v2365_v53  ;;  %v4013_v53 = vcombine.high %v2456_v47, %v2460_v50  ;;  %v2438_v47 = vld [vmem:[%s5004_s22 + $0x138] sm:$0xff] }
 0xc41   : > { %v2367_v7 = vpop.xlane.xlu1 %2366  ;;  %v3993_v50 = vcombine.high %v2434_v42, %v2438_v47 }
 0xc42   : > { %v5327_v55 = vsub.f32 %v2362_v28, %v2369_v54  ;;  %v2370_v56 = vmul.f32 0.0078125, %v2367_v7  ;;  %v3997_v28 = vcombine.high %v2440_v40, %v2444_v23  ;;  %v3958_v54 = vcombine.low %v2401_v25, %v2405_v51  ;;  %v2422_v40 = vld [vmem:[%s5004_s22 + $0xb8] sm:$0xff] }
 0xc43   : > { %v3959_v7 = vcombine.high %v2401_v25, %v2405_v51  ;;  %v3968_v23 = vcombine.low %v2410_v16, %v2414_v17  ;;  %v3976_v36 = vcombine.low %v2418_v21, %v2422_v40  ;;  %v2441_v25 = vld [vmem:[%s5004_s22 + $0x150] sm:$0xff] }
 0xc44   : > { %v5329_v57 = vsub.f32 %v2363_v29, %v2370_v56  ;;  %v2373_v58 = vmul.f32 %v5327_v55, %v5327_v55  ;;  %3007 = vmatprep.subr.bf16.mxu1 %v3997_v28  ;;  %v2447_v29 = vld [vmem:[%s5004_s22 + $0x180] sm:$0xff]  ;;  %v2402_v56 = vld [vmem:[%s5004_s22 + $0x18] sm:$0xff]  ;;  %v2425_v28 = vld [vmem:[%s5004_s22 + $0xd0] sm:$0xff] }
 0xc45   : > { %3008 = vmatpush1.bf16.msra.mxu1 %v3996_v27  ;;  %v4003_v31 = vcombine.high %v2447_v29, %v2451_v52  ;;  %v4002_v37 = vcombine.low %v2447_v29, %v2451_v52  ;;  %v3977_v27 = vcombine.high %v2418_v21, %v2422_v40  ;;  %v2429_v29 = vld [vmem:[%s5004_s22 + $0xf0] sm:$0xff]  ;;  %v2426_v52 = vld [vmem:[%s5004_s22 + $0xd8] sm:$0xff] }
 0xc46   : > { %2375 = vadd.xlane.f32.xlu0 %v2373_v58  ;;  %v2374_v59 = vmul.f32 %v5329_v57, %v5329_v57  ;;  %3009 = vmatprep.subr.bf16.mxu1 %v4005_v39  ;;  %v2406_v58 = vld [vmem:[%s5004_s22 + $0x38] sm:$0xff]  ;;  %v2433_v39 = vld [vmem:[%s5004_s22 + $0x110] sm:$0xff] }
 0xc47   : > { %2966 = vmatprep.subr.bf16.mxu0 %v4003_v31  ;;  %v3961_v60 = vcombine.high %v2402_v56, %v2406_v58  ;;  %v3974_v31 = vcombine.low %v2417_v20, %v2421_v34  ;;  %v2445_v51 = vld [vmem:[%s5004_s22 + $0x170] sm:$0xff]  ;;  %v4473_v20 = vld [vmem:[%s5012_s25 + $0x48] sm:$0xff]  }
 0xc48   : > { %2967 = vmatpush1.bf16.msra.mxu0 %v4002_v37  ;;  %v3983_v37 = vcombine.high %v2425_v28, %v2429_v29  ;;  %v4469_v16 = vld [vmem:[%s5012_s25 + $0x40] sm:$0xff]   ;;  %v4474_v34 = vld [vmem:[%s5012_s25 + $0xc8] sm:$0xff]  }
 0xc49   : > { %3010 = vmatpush1.bf16.msra.mxu1 %v4004_v38  ;;  %2968 = vmatprep.subr.bf16.mxu0 %v4011_v48  ;;  %v3985_v38 = vcombine.high %v2426_v52, %v2430_v30  ;;  %v3991_v48 = vcombine.high %v2433_v39, %v2437_v41  ;;  %v4470_v17 = vld [vmem:[%s5012_s25 + $0xc0] sm:$0xff]   ;;  %v4475_v21 = vld [vmem:[%s5012_s25 + $0x8] sm:$0xff]  }
 0xc4a   : > { %2377 = vadd.xlane.f32.xlu0 %v2374_v59  ;;  %v3960_v59 = vcombine.low %v2402_v56, %v2406_v58  ;;  %3011 = vmatprep.subr.bf16.mxu1 %v4013_v53  ;;  %v2446_v53 = vld [vmem:[%s5004_s22 + $0x178] sm:$0xff]  ;;  %v3999_v56 = vcombine.high %v2441_v25, %v2445_v51 }
 0xc4b   : > { %v4476_v40 = vld [vmem:[%s5012_s25 + $0x88] sm:$0xff]  }
 0xc4c   : > { %2969 = vmatpush1.bf16.msra.mxu0 %v4010_v1  ;;  %v3982_v1 = vcombine.low %v2425_v28, %v2429_v29  ;;  %v4482_v28 = vld [vmem:[%s5012_s25 + $0xd8] sm:$0xff]  }
 0xc4d   : > { %3012 = vmatpush1.bf16.msra.mxu1 %v4012_v26  ;;  %3040 = vmatprep.subr.bf16.mxu0 %v3959_v7  ;;  %v2442_v26 = vld [vmem:[%s5004_s22 + $0x158] sm:$0xff]  ;;  %v3992_v7 = vcombine.low %v2434_v42, %v2438_v47  ;;  %v4483_v29 = vld [vmem:[%s5012_s25 + $0x18] sm:$0xff]   ;;  %v4493_v47 = vld [vmem:[%s5012_s25 + $0x70] sm:$0xff]  }
 0xc4e   : > { %3083 = vmatprep.subr.bf16.mxu1 %v3961_v60  ;;  %v4001_v58 = vcombine.high %v2442_v26, %v2446_v53  ;;  %v2453_v60 = vld [vmem:[%s5004_s22 + $0x1b0] sm:$0xff]  ;;  %v4492_v42 = vld [vmem:[%s5012_s25 + $0xa8] sm:$0xff]  }
 0xcd3   : > { %v2376_v61 = vpop.xlane.xlu0 %2375 }
 0xcd4   : > { %v2379_v62 = vmul.f32 0.0078125, %v2376_v61  ;;  %v2450_v61 = vld [vmem:[%s5004_s22 + $0x198] sm:$0xff] }
 0xcd6   : > { %v2381_v46 = vadd.f32 1e-05, %v2379_v62  ;;  %v2454_v62 = vld [vmem:[%s5004_s22 + $0x1b8] sm:$0xff] }
 0xcd7   : > { %v2378_v0 = vpop.xlane.xlu0 %2377 }
 0xcd8   : > { %4565 = vrsqrt.f32 %v2381_v46  ;;  %v2380_v49 = vmul.f32 0.0078125, %v2378_v0  ;;  %v3998_v46 = vcombine.low %v2441_v25, %v2445_v51  ;;  %v4000_v0 = vcombine.low %v2442_v26, %v2446_v53  ;;  %v4498_v25 = vld [vmem:[%s5012_s25 + $0xf8] sm:$0xff]   ;;  %v4501_v53 = vld [vmem:[%s5012_s25 + $0x140] sm:$0xff]  }
 0xcd9   : > { %v4499_v51 = vld [vmem:[%s5012_s25 + $0x38] sm:$0xff]  }
 0xcda   : > { %v2382_v2 = vadd.f32 1e-05, %v2380_v49  ;;  %v4500_v26 = vld [vmem:[%s5012_s25 + $0xb8] sm:$0xff]  }
 0xcdc   : > { %4567 = vrsqrt.f32 %v2382_v2  ;;  %v4009_v2 = vcombine.high %v2450_v61, %v2454_v62 }
 0xce2   : > { %v4566_v6 = vpop.eup %4565 }
 0xce3   : > { %v2385_v8 = vmul.f32 %v4566_v6, %v5327_v55  ;;  %v2409_v55 = vld [vmem:[%s5004_s22 + $0x50] sm:$0xff] }
 0xce4   : > { %v3966_v22 = vcombine.low %v2409_v55, %v2413_v15  ;;  %v2457_v6 = vld [vmem:[%s5004_s22 + $0x1d0] sm:$0xff] }
 0xce5   : > { %v2391_v12 = vmul.f32 %v2390_v9, %v2385_v8  ;;  %v2461_v8 = vld [vmem:[%s5004_s22 + $0x1f0] sm:$0xff] }
 0xce6   : > { %v4568_v11 = vpop.eup %4567 }
 0xce7   : > { %v2386_v43 = vmul.f32 %v4568_v11, %v5329_v57  ;;  %v5377_v18 = vadd.f32 %v2396_v13, %v2391_v12  ;;  %v3967_v57 = vcombine.high %v2409_v55, %v2413_v15  ;;  %v2462_v11 = vld [vmem:[%s5004_s22 + $0x1f8] sm:$0xff]  ;;  %v4008_v12 = vcombine.low %v2450_v61, %v2454_v62 }
 0xce8   : > { %v4014_v55 = vcombine.low %v2457_v6, %v2461_v8 }
 0xce9   : > { %v2392_v14 = vmul.f32 %v2390_v9, %v2386_v43  ;;  %v2458_v9 = vld [vmem:[%s5004_s22 + $0x1d8] sm:$0xff] }
 0xcea   : > { %v4016_v15 = vcombine.low %v2458_v9, %v2462_v11 }
 0xceb   : > { %v5379_v19 = vadd.f32 %v2396_v13, %v2392_v14  ;;  %v4015_v13 = vcombine.high %v2457_v6, %v2461_v8  ;;  %v4017_v14 = vcombine.high %v2458_v9, %v2462_v11 }
 0xced   : > { %v5383_v45 = vpack.c.bf16 %v5379_v19, %v5377_v18 }
 0xcef   : > { %2987 = vmatmul.mubr.bf16.vlgmr.msra.gmra.mrb[28].mxu0 %v5383_v45  ;;  %3030 = vmatmul.mubr.bf16.vlgmr.msra.gmra.mrb[32].mxu1 %v5383_v45 }
 0xcf0   : > { %3041 = vmatpush1.bf16.msra.mxu0 %v3958_v54  ;;  %3084 = vmatpush1.bf16.msra.mxu1 %v3960_v59  ;;  %v3990_v54 = vcombine.low %v2433_v39, %v2437_v41  ;;  %v2449_v59 = vld [vmem:[%s5004_s22 + $0x190] sm:$0xff]  ;;  %v4490_v39 = vld [vmem:[%s5012_s25 + $0xe8] sm:$0xff]  }
 0xcf1   : > { %3042 = vmatprep.subr.bf16.mxu0 %v3967_v57  ;;  %3085 = vmatprep.subr.bf16.mxu1 %v3969_v63  ;;  %v4007_v49 = vcombine.high %v2449_v59, %v2453_v60  ;;  %v4006_v43 = vcombine.low %v2449_v59, %v2453_v60  ;;  %v4471_v57 = vld [vmem:[%s5012_s25] sm:$0xff]   ;;  %v4491_v41 = vld [vmem:[%s5012_s25 + $0x28] sm:$0xff]  }
 0xcf2   : > { %3072 = vmatprep.mubr.bf16.mxu0 %v4746_v4  ;;  %3115 = vmatprep.mubr.bf16.mxu1 %v4746_v4  ;;  %v3984_v4 = vcombine.low %v2426_v52, %v2430_v30  ;;  %v4472_v63 = vld [vmem:[%s5012_s25 + $0x80] sm:$0xff]   ;;  %v4484_v52 = vld [vmem:[%s5012_s25 + $0x98] sm:$0xff]  }
 0xcf3   : > { %v4485_v30 = vld [vmem:[%s5012_s25 + $0x60] sm:$0xff]  }
 0xcf4   : > { %3043 = vmatpush1.bf16.msra.mxu0 %v3966_v22  ;;  %3086 = vmatpush1.bf16.msra.mxu1 %v3968_v23  ;;  %v4477_v22 = vld [vmem:[%s5012_s25 + $0x50] sm:$0xff]  }
 0xcf5   : > { %3044 = vmatprep.subr.bf16.mxu0 %v3975_v24  ;;  %3087 = vmatprep.subr.bf16.mxu1 %v3977_v27  ;;  %v4478_v23 = vld [vmem:[%s5012_s25 + $0xd0] sm:$0xff]  }
 0xcf6   : > { %v4479_v24 = vld [vmem:[%s5012_s25 + $0x10] sm:$0xff]  }
 0xcf7   : > { %v4480_v27 = vld [vmem:[%s5012_s25 + $0x90] sm:$0xff]  }
 0xcf8   : > { %3045 = vmatpush1.bf16.msra.mxu0 %v3974_v31  ;;  %3088 = vmatpush1.bf16.msra.mxu1 %v3976_v36  ;;  %v4486_v31 = vld [vmem:[%s5012_s25 + $0xe0] sm:$0xff]  }
 0xcf9   : > { %3046 = vmatprep.subr.bf16.mxu0 %v3983_v37  ;;  %3089 = vmatprep.subr.bf16.mxu1 %v3985_v38  ;;  %v4487_v36 = vld [vmem:[%s5012_s25 + $0x20] sm:$0xff]   ;;  %v4489_v38 = vld [vmem:[%s5012_s25 + $0x68] sm:$0xff]  }
 0xcfa   : > { %v4488_v37 = vld [vmem:[%s5012_s25 + $0xa0] sm:$0xff]  }
 0xcfc   : > { %3047 = vmatpush1.bf16.msra.mxu0 %v3982_v1  ;;  %3090 = vmatpush1.bf16.msra.mxu1 %v3984_v4  ;;  %v4494_v1 = vld [vmem:[%s5012_s25 + $0xf0] sm:$0xff]  }
 0xcfd   : > { %3048 = vmatprep.subr.bf16.mxu0 %v3991_v48  ;;  %3091 = vmatprep.subr.bf16.mxu1 %v3993_v50  ;;  %v4495_v4 = vld [vmem:[%s5012_s25 + $0x30] sm:$0xff]   ;;  %v4497_v50 = vld [vmem:[%s5012_s25 + $0x78] sm:$0xff]  }
 0xcfe   : > { %v4496_v48 = vld [vmem:[%s5012_s25 + $0xb0] sm:$0xff]  }
 0xd00   : > { %3049 = vmatpush1.bf16.msra.mxu0 %v3990_v54  ;;  %3092 = vmatpush1.bf16.msra.mxu1 %v3992_v7  ;;  %v4502_v54 = vld [vmem:[%s5012_s25 + $0x1c0] sm:$0xff]   ;;  %v5450_v7 = vld [vmem:[%s5010_s12] sm:$0xff] }
 0xd01   : > { %3050 = vmatprep.subr.bf16.mxu0 %v3999_v56  ;;  %3093 = vmatprep.subr.bf16.mxu1 %v4001_v58  ;;  %v2597_v56 = vrot.slane %v5450_v7, %v5103_v35  ;;  %v2605_v58 = vrot.slane %v5450_v7, %v764_v44  ;;  %v2601_v59 = vrot.slane %v5450_v7, %v758_v33 }
 0xd02   : > { %v2609_v60 = vrot.slane %v5450_v7, %v2358_v5 }
 0xd04   : > { %3051 = vmatpush1.bf16.msra.mxu0 %v3998_v46  ;;  %3094 = vmatpush1.bf16.msra.mxu1 %v4000_v0 }
 0xd05   : > { %3052 = vmatprep.subr.bf16.mxu0 %v4007_v49  ;;  %3095 = vmatprep.subr.bf16.mxu1 %v4009_v2 }
 0xd08   : > { %3053 = vmatpush1.bf16.msra.mxu0 %v4006_v43  ;;  %3096 = vmatpush1.bf16.msra.mxu1 %v4008_v12 }
 0xd09   : > { %3054 = vmatprep.subr.bf16.mxu0 %v4015_v13  ;;  %3097 = vmatprep.subr.bf16.mxu1 %v4017_v14 }
 0xd0c   : > { %3055 = vmatpush1.bf16.msra.mxu0 %v4014_v55  ;;  %3098 = vmatpush1.bf16.msra.mxu1 %v4016_v15 }
 0xd0d   : > { %4143 = vmatprep.subr.bf16.mxu0 %v4469_v16  ;;  %4165 = vmatprep.subr.bf16.mxu1 %v4470_v17 }
 0xd0f   : > { %3073 = vmatmul.mubr.bf16.vlgmr.msra.gmra.mrb[32].mxu0 %v5383_v45  ;;  %3116 = vmatmul.mubr.bf16.vlgmr.msra.gmra.mrb[36].mxu1 %v5383_v45  ;;  %v4481_v45 = vld [vmem:[%s5012_s25 + $0x58] sm:$0xff]  }
 0xd10   : > { %4144 = vmatpush3.bf16.msra.mxu0 %v4471_v57  ;;  %4166 = vmatpush3.bf16.msra.mxu1 %v4472_v63 }
 0xd11   : > { %4145 = vmatprep.subr.bf16.mxu0 %v4473_v20  ;;  %4167 = vmatprep.subr.bf16.mxu1 %v4474_v34 }
 0xd14   : > { %4146 = vmatpush3.bf16.msra.mxu0 %v4475_v21  ;;  %4168 = vmatpush3.bf16.msra.mxu1 %v4476_v40 }
 0xd15   : > { %4147 = vmatprep.subr.bf16.mxu0 %v4477_v22  ;;  %4169 = vmatprep.subr.bf16.mxu1 %v4478_v23  ;;  %v4503_v22 = vld [vmem:[%s5012_s25 + $0x100] sm:$0xff]  }
 0xd16   : > { %v4504_v23 = vld [vmem:[%s5012_s25 + $0x180] sm:$0xff]  }
 0xd18   : > { %4148 = vmatpush3.bf16.msra.mxu0 %v4479_v24  ;;  %4170 = vmatpush3.bf16.msra.mxu1 %v4480_v27  ;;  %v4505_v24 = vld [vmem:[%s5012_s25 + $0x148] sm:$0xff]  }
 0xd19   : > { %4149 = vmatprep.subr.bf16.mxu0 %v4481_v45  ;;  %4171 = vmatprep.subr.bf16.mxu1 %v4482_v28  ;;  %v4506_v27 = vld [vmem:[%s5012_s25 + $0x1c8] sm:$0xff]  }
 0xd1a   : > { %v4507_v45 = vld [vmem:[%s5012_s25 + $0x108] sm:$0xff]  }
 0xd1b   : > { %v4508_v28 = vld [vmem:[%s5012_s25 + $0x188] sm:$0xff]  }
 0xd1c   : > { %4150 = vmatpush3.bf16.msra.mxu0 %v4483_v29  ;;  %4172 = vmatpush3.bf16.msra.mxu1 %v4484_v52  ;;  %v4509_v29 = vld [vmem:[%s5012_s25 + $0x150] sm:$0xff]  }
 0xd1d   : > { %4151 = vmatprep.subr.bf16.mxu0 %v4485_v30  ;;  %4173 = vmatprep.subr.bf16.mxu1 %v4486_v31  ;;  %v4510_v52 = vld [vmem:[%s5012_s25 + $0x1d0] sm:$0xff]  }
 0xd1e   : > { %v4511_v30 = vld [vmem:[%s5012_s25 + $0x110] sm:$0xff]  }
 0xd1f   : > { %v4512_v31 = vld [vmem:[%s5012_s25 + $0x190] sm:$0xff]  }
 0xd20   : > { %4152 = vmatpush3.bf16.msra.mxu0 %v4487_v36  ;;  %4174 = vmatpush3.bf16.msra.mxu1 %v4488_v37  ;;  %v4513_v36 = vld [vmem:[%s5012_s25 + $0x158] sm:$0xff]  }
 0xd21   : > { %4153 = vmatprep.subr.bf16.mxu0 %v4489_v38  ;;  %4175 = vmatprep.subr.bf16.mxu1 %v4490_v39  ;;  %v4514_v37 = vld [vmem:[%s5012_s25 + $0x1d8] sm:$0xff]  }
 0xd22   : > { %v4515_v38 = vld [vmem:[%s5012_s25 + $0x118] sm:$0xff]  }
 0xd23   : > { %v4516_v39 = vld [vmem:[%s5012_s25 + $0x198] sm:$0xff]  }
 0xd24   : > { %4154 = vmatpush3.bf16.msra.mxu0 %v4491_v41  ;;  %4176 = vmatpush3.bf16.msra.mxu1 %v4492_v42  ;;  %v4517_v41 = vld [vmem:[%s5012_s25 + $0x160] sm:$0xff]  }
 0xd25   : > { %4155 = vmatprep.subr.bf16.mxu0 %v4493_v47  ;;  %4177 = vmatprep.subr.bf16.mxu1 %v4494_v1  ;;  %v4518_v42 = vld [vmem:[%s5012_s25 + $0x1e0] sm:$0xff]  }
 0xd26   : > { %v4519_v47 = vld [vmem:[%s5012_s25 + $0x120] sm:$0xff]  }
 0xd27   : > { %v4520_v1 = vld [vmem:[%s5012_s25 + $0x1a0] sm:$0xff]  }
 0xd28   : > { %4156 = vmatpush3.bf16.msra.mxu0 %v4495_v4  ;;  %4178 = vmatpush3.bf16.msra.mxu1 %v4496_v48  ;;  %v4521_v4 = vld [vmem:[%s5012_s25 + $0x168] sm:$0xff]  }
 0xd29   : > { %4157 = vmatprep.subr.bf16.mxu0 %v4497_v50  ;;  %4179 = vmatprep.subr.bf16.mxu1 %v4498_v25  ;;  %v4522_v48 = vld [vmem:[%s5012_s25 + $0x1e8] sm:$0xff]   ;;  %v2620_v50 = vsub.s32 6, %v5096_v32  ;;  %v2624_v25 = vsub.s32 7, %v5096_v32 }
 0xd2c   : > { %4158 = vmatpush3.bf16.msra.mxu0 %v4499_v51  ;;  %4180 = vmatpush3.bf16.msra.mxu1 %v4500_v26  ;;  %v4523_v51 = vld [vmem:[%s5012_s25 + $0x128] sm:$0xff]  }
 0xd2d   : > { %4187 = vmatprep.subr.bf16.mxu0 %v4501_v53  ;;  %4209 = vmatprep.subr.bf16.mxu1 %v4502_v54  ;;  %v4524_v26 = vld [vmem:[%s5012_s25 + $0x1a8] sm:$0xff]   ;;  %v2613_v53 = vrot.slane %v5450_v7, %v2389_v3  ;;  %v2621_v54 = vrot.slane %v5450_v7, %v2620_v50  ;;  %v4527_v3 = vld [vmem:[%s5012_s25 + $0x130] sm:$0xff]  }
 0xdc2   : > { %v2988_v61 = vpop.f32.mrb[28].mxu0  ;;  %v3031_v62 = vpop.f32.mrb[32].mxu1 }
 0xdc3   : > { %v2989_v46 = vadd.f32 %v2988_v61, %v2597_v56  ;;  %v3032_v0 = vadd.f32 %v3031_v62, %v2605_v58  ;;  %v2990_v49 = vpop.f32.mrb[29].mxu0  ;;  %v3033_v2 = vpop.f32.mrb[33].mxu1 }
 0xdc4   : > { %v2991_v6 = vadd.f32 %v2990_v49, %v2601_v59  ;;  %v3034_v35 = vadd.f32 %v3033_v2, %v2609_v60  ;;  %v2992_v8 = vpop.f32.mrb[30].mxu0  ;;  %v3035_v9 = vpop.f32.mrb[34].mxu1 }
 0xdc5   : > { %v2993_v11 = vadd.f32 %v2992_v8, %v2597_v56  ;;  %v3036_v44 = vadd.f32 %v3035_v9, %v2605_v58  ;;  %v2994_v43 = vpop.f32.mrb[31].mxu0  ;;  %v3037_v12 = vpop.f32.mrb[35].mxu1  ;;  %v3126_v5 = vmax.f32 %v2989_v46, 0.0  ;;  %v3128_v14 = vmax.f32 %v3032_v0, 0.0  ;;  %v4525_v56 = vld [vmem:[%s5012_s25 + $0x170] sm:$0xff]  }
 0xdc6   : > { %v2995_v33 = vadd.f32 %v2994_v43, %v2601_v59  ;;  %v3038_v13 = vadd.f32 %v3037_v12, %v2609_v60  ;;  %v3127_v16 = vmax.f32 %v2991_v6, 0.0  ;;  %v3129_v17 = vmax.f32 %v3034_v35, 0.0  ;;  %v4526_v58 = vld [vmem:[%s5012_s25 + $0x1f0] sm:$0xff]   ;;  %v4529_v35 = vld [vmem:[%s5012_s25 + $0x178] sm:$0xff]  }
 0xdc7   : > { %v3134_v55 = vmax.f32 %v2993_v11, 0.0  ;;  %v3136_v15 = vmax.f32 %v3036_v44, 0.0  ;;  %v2617_v59 = vrot.slane %v5450_v7, %v2395_v10  ;;  %v2625_v60 = vrot.slane %v5450_v7, %v2624_v25  ;;  %v4528_v46 = vld [vmem:[%s5012_s25 + $0x1b0] sm:$0xff]   ;;  %v4530_v10 = vld [vmem:[%s5012_s25 + $0x1f8] sm:$0xff]  }
 0xdc8   : > { %v3135_v57 = vmax.f32 %v2995_v33, 0.0  ;;  %v3137_v63 = vmax.f32 %v3038_v13, 0.0 }
 0xdc9   : > { %v3142_v20 = vpack.c.bf16 %v3134_v55, %v3126_v5  ;;  %v3144_v34 = vpack.c.bf16 %v3136_v15, %v3128_v14  ;;  %v4531_v14 = vld [vmem:[%s5012_s25 + $0x138] sm:$0xff]  }
 0xdca   : > { %v3143_v21 = vpack.c.bf16 %v3135_v57, %v3127_v16  ;;  %v3145_v40 = vpack.c.bf16 %v3137_v63, %v3129_v17  ;;  %v4532_v55 = vld [vmem:[%s5012_s25 + $0x1b8] sm:$0xff]  }
 0xdcc   : > { %3570 = vmatprep.mubr.bf16.mxu0 %v3143_v21  ;;  %3611 = vmatprep.mubr.bf16.mxu1 %v3145_v40 }
 0xdcd   : > { %3571 = vmatmul.mubr.bf16.vlgmr.msra.gmra.mrb[36].mxu0 %v3142_v20  ;;  %3612 = vmatmul.mubr.bf16.vlgmr.msra.gmra.mrb[40].mxu1 %v3144_v34 }
 0xdce   : > { %4188 = vmatpush3.bf16.msra.mxu0 %v4503_v22  ;;  %4210 = vmatpush3.bf16.msra.mxu1 %v4504_v23 }
 0xdcf   : > { %4189 = vmatprep.subr.bf16.mxu0 %v4505_v24  ;;  %4211 = vmatprep.subr.bf16.mxu1 %v4506_v27 }
 0xdd2   : > { %4190 = vmatpush3.bf16.msra.mxu0 %v4507_v45  ;;  %4212 = vmatpush3.bf16.msra.mxu1 %v4508_v28  ;;  %v4573_v28 = vld [vmem:[%s5023_s21] sm:$0xff] }
 0xdd3   : > { %4191 = vmatprep.subr.bf16.mxu0 %v4509_v29  ;;  %4213 = vmatprep.subr.bf16.mxu1 %v4510_v52  ;;  %v3153_v29 = vrot.slane %v4573_v28, %v2620_v50 }
 0xdd6   : > { %4192 = vmatpush3.bf16.msra.mxu0 %v4511_v30  ;;  %4214 = vmatpush3.bf16.msra.mxu1 %v4512_v31 }
 0xdd7   : > { %4193 = vmatprep.subr.bf16.mxu0 %v4513_v36  ;;  %4215 = vmatprep.subr.bf16.mxu1 %v4514_v37 }
 0xdda   : > { %4194 = vmatpush3.bf16.msra.mxu0 %v4515_v38  ;;  %4216 = vmatpush3.bf16.msra.mxu1 %v4516_v39 }
 0xddb   : > { %4195 = vmatprep.subr.bf16.mxu0 %v4517_v41  ;;  %4217 = vmatprep.subr.bf16.mxu1 %v4518_v42 }
 0xdde   : > { %4196 = vmatpush3.bf16.msra.mxu0 %v4519_v47  ;;  %4218 = vmatpush3.bf16.msra.mxu1 %v4520_v1 }
 0xddf   : > { %4197 = vmatprep.subr.bf16.mxu0 %v4521_v4  ;;  %4219 = vmatprep.subr.bf16.mxu1 %v4522_v48 }
 0xde2   : > { %v3074_v61 = vpop.f32.mrb[32].mxu0  ;;  %v3117_v62 = vpop.f32.mrb[36].mxu1  ;;  %4198 = vmatpush3.bf16.msra.mxu0 %v4523_v51  ;;  %4220 = vmatpush3.bf16.msra.mxu1 %v4524_v26 }
 0xde3   : > { %v3075_v0 = vadd.f32 %v3074_v61, %v2613_v53  ;;  %v3118_v49 = vadd.f32 %v3117_v62, %v2621_v54  ;;  %v3076_v2 = vpop.f32.mrb[33].mxu0  ;;  %v3119_v6 = vpop.f32.mrb[37].mxu1  ;;  %4199 = vmatprep.subr.bf16.mxu0 %v4525_v56  ;;  %4221 = vmatprep.subr.bf16.mxu1 %v4526_v58 }
 0xde4   : > { %v3077_v8 = vadd.f32 %v3076_v2, %v2617_v59  ;;  %v3120_v9 = vadd.f32 %v3119_v6, %v2625_v60  ;;  %v3078_v11 = vpop.f32.mrb[34].mxu0  ;;  %v3121_v7 = vpop.f32.mrb[38].mxu1 }
 0xde5   : > { %v3079_v44 = vadd.f32 %v3078_v11, %v2613_v53  ;;  %v3122_v43 = vadd.f32 %v3121_v7, %v2621_v54  ;;  %v3080_v12 = vpop.f32.mrb[35].mxu0  ;;  %v3123_v33 = vpop.f32.mrb[39].mxu1  ;;  %v3130_v15 = vmax.f32 %v3075_v0, 0.0  ;;  %v3132_v16 = vmax.f32 %v3118_v49, 0.0 }
 0xde6   : > { %v3081_v13 = vadd.f32 %v3080_v12, %v2617_v59  ;;  %v3124_v5 = vadd.f32 %v3123_v33, %v2625_v60  ;;  %4200 = vmatpush3.bf16.msra.mxu0 %v4527_v3  ;;  %4222 = vmatpush3.bf16.msra.mxu1 %v4528_v46  ;;  %v3131_v63 = vmax.f32 %v3077_v8, 0.0  ;;  %v3133_v20 = vmax.f32 %v3120_v9, 0.0 }
 0xde7   : > { %v3138_v17 = vmax.f32 %v3079_v44, 0.0  ;;  %v3140_v57 = vmax.f32 %v3122_v43, 0.0  ;;  %4201 = vmatprep.subr.bf16.mxu0 %v4529_v35  ;;  %4223 = vmatprep.subr.bf16.mxu1 %v4530_v10 }
 0xde8   : > { %v3139_v34 = vmax.f32 %v3081_v13, 0.0  ;;  %v3141_v21 = vmax.f32 %v3124_v5, 0.0 }
 0xde9   : > { %v3146_v40 = vpack.c.bf16 %v3138_v17, %v3130_v15  ;;  %v3148_v22 = vpack.c.bf16 %v3140_v57, %v3132_v16  ;;  %v4082_v57 = vld [vmem:[%s5023_s21 + $0x8] ss:$0 sm:$0xff] }
 0xdea   : > { %v3147_v23 = vpack.c.bf16 %v3139_v34, %v3131_v63  ;;  %v3149_v24 = vpack.c.bf16 %v3141_v21, %v3133_v20  ;;  %4202 = vmatpush3.bf16.msra.mxu0 %v4531_v14  ;;  %4224 = vmatpush3.bf16.msra.mxu1 %v4532_v55 }
 0xdec   : > { %3652 = vmatprep.mubr.bf16.mxu0 %v3147_v23  ;;  %3693 = vmatprep.mubr.bf16.mxu1 %v3149_v24 }
 0xded   : > { %3653 = vmatmul.mubr.bf16.vlgmr.msra.gmra.mrb[40].mxu0 %v3146_v40  ;;  %3694 = vmatmul.mubr.bf16.vlgmr.msra.gmra.mrb[44].mxu1 %v3148_v22 }
 0xea0   : > { %v4159_v27 = vpop.f32.mrb[36].mxu0  ;;  %v4181_v45 = vpop.f32.mrb[40].mxu1 }
 0xea1   : > { %v4160_v52 = vpop.f32.mrb[37].mxu0  ;;  %v4182_v30 = vpop.f32.mrb[41].mxu1 }
 0xea2   : > { %v4161_v31 = vadd.f32 %v4160_v52, %v4159_v27  ;;  %v4183_v36 = vadd.f32 %v4182_v30, %v4181_v45  ;;  %v4162_v37 = vpop.f32.mrb[38].mxu0  ;;  %v4184_v38 = vpop.f32.mrb[42].mxu1 }
 0xea3   : > { %v4163_v39 = vpop.f32.mrb[39].mxu0  ;;  %v4185_v41 = vpop.f32.mrb[43].mxu1 }
 0xea4   : > { %v3573_v42 = vadd.f32 %v4161_v31, %v3153_v29  ;;  %v4164_v47 = vadd.f32 %v4163_v39, %v4162_v37  ;;  %v4186_v1 = vadd.f32 %v4185_v41, %v4184_v38 }
 0xea6   : > { %v3614_v4 = vadd.f32 %v4183_v36, %v3573_v42  ;;  %v3576_v48 = vadd.f32 %v4164_v47, %v3153_v29 }
 0xea8   : > { %v3617_v51 = vadd.f32 %v4186_v1, %v3576_v48 }
 0xec0   : > { %v4203_v26 = vpop.f32.mrb[40].mxu0  ;;  %v4225_v53 = vpop.f32.mrb[44].mxu1 }
 0xec1   : > { %v4204_v54 = vpop.f32.mrb[41].mxu0  ;;  %v4226_v56 = vpop.f32.mrb[45].mxu1 }
 0xec2   : > { %v4205_v58 = vadd.f32 %v4204_v54, %v4203_v26  ;;  %v4227_v50 = vadd.f32 %v4226_v56, %v4225_v53  ;;  %v4206_v59 = vpop.f32.mrb[42].mxu0  ;;  %v4228_v60 = vpop.f32.mrb[46].mxu1 }
 0xec3   : > { %v4207_v61 = vpop.f32.mrb[43].mxu0  ;;  %v4229_v62 = vpop.f32.mrb[47].mxu1 }
 0xec4   : > { %v3655_v3 = vadd.f32 %v4205_v58, %v3614_v4  ;;  %v4208_v46 = vadd.f32 %v4207_v61, %v4206_v59  ;;  %v4230_v0 = vadd.f32 %v4229_v62, %v4228_v60 }
 0xec6   : > { %v3696_v49 = vadd.f32 %v4227_v50, %v3655_v3  ;;  %v3658_v2 = vadd.f32 %v4208_v46, %v3617_v51 }
 0xec8   : > { %v3699_v6 = vadd.f32 %v4230_v0, %v3658_v2  ;;  %v3702_v35 = vadd.f32 %v3696_v49, %v5377_v18 }
 0xeca   : > { %3704 = vadd.xlane.f32.xlu0 %v3702_v35  ;;  %v3703_v10 = vadd.f32 %v3699_v6, %v5379_v19  ;;  %v3729_v19 = vrot.slane %v4573_v28, %v2624_v25 }
 0xece   : > { %3706 = vadd.xlane.f32.xlu0 %v3703_v10 }
 0xf57   : > { %v3705_v8 = vpop.xlane.xlu0 %3704 }
 0xf58   : > { %v3708_v9 = vmul.f32 0.0078125, %v3705_v8 }
 0xf5a   : > { %v3710_v11 = vsub.f32 %v3702_v35, %v3708_v9 }
 0xf5b   : > { %v3707_v7 = vpop.xlane.xlu0 %3706 }
 0xf5c   : > { %v3709_v44 = vmul.f32 0.0078125, %v3707_v7  ;;  %v3712_v43 = vmul.f32 %v3710_v11, %v3710_v11 }
 0xf5e   : > { %v3711_v12 = vsub.f32 %v3703_v10, %v3709_v44  ;;  %3714 = vadd.xlane.f32.xlu0 %v3712_v43 }
 0xf60   : > { %v3713_v33 = vmul.f32 %v3711_v12, %v3711_v12 }
 0xf62   : > { %3716 = vadd.xlane.f32.xlu1 %v3713_v33 }
 0xfeb   : > { %v3715_v13 = vpop.xlane.xlu0 %3714 }
 0xfec   : > { %v3718_v5 = vmul.f32 0.0078125, %v3715_v13 }
 0xfee   : > { %v3720_v14 = vadd.f32 1e-05, %v3718_v5 }
 0xfef   : > { %v3717_v55 = vpop.xlane.xlu1 %3716 }
 0xff0   : > { %4569 = vrsqrt.f32 %v3720_v14  ;;  %v3719_v18 = vmul.f32 0.0078125, %v3717_v55 }
 0xff2   : > { %v3721_v15 = vadd.f32 1e-05, %v3719_v18 }
 0xff4   : > { %4571 = vrsqrt.f32 %v3721_v15 }
 0xffa   : > { %v4570_v16 = vpop.eup %4569 }
 0xffb   : > { %v3724_v17 = vmul.f32 %v4570_v16, %v3710_v11 }
 0xffd   : > { %v3730_v63 = vmul.f32 %v3729_v19, %v3724_v17 }
 0xffe   : > { %v4572_v20 = vpop.eup %4571 }
 0xfff   : > { %v3736_v34 = vadd.f32 %v4082_v57, %v3730_v63  ;;  %v3725_v21 = vmul.f32 %v4572_v20, %v3711_v12 }
0x1001   : > { %3738 = vst [vmem:[%s5542_s8] sm:$0xff] %v3736_v34  ;;  %v3731_v40 = vmul.f32 %v3729_v19, %v3725_v21 }
0x1003   : > { %v3737_v22 = vadd.f32 %v4082_v57, %v3731_v40 }
0x1005   : > { %3739 = vst [vmem:[%s5542_s8 + $0x8] sm:$0xff] %v3737_v22 }
0x1006 PF: > { %s5564_s3 = sld [smem:[#allocation12_spill]]  ;;  %p24_p3 = scmp.ge.s32.totalorder %s4820_s10, 4  }
0x1007   : > { %s5565_s27 = smov %s4728_s28  ;;  %s5566_s28 = smov %s4732_s29 }
0x1008   : > { %s5568_s30 = smov %s4820_s10  ;;  %26 = sbr.rel (!%p24_p3) target bundleno = 10 (0xa), region = 135 }
0x100c   : > { %s5567_s29 = smov %s5564_s3 }
0x100f   :  { %3751 = vsyncpa [#allocation3], 1 }
0x1010   :  { %3753 = vsyncpa [#allocation3 + $0x1], 1 }
0x1011   :  { %3754 = vsyncpa [#allocation5], 1 }
0x1012   :  { %3756 = vsyncpa [#allocation5 + $0x1], 1 }
0x1013   :  { %3757 = vsyncpa [#allocation8], 1 }
0x1014   :  { %3759 = vsyncpa [#allocation8 + $0x1], 1 }

// kernel: transformer_forward.4
= control target key start
LH: loop header
LB: loop body
LE: loop exit
PB: predicated region body
PF: predicated region fallthrough
CT: control target
= control target key end

     0   :  { %s7991_s0 = inlined_call_operand.vmem [shape: f32[2,8,128], index: 0, kind: input, shape index: {}]   ;;  %s7992_s1 = inlined_call_operand.vmem [shape: bf16[2,8,128], index: 1, kind: input, shape index: {}]   ;;  %s7993_s2 = inlined_call_operand.vmem [shape: f32[2,8], index: 2, kind: input, shape index: {}]   ;;  %s7994_s3 = inlined_call_operand.vmem [shape: f32[2,8], index: 3, kind: input, shape index: {}]   ;;  %s7995_s4 = inlined_call_operand.vmem [shape: bf16[2,128,384], index: 4, kind: input, shape index: {}]   ;;  %s7996_s5 = inlined_call_operand.vmem [shape: bf16[2,128,128], index: 5, kind: input, shape index: {}]   ;;  %s7997_s6 = inlined_call_operand.vmem [shape: bf16[2,128,128], index: 6, kind: input, shape index: {}]   ;;  %s7998_s7 = inlined_call_operand.vmem [shape: bf16[2,128,256], index: 7, kind: input, shape index: {}]   ;;  %s7999_s8 = inlined_call_operand.hbm [shape: bf16[2,128,128], index: 8, kind: input, shape index: {}]   ;;  %s8000_s9 = inlined_call_operand.vmem [shape: bf16[2,128,1024], index: 9, kind: input, shape index: {}]   ;;  %s8001_s10 = inlined_call_operand.vmem [shape: f32[2,1,1024], index: 10, kind: input, shape index: {}]   ;;  %s8002_s11 = inlined_call_operand.vmem [shape: bf16[2,1024,128], index: 11, kind: input, shape index: {}]   ;;  %s8003_s12 = inlined_call_operand.vmem [shape: f32[2,15,128], index: 12, kind: input, shape index: {}]   ;;  %s8004_s13 = inlined_call_operand.vmem [shape: f32[2,8,128], index: 13, kind: output, shape index: {}]  }
   0x1   :  { %8010 = sst [smem:[#allocation10_spill]] %s7995_s4 }
   0x2   :  { %8011 = sst [smem:[#allocation11_spill]] %s7996_s5 }
   0x3   :  { %8012 = sst [smem:[#allocation12_spill]] %s7997_s6 }
   0x4   :  { %8013 = sst [smem:[#allocation13_spill]] %s7999_s8 }
   0x5   :  { %18 = vsyncpa [#allocation3], 0 }
   0x6   :  { %20 = vsyncpa [#allocation3 + $0x1], 0  ;;  %s7086_s25 = smov 0   ;;  %s7088_s26 = smov 0  }
   0x7   :  { %s7090_s27 = smov 0   ;;  %s7092_s28 = smov 0  }
   0x8 LB: > { %8014 = sst [smem:[#allocation5_spill]] %s6995_s26  ;;  %s7105_s29 = sadd.s32 4294967295, %s7003_s28   ;;  %s7003_s28 = sphi %s7092_s28, %s8027_s28   ;;  %s6999_s27 = sphi %s7090_s27, %s8030_s27   ;;  %s6995_s26 = sphi %s7088_s26, %s8029_s26   ;;  %s6991_s25 = sphi %s7086_s25, %s8028_s25  }
   0x9   : > { %8015 = sst [smem:[#allocation6_spill]] %s6999_s27  ;;  %s7108_s30 = sadd.s32 1, %s7003_s28  }
   0xa   : > { %8016 = sst [smem:[#allocation7_spill]] %s7108_s30  ;;  %s218_s14 = ssub.s32 %s7003_s28, %s7108_s30 }
   0xb   : > { %s221_s15 = sadd.s32 1, %s6999_s27  ;;  %p219_p0 = scmp.eq.s32.totalorder %s218_s14, 0 }
   0xc   : > { %p228_p1 = scmp.ne.s32.totalorder %s6999_s27, %s6995_s26  ;;  %p229_p2 = scmp.eq.s32.totalorder %s7003_s28, 0 }
   0xd   : > { %p234_p3 = scmp.ne.s32.totalorder %s6995_s26, %s6991_s25  ;;  %p235_p5 = scmp.eq.s32.totalorder %s7105_s29, 0 }
   0xe   : > { %s7118_s16 = scalar_select %p219_p0, %s6999_s27, %s221_s15  }
   0xf   : > { %p230_p4 = por %p229_p2, %p228_p1  ;;  %p6672_p6 = scmp.lt.s32.totalorder %s7003_s28, 2 }
  0x10   : > { %8017 = sst [smem:[#allocation8_spill]] %s7118_s16  ;;  %p7122_p7 = por %p235_p5, %p234_p3 }
  0x11   : > { %s427_s18 = sand.u32 1, %s6999_s27   ;;  %s6200_s20 = sshll.u32 %s7003_s28, 10 }
  0x12   : > { %s5927_s19 = sshll.u32 %s427_s18, 6  ;;  %s8019_s8 = sld [smem:[#allocation13_spill]] }
  0x13   : > { %s431_s24 = scalar_lea.vmem [#allocation2], %s5927_s19  ;;  %p7135_p8 = pnand %p6672_p6, %p230_p4 }
  0x14   : > { %s438_s25 = sshll.u32 %s431_s24, 4  ;;  %s7140_s15 = scalar_lea.sflag [#allocation3], %s427_s18  ;;  %s7133_s25 = int_to_ptr.vmem [resolvable:$true] %s438_s25 }
  0x15   : > { %p6941_p11 = pneg %p7135_p8 }
  0x18   : > { %s7131_s23 = scalar_lea.hbm %s8019_s8, %s6200_s20  ;;  %s6944_s22 = scalar_lea.hbm %s8019_s8, 2048 }
  0x19   : > { %s6939_s21 = scalar_lea.hbm %s7131_s23, 1024  ;;  %p6945_p0 = scmp.lt.u32.totalorder %s7131_s23, %s8019_s8 }
  0x1a   : > { %p6940_p10 = scmp.ne.s32.totalorder %s7131_s23, %s6939_s21  ;;  %p6946_p1 = scmp.lt.u32.totalorder %s6944_s22, %s6939_s21 }
  0x1b   : > { %p6948_p3 = scmp.lt.u32.totalorder %s6939_s21, %s7131_s23 }
  0x1c   : > { %p6942_p12 = pnand %p6941_p11, %p6940_p10  ;;  %p6947_p2 = por %p6946_p1, %p6945_p0 }
  0x1e   : > { %p6943_p13 = pneg %p6942_p12  ;;  %p6949_p4 = por %p6948_p3, %p6947_p2 }
  0x20   : > { %p6950_p5 = pnand %p6949_p4, %p6943_p13 }
  0x22   : > { %6953 = shalt.err (!%p6950_p5)
}
  0x23   : > { %s6954_s18 = scalar_lea.vmem %s7133_s25, 1024  ;;  %s7005_s19 = smov [#allocation2]  }
  0x24   : > { %p6955_p6 = scmp.ne.s32.totalorder %s7133_s25, %s6954_s18  ;;  %s6959_s20 = sshll.u32 %s7005_s19, 4  ;;  %s6960_s20 = int_to_ptr.vmem [resolvable:$false] %s6959_s20 }
  0x25   : > { %s6961_s16 = scalar_lea.vmem %s6960_s20, 2048  ;;  %p6962_p9 = scmp.lt.s32.totalorder %s7133_s25, %s6960_s20 }
  0x26   : > { %p6957_p10 = pnand %p6955_p6, %p6941_p11  ;;  %p6963_p0 = scmp.lt.s32.totalorder %s6961_s16, %s6954_s18 }
  0x28   : > { %p6958_p12 = pneg %p6957_p10  ;;  %p6964_p1 = por %p6963_p0, %p6962_p9 }
  0x2a   : > { %p6965_p2 = pnand %p6964_p1, %p6958_p12 }
  0x2c   : > { %6968 = shalt.err (!%p6965_p2)
}
  0x2d   : > { %s7006_s21 = smov 64   ;;  %s7007_s22 = smov 4  }
  0x2e   : > { %6671 = dma.hbm_to_vmem [thread:$0]  (!%p7135_p8), %s7131_s23, 1024, %s7133_s25, %s7140_s15, %s7006_s21, %s7006_s21, %s7007_s22  }
  0x2f   : > { %p477_p11 = scmp.lt.s32.totalorder %s7003_s28, 3  ;;  %p8021_p13 = scmp.ge.s32.totalorder %s7003_s28, 1 }
  0x31   : > { %p478_p3 = pnand %p8021_p13, %p477_p11 }
  0x33   : > { %481 = sbr.rel (%p478_p3) target bundleno = 7141 (0x1be5), region = 72 }
  0x3a   : > { %s483_s24 = sand.u32 1, %s6995_s26  }
  0x3b   : > { %s5931_s18 = sshll.u32 %s483_s24, 6  ;;  %s484_s19 = scalar_lea.sflag [#allocation3], %s483_s24 }
  0x3c   : > { %s7172_s20 = scalar_lea.vmem [#allocation2], %s5931_s18 }
  0x3d   : > { %8022 = sst [smem:[#allocation9_spill]] %s7172_s20 }
  0x3e   : > { %6986 = dma.done.wait (%p7122_p7), %s484_s19, 1024  }
  0x3f   : > { %6988 = vsyncadd (%p7122_p7), %s484_s19, 4294966272  ;;  %p564_p9 = scmp.lt.s32.totalorder %s7105_s29, 1  ;;  %s8023_s5 = sld [smem:[#allocation11_spill]] }
  0x40   : > { %s8024_s6 = sld [smem:[#allocation12_spill]]  ;;  %s8025_s4 = sld [smem:[#allocation10_spill]] }
  0x41   : > { %s565_s23 = scalar_select %p564_p9, %s7105_s29, 1 }
  0x42   : > { %p5946_p7 = scmp.ne.s32.totalorder %s7105_s29, 0 }
  0x43   : > { %s6665_s25 = smul.u32 192, %s565_s23  ;;  %s6201_s28 = sshll.u32 %s565_s23, 6  ;;  %v608_v0 = vld [vmem:[%s7991_s0] sm:$0xff] (!%p5946_p7)  ;;  %v609_v1 = vld [vmem:[%s7991_s0 + $0x8] sm:$0xff] (!%p5946_p7) }
  0x44   : > { %s6203_s19 = sshll.u32 %s565_s23, 7  ;;  %s6204_s20 = sshll.u32 %s565_s23, 9  ;;  %610 = vst [vmem:[%s8004_s13] sm:$0xff] (!%p5946_p7), %v608_v0  ;;  %611 = vst [vmem:[%s8004_s13 + $0x8] sm:$0xff] (!%p5946_p7), %v609_v1 }
  0x45   : > { %s7183_s16 = scalar_lea.vmem %s8023_s5, %s6201_s28  ;;  %s7198_s30 = scalar_lea.vmem %s7998_s7, %s6203_s19 }
  0x46   : > { %s7188_s24 = scalar_lea.vmem %s8024_s6, %s6201_s28  ;;  %s7193_s17 = scalar_lea.vmem %s8025_s4, %s6665_s25 }
  0x47   : > { %s7203_s5 = scalar_lea.vmem %s8000_s9, %s6204_s20  ;;  %s5941_s21 = sshll.u32 %s565_s23, 3 }
  0x48   : > { %s7208_s6 = scalar_lea.vmem %s8001_s10, %s5941_s21  ;;  %s7213_s18 = scalar_lea.vmem %s8002_s11, %s6204_s20 }
  0x49   : > { %s6206_s26 = sshll.u32 %s565_s23, 4  ;;  %607 = sbr.rel (%p5946_p7) target bundleno = 80 (0x50), region = 80 }
  0x4a   : > { %s7218_s4 = scalar_lea.vmem %s8003_s12, %s6206_s26 }
  0x50 PF: > { %v6715_v2 = vld [vmem:[%s7193_s17 + $0x4] ss:$12 sps:$4 sm:$0xff]   ;;  %v6717_v3 = vld [vmem:[%s7193_s17] ss:$12 sps:$4 sm:$0xff]   ;;  %v7008_v4 = vmov 0   ;;  %v7009_v5 = vmov 0.0   ;;  %v618_v31 = vlaneseq }
  0x51   : > { %862 = vmatprep.mubr.bf16.mxu0 %v7008_v4  ;;  %6401 = vmatprep.subr.bf16.mxu1 %v7009_v5  ;;  %v6718_v6 = vld [vmem:[%s7193_s17 + $0x1c] ss:$12 sps:$4 sm:$0xff]   ;;  %vm7010_vm0 = vmmov 0   ;;  %v6720_v7 = vld [vmem:[%s7193_s17 + $0x18] ss:$12 sps:$4 sm:$0xff]   ;;  %vm948_vm1 = vcmask 261120  }
  0x52   : > { %830 = vmatprep.subr.bf16.mxu0 %v6715_v2  ;;  %6417 = vmatprep.mubr.msk.bf16.mxu1 %vm7010_vm0, %v7009_v5  ;;  %v6721_v8 = vld [vmem:[%s7193_s17 + $0x34] ss:$12 sps:$4 sm:$0xff]   ;;  %v6723_v9 = vld [vmem:[%s7193_s17 + $0x30] ss:$12 sps:$4 sm:$0xff]   ;;  %v6724_v10 = vld [vmem:[%s7193_s17 + $0x4c] ss:$12 sps:$4 sm:$0xff]  }
  0x53   : > { %831 = vmatpush1.bf16.msra.mxu0 %v6717_v3  ;;  %v6726_v11 = vld [vmem:[%s7193_s17 + $0x48] ss:$12 sps:$4 sm:$0xff]   ;;  %v6727_v12 = vld [vmem:[%s7193_s17 + $0x64] ss:$12 sps:$4 sm:$0xff]   ;;  %v6740_v14 = vld [vmem:[%s7193_s17 + $0x20] ss:$12 sps:$4 sm:$0xff]  }
  0x54   : > { %832 = vmatprep.subr.bf16.mxu0 %v6718_v6  ;;  %v6739_v13 = vld [vmem:[%s7193_s17 + $0x8] ss:$12 sps:$4 sm:$0xff]   ;;  %v6729_v15 = vld [vmem:[%s7193_s17 + $0x60] ss:$12 sps:$4 sm:$0xff]   ;;  %v6741_v17 = vld [vmem:[%s7193_s17 + $0x38] ss:$12 sps:$4 sm:$0xff]  }
  0x55   : > { %6402 = vmatpush3.bf16.msra.mxu1 %v6739_v13  ;;  %v6730_v16 = vld [vmem:[%s7193_s17 + $0x7c] ss:$12 sps:$4 sm:$0xff]   ;;  %v6732_v18 = vld [vmem:[%s7193_s17 + $0x78] ss:$12 sps:$4 sm:$0xff]   ;;  %v6733_v19 = vld [vmem:[%s7193_s17 + $0x94] ss:$12 sps:$4 sm:$0xff]  }
  0x56   : > { %6403 = vmatprep.subr.bf16.mxu1 %v7009_v5  ;;  %v6742_v20 = vld [vmem:[%s7193_s17 + $0x50] ss:$12 sps:$4 sm:$0xff]   ;;  %v6736_v22 = vld [vmem:[%s7193_s17 + $0xac] ss:$12 sps:$4 sm:$0xff]   ;;  %v6743_v23 = vld [vmem:[%s7193_s17 + $0x68] ss:$12 sps:$4 sm:$0xff]  }
  0x57   : > { %833 = vmatpush1.bf16.msra.mxu0 %v6720_v7  ;;  %v6735_v21 = vld [vmem:[%s7193_s17 + $0x90] ss:$12 sps:$4 sm:$0xff]   ;;  %v6738_v24 = vld [vmem:[%s7193_s17 + $0xa8] ss:$12 sps:$4 sm:$0xff]   ;;  %v612_v25 = vld [vmem:[%s8004_s13] sm:$0xff]  ;;  %v7280_v32 = vshrl.u32 %v618_v31, 7 }
  0x58   : > { %834 = vmatprep.subr.bf16.mxu0 %v6721_v8  ;;  %v613_v26 = vld [vmem:[%s8004_s13 + $0x8] sm:$0xff]  ;;  %v6745_v29 = vld [vmem:[%s7193_s17 + $0x98] ss:$12 sps:$4 sm:$0xff]   ;;  %v6746_v30 = vld [vmem:[%s7193_s17 + $0xb0] ss:$12 sps:$4 sm:$0xff]   ;;  %v621_v59 = vand.u32 127, %v618_v31 }
  0x59   : > { %6404 = vmatpush3.bf16.msra.mxu1 %v6740_v14  ;;  %v6744_v27 = vld [vmem:[%s7193_s17 + $0x80] ss:$12 sps:$4 sm:$0xff]   ;;  %v701_v28 = vpack.c.bf16 %v613_v26, %v612_v25  ;;  %v7286_v35 = vsub.s32 0, %v7280_v32  ;;  %v7289_v37 = vsub.s32 1, %v7280_v32  ;;  %v7305_v48 = vsub.s32 2, %v7280_v32  ;;  %s7012_s17 = smov 96  }
  0x5a   : > { %6405 = vmatprep.subr.bf16.mxu1 %v7009_v5  ;;  %v624_v33 = vld [vmem:[%s7994_s3] sm:$0x3]  ;;  %vm622_vm2 = vcmp.ge.s32.totalorder %v7280_v32, %v621_v59  ;;  %v7011_v61 = vmov -1e+10   ;;  %vm1105_vm3 = vcmask 64512   ;;  %s7013_s15 = smov 64  }
  0x5b   : > { %835 = vmatpush1.bf16.msra.mxu0 %v6723_v9  ;;  %v5947_v34 = vadd.f32 -1.0, %v624_v33  ;;  %v7294_v40 = vld [vmem:[%s7218_s4] sm:$0xff]  ;;  %v623_v62 = vsel %vm622_vm2, 0.0, %v7011_v61  ;;  %s7014_s21 = smov 32   ;;  %s8026_s29 = sld [smem:[#allocation9_spill]] }
  0x5c   : > { %836 = vmatprep.subr.bf16.mxu0 %v6724_v10  ;;  %v923_v41 = vrot.slane %v7294_v40, %v7289_v37  ;;  %v917_v43 = vrot.slane %v7294_v40, %v7286_v35  ;;  %v929_v51 = vrot.slane %v7294_v40, %v7305_v48 }
  0x5d   : > { %6406 = vmatpush3.bf16.msra.mxu1 %v6741_v17  ;;  %v626_v36 = vmul.f32 1e+10, %v5947_v34 }
  0x5e   : > { %6407 = vmatprep.subr.bf16.mxu1 %v7009_v5 }
  0x5f   : > { %837 = vmatpush1.bf16.msra.mxu0 %v6726_v11  ;;  %v630_v38 = vrot.slane %v626_v36, %v7286_v35  ;;  %v637_v39 = vrot.slane %v626_v36, %v7289_v37 }
  0x60   : > { %838 = vmatprep.subr.bf16.mxu0 %v6727_v12 }
  0x61   : > { %6408 = vmatpush3.bf16.msra.mxu1 %v6742_v20  ;;  %632 = vbcast.lane.b32.xlu0 %v630_v38, 256 }
  0x62   : > { %6409 = vmatprep.subr.bf16.mxu1 %v7009_v5 }
  0x63   : > { %839 = vmatpush1.bf16.msra.mxu0 %v6729_v15 }
  0x64   : > { %840 = vmatprep.subr.bf16.mxu0 %v6730_v16 }
  0x65   : > { %6410 = vmatpush3.bf16.msra.mxu1 %v6743_v23  ;;  %639 = vbcast.lane.b32.xlu0 %v637_v39, 256 }
  0x66   : > { %6411 = vmatprep.subr.bf16.mxu1 %v7009_v5 }
  0x67   : > { %841 = vmatpush1.bf16.msra.mxu0 %v6732_v18 }
  0x68   : > { %842 = vmatprep.subr.bf16.mxu0 %v6733_v19 }
  0x69   : > { %6412 = vmatpush3.bf16.msra.mxu1 %v6744_v27 }
  0x6a   : > { %6413 = vmatprep.subr.bf16.mxu1 %v7009_v5 }
  0x6b   : > { %843 = vmatpush1.bf16.msra.mxu0 %v6735_v21 }
  0x6c   : > { %844 = vmatprep.subr.bf16.mxu0 %v6736_v22 }
  0x6d   : > { %6414 = vmatpush3.bf16.msra.mxu1 %v6745_v29 }
  0x6e   : > { %6415 = vmatprep.subr.bf16.mxu1 %v7009_v5 }
  0x6f   : > { %845 = vmatpush1.bf16.msra.mxu0 %v6738_v24 }
  0x70   : > { %6431 = vmatprep.subr.mxu0 %v7009_v5 }
  0x71   : > { %6416 = vmatpush3.bf16.msra.mxu1 %v6746_v30 }
  0x72   : > { %863 = vmatmul.mubr.bf16.vlgmr.msra.gmra.mrb[0].mxu0 %v701_v28  ;;  %6421 = vmatprep.subr.mxu1 %v7009_v5 }
  0x73   : > { %6433 = vmatprep.mubr.msk.f32.mxu0 %vm7010_vm0, %v7009_v5 }
  0x74   : > { %6418 = vmatmul.mubr.bf16.vlgmr.msra.gmra.mrb[0].mxu1 %v701_v28 }
  0x75   : > { %6423 = vmatprep.mubr.msk.f32.mxu1 %vm7010_vm0, %v7009_v5 }
  0xd3   : > { %v633_v60 = vpop.permute.xlu0 %632 }
  0xd4   : > { %v7336_v63 = vadd.f32 %v633_v60, %v623_v62 }
  0xd7   : > { %v640_v1 = vpop.permute.xlu0 %639 }
  0xd8   : > { %v7338_v6 = vadd.f32 %v640_v1, %v623_v62 }
 0x145   : > { %v864_v42 = vpop.f32.mrb[0].mxu0 }
 0x146   : > { %v866_v44 = vpop.f32.mrb[1].mxu0  ;;  %v7307_v49 = vadd.f32 %v917_v43, %v864_v42 }
 0x147   : > { %v7300_v45 = vadd.f32 %v923_v41, %v866_v44  ;;  %v868_v46 = vpop.f32.mrb[2].mxu0  ;;  %v907_v53 = vpop.f32.mrb[0].mxu1 }
 0x148   : > { %v870_v47 = vpop.f32.mrb[3].mxu0  ;;  %v7320_v52 = vadd.f32 %v917_v43, %v868_v46  ;;  %v7325_v54 = vadd.f32 %v929_v51, %v907_v53  ;;  %v6419_v55 = vpop.f32.mrb[1].mxu1 }
 0x149   : > { %6422 = vmatpush3.xpose.msk.msra.mxu1 %vm948_vm1, %v7300_v45  ;;  %v7310_v50 = vadd.f32 %v923_v41, %v870_v47  ;;  %v910_v56 = vpop.f32.mrb[2].mxu1 }
 0x14a   : > { %6426 = vmatprep.subr.mxu1 %v7009_v5  ;;  %v7329_v57 = vadd.f32 %v929_v51, %v910_v56  ;;  %v6420_v58 = vpop.f32.mrb[3].mxu1  ;;  %6432 = vmatpush3.msra.mxu0 %v7325_v54 }
 0x14b   : > { %6441 = vmatprep.subr.mxu0 %v7009_v5 }
 0x14c   : > { %6424 = vmatmul.mubr.msk.f32.vlgmr.msra.gmra.mrb[4].mxu1 %vm948_vm1, %v7307_v49 }
 0x14d   : > { %6427 = vmatpush3.xpose.msk.msra.mxu1 %vm948_vm1, %v7310_v50  ;;  %6428 = vmatprep.mubr.msk.f32.mxu1 %vm7010_vm0, %v7009_v5 }
 0x14e   : > { %6436 = vmatprep.subr.mxu1 %v7009_v5 }
 0x150   : > { %6429 = vmatmul.mubr.msk.f32.vlgmr.msra.gmra.mrb[6].mxu1 %vm948_vm1, %v7320_v52 }
 0x151   : > { %6438 = vmatprep.mubr.msk.f32.mxu1 %vm7010_vm0, %v7009_v5  ;;  %6437 = vmatpush3.msra.mxu1 %v7329_v57 }
 0x152   : > { %6446 = vmatprep.subr.mxu1 %v7009_v5 }
 0x21f   : > { %v1021_v0 = vpop.f32.mrb[4].mxu1 }
 0x220   : > { %v1101_v2 = vmul.f32 0.17677669, %v1021_v0  ;;  %v6425_v3 = vpop.f32.mrb[5].mxu1 }
 0x222   : > { %v1103_v7 = vadd.f32 %v1101_v2, %v7336_v63 }
 0x223   : > { %v1097_v8 = vpop.f32.mrb[6].mxu1 }
 0x224   : > { %v1102_v9 = vmul.f32 0.17677669, %v1097_v8  ;;  %v6430_v10 = vpop.f32.mrb[7].mxu1  ;;  %v1106_v11 = vsel %vm1105_vm3, %v1103_v7, -inf }
 0x225   : > { %1107 = vmax.xlane.f32.xlu1 %v1106_v11 }
 0x226   : > { %v1104_v12 = vadd.f32 %v1102_v9, %v7338_v6 }
 0x228   : > { %v1109_v13 = vsel %vm1105_vm3, %v1104_v12, -inf }
 0x229   : > { %1110 = vmax.xlane.f32.xlu1 %v1109_v13 }
 0x23a   : > { %1277 = vrot.lane.b32.xlu1 %v7300_v45, %s7012_s17 }
 0x23e   : > { %1355 = vrot.lane.b32.xlu1 %v7310_v50, %s7012_s17 }
 0x242   : > { %1275 = vrot.lane.b32.xlu1 %v7307_v49, %s7012_s17 }
 0x2b2   : > { %v1108_v14 = vpop.xlane.xlu1 %1107 }
 0x2b3   : > { %v1112_v15 = vsub.f32 %v1103_v7, %v1108_v14 }
 0x2b5   : > { %v1114_v16 = vmul.f32 1.442695, %v1112_v15  ;;  %v6749_v15 = vld [vmem:[%s7183_s16 + $0x10] sm:$0xff]  }
 0x2b6   : > { %v1111_v17 = vpop.xlane.xlu1 %1110 }
 0x2b7   : > { %6860 = vpow2.f32 %v1114_v16  ;;  %v1113_v18 = vsub.f32 %v1104_v12, %v1111_v17 }
 0x2b9   : > { %v1116_v19 = vmul.f32 1.442695, %v1113_v18 }
 0x2ba   : > { %v1278_v24 = vpop.permute.xlu1 %1277 }
 0x2bb   : > { %6862 = vpow2.f32 %v1116_v19  ;;  %v6750_v19 = vld [vmem:[%s7183_s16 + $0x18] sm:$0xff]  }
 0x2be   : > { %v1356_v25 = vpop.permute.xlu1 %1355 }
 0x2c1   : > { %v6861_v20 = vpop.eup %6860 }
 0x2c2   : > { %v1118_v21 = vsel %vm1105_vm3, %v6861_v20, 0.0  ;;  %v1276_v26 = vpop.permute.xlu1 %1275 }
 0x2c3   : > { %1119 = vadd.xlane.f32.xlu0 %v1118_v21 }
 0x2c5   : > { %v6863_v22 = vpop.eup %6862 }
 0x2c6   : > { %v1121_v23 = vsel %vm1105_vm3, %v6863_v22, 0.0 }
 0x2c7   : > { %1122 = vadd.xlane.f32.xlu1 %v1121_v23 }
 0x2d8   : > { %1353 = vrot.lane.b32.xlu1 %v7320_v52, %s7012_s17 }
 0x350   : > { %v1120_v27 = vpop.xlane.xlu0 %1119 }
 0x351   : > { %6864 = vrcp.f32 %v1120_v27 }
 0x354   : > { %v1123_v28 = vpop.xlane.xlu1 %1122 }
 0x355   : > { %6866 = vrcp.f32 %v1123_v28 }
 0x358   : > { %v1354_v34 = vpop.permute.xlu1 %1353 }
 0x35b   : > { %v6865_v29 = vpop.eup %6864 }
 0x35c   : > { %v1125_v30 = vmul.f32 %v6865_v29, %v6861_v20  ;;  %v6748_v20 = vld [vmem:[%s7183_s16 + $0x8] sm:$0xff]  }
 0x35e   : > { %6434 = vmatmul.mubr.msk.f32.vlgmr.msra.gmra.mrb[4].mxu0 %vm1105_vm3, %v1125_v30 }
 0x35f   : > { %v6867_v31 = vpop.eup %6866  ;;  %6442 = vmatpush3.xpose.msk.msra.mxu0 %vm948_vm1, %v1278_v24  ;;  %6443 = vmatprep.mubr.msk.f32.mxu0 %vm7010_vm0, %v7009_v5 }
 0x360   : > { %v1127_v33 = vmul.f32 %v6867_v31, %v6863_v22  ;;  %6451 = vmatprep.subr.mxu0 %v7009_v5 }
 0x362   : > { %6439 = vmatmul.mubr.msk.f32.vlgmr.msra.gmra.mrb[8].mxu1 %vm1105_vm3, %v1127_v33  ;;  %6444 = vmatmul.mubr.msk.f32.vlgmr.msra.gmra.mrb[6].mxu0 %vm948_vm1, %v1276_v26 }
 0x363   : > { %6447 = vmatpush3.xpose.msk.msra.mxu1 %vm948_vm1, %v1356_v25  ;;  %6448 = vmatprep.mubr.msk.f32.mxu1 %vm7010_vm0, %v7009_v5 }
 0x364   : > { %6456 = vmatprep.subr.mxu1 %v7009_v5  ;;  %6453 = vmatprep.mubr.msk.f32.mxu0 %vm7010_vm0, %v7009_v5 }
 0x366   : > { %6449 = vmatmul.mubr.msk.f32.vlgmr.msra.gmra.mrb[10].mxu1 %vm948_vm1, %v1354_v34 }
 0x367   : > { %6458 = vmatprep.mubr.msk.f32.mxu1 %vm7010_vm0, %v7009_v5 }
 0x431   : > { %v7370_v36 = vpop.f32.mrb[4].mxu0 }
 0x432   : > { %v6435_v38 = vpop.f32.mrb[5].mxu0 }
 0x435   : > { %v7372_v39 = vpop.f32.mrb[8].mxu1  ;;  %v1349_v41 = vpop.f32.mrb[6].mxu0 }
 0x436   : > { %v1274_v42 = vpack.c.bf16 %v7372_v39, %v7370_v36  ;;  %v1431_v43 = vmul.f32 0.17677669, %v1349_v41  ;;  %v6440_v44 = vpop.f32.mrb[9].mxu1  ;;  %v6445_v46 = vpop.f32.mrb[7].mxu0 }
 0x438   : > { %v1433_v47 = vadd.f32 %v1431_v43, %v7336_v63 }
 0x439   : > { %v1427_v51 = vpop.f32.mrb[10].mxu1 }
 0x43a   : > { %v1432_v53 = vmul.f32 0.17677669, %v1427_v51  ;;  %v6450_v55 = vpop.f32.mrb[11].mxu1  ;;  %v1435_v56 = vsel %vm1105_vm3, %v1433_v47, -inf }
 0x43b   : > { %1436 = vmax.xlane.f32.xlu0 %v1435_v56 }
 0x43c   : > { %v1434_v58 = vadd.f32 %v1432_v53, %v7338_v6 }
 0x43e   : > { %v1438_v59 = vsel %vm1105_vm3, %v1434_v58, -inf }
 0x43f   : > { %1439 = vmax.xlane.f32.xlu1 %v1438_v59 }
 0x450   : > { %1802 = vrot.lane.b32.xlu1 %v7320_v52, %s7013_s15 }
 0x451   : > { %1458 = vrot.lane.b32.xlu0 %v7325_v54, %s7012_s17 }
 0x454   : > { %2119 = vrot.lane.b32.xlu1 %v7300_v45, %s7014_s21 }
 0x4c8   : > { %v1437_v60 = vpop.xlane.xlu0 %1436 }
 0x4c9   : > { %v1441_v61 = vsub.f32 %v1433_v47, %v1437_v60 }
 0x4cb   : > { %v1443_v62 = vmul.f32 1.442695, %v1441_v61 }
 0x4cc   : > { %v1459_v0 = vpop.permute.xlu0 %1458  ;;  %v1440_v1 = vpop.xlane.xlu1 %1439 }
 0x4cd   : > { %6868 = vpow2.f32 %v1443_v62  ;;  %v1442_v2 = vsub.f32 %v1434_v58, %v1440_v1  ;;  %6452 = vmatpush3.msra.mxu0 %v1459_v0 }
 0x4ce   : > { %6461 = vmatprep.subr.bf16.mxu0 %v7009_v5 }
 0x4cf   : > { %v1445_v3 = vmul.f32 1.442695, %v1442_v2 }
 0x4d0   : > { %v1803_v22 = vpop.permute.xlu1 %1802 }
 0x4d1   : > { %6870 = vpow2.f32 %v1445_v3 }
 0x4d7   : > { %v6869_v7 = vpop.eup %6868 }
 0x4d8   : > { %v1447_v8 = vsel %vm1105_vm3, %v6869_v7, 0.0 }
 0x4d9   : > { %1448 = vadd.xlane.f32.xlu0 %v1447_v8 }
 0x4db   : > { %v6871_v9 = vpop.eup %6870 }
 0x4dc   : > { %v1450_v10 = vsel %vm1105_vm3, %v6871_v9, 0.0 }
 0x4dd   : > { %1451 = vadd.xlane.f32.xlu0 %v1450_v10 }
 0x4f3   : > { %1535 = vrot.lane.b32.xlu0 %v7329_v57, %s7012_s17 }
 0x4f7   : > { %1804 = vrot.lane.b32.xlu0 %v7310_v50, %s7013_s15 }
 0x4fb   : > { %1726 = vrot.lane.b32.xlu0 %v7300_v45, %s7013_s15  ;;  %v6747_v45 = vld [vmem:[%s7183_s16] sm:$0xff]  }
 0x4ff   : > { %1724 = vrot.lane.b32.xlu0 %v7307_v49, %s7013_s15 }
 0x566   : > { %v1449_v11 = vpop.xlane.xlu0 %1448 }
 0x567   : > { %6872 = vrcp.f32 %v1449_v11 }
 0x56a   : > { %v1452_v12 = vpop.xlane.xlu0 %1451 }
 0x56b   : > { %6874 = vrcp.f32 %v1452_v12 }
 0x56e   : > { %v1536_v13 = vpop.permute.xlu0 %1535 }
 0x56f   : > { %6457 = vmatpush3.msra.mxu1 %v1536_v13 }
 0x570   : > { %6469 = vmatprep.subr.bf16.mxu1 %v7009_v5 }
 0x571   : > { %v6873_v14 = vpop.eup %6872 }
 0x572   : > { %v1454_v16 = vmul.f32 %v6873_v14, %v6869_v7  ;;  %v1805_v21 = vpop.permute.xlu0 %1804 }
 0x574   : > { %6454 = vmatmul.mubr.msk.f32.vlgmr.msra.gmra.mrb[8].mxu0 %vm1105_vm3, %v1454_v16 }
 0x575   : > { %v6875_v17 = vpop.eup %6874  ;;  %6462 = vmatpush3.bf16.msra.mxu0 %v6749_v15  ;;  %6465 = vmatprep.mubr.msk.bf16.mxu0 %vm7010_vm0, %v7009_v5 }
 0x576   : > { %v1456_v18 = vmul.f32 %v6875_v17, %v6871_v9  ;;  %6463 = vmatprep.subr.bf16.mxu0 %v7009_v5  ;;  %v1727_v28 = vpop.permute.xlu0 %1726 }
 0x578   : > { %6459 = vmatmul.mubr.msk.f32.vlgmr.msra.gmra.mrb[12].mxu1 %vm1105_vm3, %v1456_v18 }
 0x579   : > { %6470 = vmatpush3.bf16.msra.mxu1 %v6747_v45  ;;  %6473 = vmatprep.mubr.msk.bf16.mxu1 %vm7010_vm0, %v7009_v5 }
 0x57a   : > { %6471 = vmatprep.subr.bf16.mxu1 %v7009_v5  ;;  %6464 = vmatpush3.bf16.msra.mxu0 %v6750_v19  ;;  %v1725_v31 = vpop.permute.xlu0 %1724 }
 0x57b   : > { %6477 = vmatprep.subr.mxu0 %v7009_v5 }
 0x57d   : > { %6472 = vmatpush3.bf16.msra.mxu1 %v6748_v20 }
 0x57e   : > { %6482 = vmatprep.subr.mxu1 %v7009_v5 }
 0x580   : > { %6474 = vmatmul.mubr.msk.bf16.vlgmr.msra.gmra.mrb[16].mxu1 %vm948_vm1, %v1274_v42 }
 0x581   : > { %6484 = vmatprep.mubr.msk.f32.mxu1 %vm7010_vm0, %v7009_v5 }
 0x586   : > { %6483 = vmatpush3.xpose.msk.msra.mxu1 %vm948_vm1, %v1805_v21 }
 0x587   : > { %6492 = vmatprep.subr.mxu1 %v7009_v5 }
 0x589   : > { %6485 = vmatmul.mubr.msk.f32.vlgmr.msra.gmra.mrb[14].mxu1 %vm948_vm1, %v1803_v22 }
 0x58a   : > { %6494 = vmatprep.mubr.msk.f32.mxu1 %vm7010_vm0, %v7009_v5 }
 0x647   : > { %v1530_v23 = vpop.f32.mrb[8].mxu0 }
 0x648   : > { %v6455_v24 = vpop.f32.mrb[9].mxu0 }
 0x64b   : > { %v1607_v25 = vpop.f32.mrb[12].mxu1 }
 0x64c   : > { %v1611_v26 = vpack.c.bf16 %v1607_v25, %v1530_v23  ;;  %v6460_v27 = vpop.f32.mrb[13].mxu1 }
 0x64e   : > { %6466 = vmatmul.mubr.msk.bf16.vlgmr.msra.gmra.mrb[12].mxu0 %vm948_vm1, %v1611_v26 }
 0x64f   : > { %6478 = vmatpush3.xpose.msk.msra.mxu0 %vm948_vm1, %v1727_v28  ;;  %6479 = vmatprep.mubr.msk.f32.mxu0 %vm7010_vm0, %v7009_v5 }
 0x650   : > { %6487 = vmatprep.subr.mxu0 %v7009_v5 }
 0x653   : > { %v1717_v29 = vpop.f32.mrb[16].mxu1 }
 0x654   : > { %v6475_v30 = vpop.f32.mrb[17].mxu1 }
 0x655   : > { %v1720_v33 = vpop.f32.mrb[18].mxu1 }
 0x656   : > { %v6476_v34 = vpop.f32.mrb[19].mxu1  ;;  %6480 = vmatmul.mubr.msk.f32.vlgmr.msra.gmra.mrb[10].mxu0 %vm948_vm1, %v1725_v31  ;;  %v6751_v31 = vld [vmem:[%s7183_s16 + $0x20] sm:$0xff]  }
 0x657   : > { %6489 = vmatprep.mubr.msk.f32.mxu0 %vm7010_vm0, %v7009_v5 }
 0x65c   : > { %v1876_v36 = vpop.f32.mrb[14].mxu1 }
 0x65d   : > { %v1881_v38 = vmul.f32 0.17677669, %v1876_v36  ;;  %v6486_v39 = vpop.f32.mrb[15].mxu1 }
 0x65f   : > { %v1883_v41 = vadd.f32 %v1881_v38, %v7338_v6 }
 0x661   : > { %v1887_v42 = vsel %vm1105_vm3, %v1883_v41, -inf }
 0x662   : > { %1888 = vmax.xlane.f32.xlu0 %v1887_v42 }
 0x678   : > { %1982 = vrot.lane.b32.xlu0 %v7329_v57, %s7013_s15 }
 0x67c   : > { %2117 = vrot.lane.b32.xlu0 %v7307_v49, %s7014_s21 }
 0x680   : > { %2197 = vrot.lane.b32.xlu0 %v7310_v50, %s7014_s21 }
 0x6ef   : > { %v1889_v43 = vpop.xlane.xlu0 %1888 }
 0x6f0   : > { %v1891_v44 = vsub.f32 %v1883_v41, %v1889_v43 }
 0x6f2   : > { %v1894_v46 = vmul.f32 1.442695, %v1891_v44 }
 0x6f3   : > { %v1983_v47 = vpop.permute.xlu0 %1982 }
 0x6f4   : > { %6876 = vpow2.f32 %v1894_v46  ;;  %6493 = vmatpush3.msra.mxu1 %v1983_v47 }
 0x6f5   : > { %6505 = vmatprep.subr.mxu1 %v7009_v5 }
 0x6f7   : > { %v2118_v7 = vpop.permute.xlu0 %2117 }
 0x6fb   : > { %v2198_v9 = vpop.permute.xlu0 %2197 }
 0x6fe   : > { %v6877_v51 = vpop.eup %6876 }
 0x6ff   : > { %v1899_v53 = vsel %vm1105_vm3, %v6877_v51, 0.0 }
 0x700   : > { %1900 = vadd.xlane.f32.xlu1 %v1899_v53 }
 0x711   : > { %2195 = vrot.lane.b32.xlu1 %v7320_v52, %s7014_s21  ;;  %v2120_v52 = vpop.permute.xlu1 %2119 }
 0x721   : > { %v1661_v55 = vpop.f32.mrb[12].mxu0 }
 0x722   : > { %v7443_v49 = vadd.f32 %v1717_v29, %v1661_v55  ;;  %v6467_v56 = vpop.f32.mrb[13].mxu0 }
 0x723   : > { %v1664_v50 = vpop.f32.mrb[14].mxu0 }
 0x724   : > { %v7445_v58 = vadd.f32 %v1720_v33, %v1664_v50  ;;  %v6468_v59 = vpop.f32.mrb[15].mxu0  ;;  %v6752_v33 = vld [vmem:[%s7183_s16 + $0x28] sm:$0xff]  }
 0x729   : > { %v1798_v60 = vpop.f32.mrb[10].mxu0 }
 0x72a   : > { %v1880_v61 = vmul.f32 0.17677669, %v1798_v60  ;;  %v6481_v62 = vpop.f32.mrb[11].mxu0 }
 0x72b   : > { %v6754_v62 = vld [vmem:[%s7183_s16 + $0x38] sm:$0xff]  }
 0x72c   : > { %v1882_v0 = vadd.f32 %v1880_v61, %v7336_v63  ;;  %v6753_v61 = vld [vmem:[%s7183_s16 + $0x30] sm:$0xff]  }
 0x72e   : > { %v1884_v1 = vsel %vm1105_vm3, %v1882_v0, -inf }
 0x72f   : > { %1885 = vmax.xlane.f32.xlu0 %v1884_v1 }
 0x745   : > { %1906 = vrot.lane.b32.xlu0 %v7325_v54, %s7013_s15 }
 0x749   : > { %2299 = vrot.lane.b32.xlu0 %v7325_v54, %s7014_s21 }
 0x78d   : > { %v1901_v2 = vpop.xlane.xlu1 %1900 }
 0x78e   : > { %6878 = vrcp.f32 %v1901_v2 }
 0x791   : > { %v2196_v54 = vpop.permute.xlu1 %2195 }
 0x798   : > { %v6879_v3 = vpop.eup %6878 }
 0x799   : > { %v1905_v8 = vmul.f32 %v6879_v3, %v6877_v51 }
 0x79b   : > { %6495 = vmatmul.mubr.msk.f32.vlgmr.msra.gmra.mrb[20].mxu1 %vm1105_vm3, %v1905_v8 }
 0x79c   : > { %6506 = vmatpush3.xpose.msk.msra.mxu1 %vm948_vm1, %v2120_v52  ;;  %6507 = vmatprep.mubr.msk.f32.mxu1 %vm7010_vm0, %v7009_v5 }
 0x79d   : > { %6510 = vmatprep.subr.mxu1 %v7009_v5 }
 0x79f   : > { %6508 = vmatmul.mubr.msk.f32.vlgmr.msra.gmra.mrb[22].mxu1 %vm948_vm1, %v2118_v7 }
 0x7a0   : > { %6511 = vmatpush3.xpose.msk.msra.mxu1 %vm948_vm1, %v2198_v9  ;;  %6512 = vmatprep.mubr.msk.f32.mxu1 %vm7010_vm0, %v7009_v5 }
 0x7a1   : > { %6515 = vmatprep.subr.mxu1 %v7009_v5 }
 0x7a3   : > { %6513 = vmatmul.mubr.msk.f32.vlgmr.msra.gmra.mrb[24].mxu1 %vm948_vm1, %v2196_v54 }
 0x7a4   : > { %6517 = vmatprep.mubr.msk.f32.mxu1 %vm7010_vm0, %v7009_v5 }
 0x7bc   : > { %v1886_v10 = vpop.xlane.xlu0 %1885 }
 0x7bd   : > { %v1890_v11 = vsub.f32 %v1882_v0, %v1886_v10 }
 0x7bf   : > { %v1892_v12 = vmul.f32 1.442695, %v1890_v11 }
 0x7c0   : > { %v1907_v13 = vpop.permute.xlu0 %1906 }
 0x7c1   : > { %6880 = vpow2.f32 %v1892_v12  ;;  %6488 = vmatpush3.msra.mxu0 %v1907_v13  ;;  %v7502_v12 = vsub.s32 3, %v7280_v32 }
 0x7c2   : > { %6497 = vmatprep.subr.bf16.mxu0 %v7009_v5 }
 0x7c4   : > { %v2300_v14 = vpop.permute.xlu0 %2299 }
 0x7c5   : > { %6516 = vmatpush3.msra.mxu1 %v2300_v14 }
 0x7c6   : > { %6525 = vmatprep.subr.bf16.mxu1 %v7009_v5 }
 0x7cb   : > { %v6881_v15 = vpop.eup %6880 }
 0x7cc   : > { %v1896_v16 = vsel %vm1105_vm3, %v6881_v15, 0.0 }
 0x7cd   : > { %1897 = vadd.xlane.f32.xlu1 %v1896_v16 }
 0x85a   : > { %v1898_v17 = vpop.xlane.xlu1 %1897 }
 0x85b   : > { %6882 = vrcp.f32 %v1898_v17 }
 0x865   : > { %v6883_v45 = vpop.eup %6882 }
 0x866   : > { %v1903_v18 = vmul.f32 %v6883_v45, %v6881_v15 }
 0x868   : > { %6490 = vmatmul.mubr.msk.f32.vlgmr.msra.gmra.mrb[16].mxu0 %vm1105_vm3, %v1903_v18 }
 0x869   : > { %6501 = vmatprep.mubr.msk.bf16.mxu0 %vm7010_vm0, %v7009_v5  ;;  %6498 = vmatpush3.bf16.msra.mxu0 %v6751_v31 }
 0x86a   : > { %6499 = vmatprep.subr.bf16.mxu0 %v7009_v5 }
 0x86d   : > { %6500 = vmatpush3.bf16.msra.mxu0 %v6752_v33 }
 0x86e   : > { %v2054_v19 = vpop.f32.mrb[20].mxu1  ;;  %6520 = vmatprep.subr.mxu0 %v7009_v5 }
 0x86f   : > { %v6496_v20 = vpop.f32.mrb[21].mxu1 }
 0x872   : > { %v2191_v21 = vpop.f32.mrb[22].mxu1 }
 0x873   : > { %v2273_v22 = vmul.f32 0.17677669, %v2191_v21  ;;  %v6509_v23 = vpop.f32.mrb[23].mxu1  ;;  %v6937_v21 = vld [vmem:[%s8004_s13 + $0x8] sm:$0xff] }
 0x874   : > { %v6755_v23 = vld [vmem:[%s7198_s30] ss:$8 sps:$4 sm:$0xff]  }
 0x875   : > { %v2275_v24 = vadd.f32 %v2273_v22, %v7336_v63 }
 0x876   : > { %v2269_v25 = vpop.f32.mrb[24].mxu1 }
 0x877   : > { %v2274_v26 = vmul.f32 0.17677669, %v2269_v25  ;;  %v6514_v27 = vpop.f32.mrb[25].mxu1  ;;  %v2277_v28 = vsel %vm1105_vm3, %v2275_v24, -inf  ;;  %v6760_v25 = vld [vmem:[%s7198_s30 + $0x14] ss:$8 sps:$4 sm:$0xff]  }
 0x878   : > { %2278 = vmax.xlane.f32.xlu1 %v2277_v28  ;;  %v6758_v27 = vld [vmem:[%s7198_s30 + $0x10] ss:$8 sps:$4 sm:$0xff]   ;;  %v6764_v28 = vld [vmem:[%s7198_s30 + $0x24] ss:$8 sps:$4 sm:$0xff]  }
 0x879   : > { %v2276_v29 = vadd.f32 %v2274_v26, %v7338_v6  ;;  %v6761_v26 = vld [vmem:[%s7188_s24] sm:$0xff]  }
 0x87b   : > { %v2280_v30 = vsel %vm1105_vm3, %v2276_v29, -inf }
 0x87c   : > { %2281 = vmax.xlane.f32.xlu1 %v2280_v30 }
 0x905   : > { %v2279_v63 = vpop.xlane.xlu1 %2278 }
 0x906   : > { %v2283_v34 = vsub.f32 %v2275_v24, %v2279_v63  ;;  %v6757_v24 = vld [vmem:[%s7198_s30 + $0x4] ss:$8 sps:$4 sm:$0xff]  }
 0x908   : > { %v2285_v36 = vmul.f32 1.442695, %v2283_v34 }
 0x909   : > { %v2282_v38 = vpop.xlane.xlu1 %2281 }
 0x90a   : > { %6884 = vpow2.f32 %v2285_v36  ;;  %v2284_v39 = vsub.f32 %v2276_v29, %v2282_v38  ;;  %v6762_v29 = vld [vmem:[%s7198_s30 + $0x20] ss:$8 sps:$4 sm:$0xff]  }
 0x90c   : > { %v2287_v41 = vmul.f32 1.442695, %v2284_v39 }
 0x90e   : > { %6886 = vpow2.f32 %v2287_v41  ;;  %v6765_v41 = vld [vmem:[%s7188_s24 + $0x8] sm:$0xff]  }
 0x914   : > { %v6885_v6 = vpop.eup %6884 }
 0x915   : > { %v2289_v42 = vsel %vm1105_vm3, %v6885_v6, 0.0 }
 0x916   : > { %2290 = vadd.xlane.f32.xlu1 %v2289_v42  ;;  %v6766_v42 = vld [vmem:[%s7198_s30 + $0x30] ss:$8 sps:$4 sm:$0xff]  }
 0x918   : > { %v6887_v43 = vpop.eup %6886 }
 0x919   : > { %v2292_v44 = vsel %vm1105_vm3, %v6887_v43, 0.0 }
 0x91a   : > { %2293 = vadd.xlane.f32.xlu1 %v2292_v44  ;;  %v6772_v44 = vld [vmem:[%s7198_s30 + $0x44] ss:$8 sps:$4 sm:$0xff]  }
 0x92b   : > { %2375 = vrot.lane.b32.xlu1 %v7329_v57, %s7014_s21 }
 0x93b   : > { %v1978_v46 = vpop.f32.mrb[16].mxu0 }
 0x93c   : > { %v2058_v47 = vpack.c.bf16 %v2054_v19, %v1978_v46  ;;  %v6491_v51 = vpop.f32.mrb[17].mxu0  ;;  %v6936_v19 = vld [vmem:[%s8004_s13] sm:$0xff] }
 0x93d   : > { %v6770_v46 = vld [vmem:[%s7198_s30 + $0x40] ss:$8 sps:$4 sm:$0xff]   ;;  %v6776_v51 = vld [vmem:[%s7198_s30 + $0x54] ss:$8 sps:$4 sm:$0xff]  }
 0x93e   : > { %6502 = vmatmul.mubr.msk.bf16.vlgmr.msra.gmra.mrb[20].mxu0 %vm948_vm1, %v2058_v47  ;;  %v6773_v47 = vld [vmem:[%s7188_s24 + $0x18] sm:$0xff]  }
 0x93f   : > { %6522 = vmatprep.mubr.msk.f32.mxu0 %vm7010_vm0, %v7009_v5 }
 0x9a3   : > { %v2291_v53 = vpop.xlane.xlu1 %2290 }
 0x9a4   : > { %6888 = vrcp.f32 %v2291_v53  ;;  %v6774_v53 = vld [vmem:[%s7198_s30 + $0x50] ss:$8 sps:$4 sm:$0xff]  }
 0x9a7   : > { %v2294_v55 = vpop.xlane.xlu1 %2293 }
 0x9a8   : > { %6890 = vrcp.f32 %v2294_v55  ;;  %v6777_v55 = vld [vmem:[%s7188_s24 + $0x20] sm:$0xff]  }
 0x9ab   : > { %v2376_v56 = vpop.permute.xlu1 %2375 }
 0x9ac   : > { %6521 = vmatpush3.msra.mxu0 %v2376_v56  ;;  %v6780_v56 = vld [vmem:[%s7198_s30 + $0x64] ss:$8 sps:$4 sm:$0xff]  }
 0x9ad   : > { %6533 = vmatprep.subr.bf16.mxu0 %v7009_v5 }
 0x9ae   : > { %v6889_v50 = vpop.eup %6888 }
 0x9af   : > { %v2296_v57 = vmul.f32 %v6889_v50, %v6885_v6  ;;  %v6768_v6 = vld [vmem:[%s7198_s30 + $0x34] ss:$8 sps:$4 sm:$0xff]   ;;  %v6778_v50 = vld [vmem:[%s7198_s30 + $0x60] ss:$8 sps:$4 sm:$0xff]  }
 0x9b1   : > { %6518 = vmatmul.mubr.msk.f32.vlgmr.msra.gmra.mrb[26].mxu1 %vm1105_vm3, %v2296_v57  ;;  %v6781_v57 = vld [vmem:[%s7188_s24 + $0x28] sm:$0xff]  }
 0x9b2   : > { %v6891_v59 = vpop.eup %6890  ;;  %6529 = vmatprep.mubr.msk.bf16.mxu1 %vm7010_vm0, %v7009_v5  ;;  %6526 = vmatpush3.bf16.msra.mxu1 %v6753_v61  ;;  %v6785_v61 = vld [vmem:[%s7188_s24 + $0x30] sm:$0xff]  }
 0x9b3   : > { %v2298_v60 = vmul.f32 %v6891_v59, %v6887_v43  ;;  %6527 = vmatprep.subr.bf16.mxu1 %v7009_v5  ;;  %v6769_v43 = vld [vmem:[%s7188_s24 + $0x10] sm:$0xff]  }
 0x9b4   : > { %v6784_v59 = vld [vmem:[%s7198_s30 + $0x74] ss:$8 sps:$4 sm:$0xff]  }
 0x9b5   : > { %6523 = vmatmul.mubr.msk.f32.vlgmr.msra.gmra.mrb[18].mxu0 %vm1105_vm3, %v2298_v60  ;;  %v6782_v60 = vld [vmem:[%s7198_s30 + $0x70] ss:$8 sps:$4 sm:$0xff]  }
 0x9b6   : > { %6549 = vmatprep.mubr.msk.bf16.mxu0 %vm7010_vm0, %v7009_v5  ;;  %6528 = vmatpush3.bf16.msra.mxu1 %v6754_v62  ;;  %v6786_v62 = vld [vmem:[%s7992_s1] sm:$0xff]  }
 0x9b7   : > { %2765 = vmatprep.subr.bf16.mxu1 %v6757_v24  ;;  %6534 = vmatpush3.bf16.msra.mxu0 %v6761_v26 }
 0x9b8   : > { %6535 = vmatprep.subr.bf16.mxu0 %v7009_v5 }
 0x9bb   : > { %6536 = vmatpush3.bf16.msra.mxu0 %v6765_v41 }
 0x9bc   : > { %6537 = vmatprep.subr.bf16.mxu0 %v7009_v5 }
 0x9bf   : > { %6538 = vmatpush3.bf16.msra.mxu0 %v6769_v43 }
 0x9c0   : > { %6539 = vmatprep.subr.bf16.mxu0 %v7009_v5 }
 0x9c3   : > { %6540 = vmatpush3.bf16.msra.mxu0 %v6773_v47 }
 0x9c4   : > { %6541 = vmatprep.subr.bf16.mxu0 %v7009_v5 }
 0x9c7   : > { %6542 = vmatpush3.bf16.msra.mxu0 %v6777_v55 }
 0x9c8   : > { %6543 = vmatprep.subr.bf16.mxu0 %v7009_v5 }
 0x9cb   : > { %6544 = vmatpush3.bf16.msra.mxu0 %v6781_v57 }
 0x9cc   : > { %6545 = vmatprep.subr.bf16.mxu0 %v7009_v5 }
 0x9cf   : > { %6546 = vmatpush3.bf16.msra.mxu0 %v6785_v61 }
 0x9d0   : > { %6547 = vmatprep.subr.bf16.mxu0 %v7009_v5 }
 0xa11   : > { %v2108_v0 = vpop.f32.mrb[20].mxu0 }
 0xa12   : > { %v2115_v1 = vadd.f32 %v2108_v0, %v7443_v49  ;;  %v6503_v52 = vpop.f32.mrb[21].mxu0  ;;  %v2513_v49 = vrot.slane %v7294_v40, %v7502_v12  ;;  %v6787_v0 = vld [vmem:[%s7188_s24 + $0x38] sm:$0xff]  }
 0xa13   : > { %v2111_v2 = vpop.f32.mrb[22].mxu0  ;;  %6548 = vmatpush3.bf16.msra.mxu0 %v6787_v0 }
 0xa14   : > { %v2116_v3 = vadd.f32 %v2111_v2, %v7445_v58  ;;  %v6504_v7 = vpop.f32.mrb[23].mxu0  ;;  %6553 = vmatprep.subr.mxu0 %v7009_v5 }
 0xa84   : > { %v2371_v8 = vpop.f32.mrb[26].mxu1 }
 0xa85   : > { %v6519_v9 = vpop.f32.mrb[27].mxu1 }
 0xa86   : > { %v7555_v9 = vsub.s32 4, %v7280_v32 }
 0xa88   : > { %v2447_v54 = vpop.f32.mrb[18].mxu0 }
 0xa89   : > { %v2451_v10 = vpack.c.bf16 %v2447_v54, %v2371_v8  ;;  %v6524_v11 = vpop.f32.mrb[19].mxu0 }
 0xa8a   : > { %v2544_v11 = vrot.slane %v7294_v40, %v7555_v9 }
 0xa8b   : > { %6530 = vmatmul.mubr.msk.bf16.vlgmr.msra.gmra.mrb[28].mxu1 %vm948_vm1, %v2451_v10 }
 0xa8c   : > { %2797 = vmatprep.mubr.bf16.mxu1 %v7008_v4  ;;  %2766 = vmatpush1.bf16.msra.mxu1 %v6755_v23 }
 0xa8d   : > { %2767 = vmatprep.subr.bf16.mxu1 %v6760_v25 }
 0xa90   : > { %2768 = vmatpush1.bf16.msra.mxu1 %v6758_v27 }
 0xa91   : > { %2769 = vmatprep.subr.bf16.mxu1 %v6764_v28 }
 0xa94   : > { %2770 = vmatpush1.bf16.msra.mxu1 %v6762_v29 }
 0xa95   : > { %2771 = vmatprep.subr.bf16.mxu1 %v6768_v6 }
 0xa98   : > { %2772 = vmatpush1.bf16.msra.mxu1 %v6766_v42  ;;  %v643_v42 = vld [vmem:[%s7993_s2] sm:$0x3] }
 0xa99   : > { %2773 = vmatprep.subr.bf16.mxu1 %v6772_v44  ;;  %v5948_v43 = vadd.f32 -1.0, %v643_v42 }
 0xa9c   : > { %2774 = vmatpush1.bf16.msra.mxu1 %v6770_v46  ;;  %v645_v46 = vmul.f32 1e+10, %v5948_v43 }
 0xa9d   : > { %2775 = vmatprep.subr.bf16.mxu1 %v6776_v51 }
 0xaa0   : > { %2776 = vmatpush1.bf16.msra.mxu1 %v6774_v53 }
 0xaa1   : > { %2777 = vmatprep.subr.bf16.mxu1 %v6780_v56 }
 0xaa4   : > { %2778 = vmatpush1.bf16.msra.mxu1 %v6778_v50 }
 0xaa5   : > { %2779 = vmatprep.subr.bf16.mxu1 %v6784_v59 }
 0xaa8   : > { %2780 = vmatpush1.bf16.msra.mxu1 %v6782_v60 }
 0xaa9   : > { %6563 = vmatprep.subr.mxu1 %v7009_v5 }
 0xaab   : > { %2798 = vmatmul.mubr.bf16.vlgmr.msra.gmra.mrb[32].mxu1 %v6786_v62 }
 0xaac   : > { %6565 = vmatprep.mubr.msk.f32.mxu1 %vm7010_vm0, %v7009_v5 }
 0xb5e   : > { %v2501_v13 = vpop.f32.mrb[28].mxu1 }
 0xb5f   : > { %v2508_v58 = vadd.f32 %v2501_v13, %v2115_v1  ;;  %v6531_v14 = vpop.f32.mrb[29].mxu1 }
 0xb60   : > { %v2504_v15 = vpop.f32.mrb[30].mxu1 }
 0xb61   : > { %v2514_v16 = vadd.f32 %v2513_v49, %v2508_v58  ;;  %v2509_v17 = vadd.f32 %v2504_v15, %v2116_v3  ;;  %v6532_v45 = vpop.f32.mrb[31].mxu1 }
 0xb63   : > { %v2515_v18 = vadd.f32 %v2513_v49, %v2509_v17  ;;  %v2516_v20 = vadd.f32 %v6936_v19, %v2514_v16  ;;  %v7560_v49 = vsub.s32 5, %v7280_v32  ;;  %v2810_v19 = vsub.s32 7, %v7280_v32 }
 0xb65   : > { %2518 = vadd.xlane.f32.xlu0 %v2516_v20  ;;  %v2517_v22 = vadd.f32 %v6937_v21, %v2515_v18  ;;  %v2550_v15 = vrot.slane %v7294_v40, %v7560_v49  ;;  %v2811_v21 = vrot.slane %v7294_v40, %v2810_v19 }
 0xb67   : > { %2520 = vadd.xlane.f32.xlu1 %v2517_v22 }
 0xb7e   : > { %v2799_v23 = vpop.f32.mrb[32].mxu1 }
 0xb7f   : > { %v7582_v24 = vadd.f32 %v2811_v21, %v2799_v23  ;;  %v2801_v25 = vpop.f32.mrb[33].mxu1 }
 0xb80   : > { %v2803_v27 = vpop.f32.mrb[34].mxu1 }
 0xb81   : > { %v7586_v28 = vadd.f32 %v2811_v21, %v2803_v27  ;;  %v2805_v29 = vpop.f32.mrb[35].mxu1 }
 0xb83   : > { %3251 = vrot.lane.b32.xlu1 %v7586_v28, %s7012_s17 }
 0xbf2   : > { %v2519_v30 = vpop.xlane.xlu0 %2518 }
 0xbf3   : > { %v2523_v31 = vmul.f32 0.0078125, %v2519_v30 }
 0xbf4   : > { %v2521_v33 = vpop.xlane.xlu1 %2520 }
 0xbf5   : > { %v2525_v63 = vsub.f32 %v2516_v20, %v2523_v31  ;;  %v2524_v34 = vmul.f32 0.0078125, %v2521_v33  ;;  %v7575_v20 = vld [vmem:[%s7218_s4 + $0x8] sm:$0x7f]  ;;  %v7598_v31 = vsub.s32 6, %v7280_v32 }
 0xbf7   : > { %v7520_v36 = vsub.f32 %v2517_v22, %v2524_v34  ;;  %v2527_v38 = vmul.f32 %v2525_v63, %v2525_v63  ;;  %v2817_v22 = vrot.slane %v7575_v20, %v7286_v35  ;;  %v2573_v33 = vrot.slane %v7294_v40, %v7598_v31 }
 0xbf8   : > { %v7015_v40 = vmov 1966171168  }
 0xbf9   : > { %2529 = vadd.xlane.f32.xlu0 %v2527_v38  ;;  %v2528_v39 = vmul.f32 %v7520_v36, %v7520_v36  ;;  %v7584_v26 = vadd.f32 %v2817_v22, %v2801_v25  ;;  %v7590_v30 = vadd.f32 %v2817_v22, %v2805_v29  ;;  %v648_v6 = vunpack.c.l.s4 %v7015_v40  ;;  %v3252_v22 = vpop.permute.xlu1 %3251 }
 0xbfb   : > { %6564 = vmatpush3.msra.mxu1 %v7584_v26  ;;  %v649_v44 = vunpack.c.0.s8 %v648_v6 }
 0xbfc   : > { %6573 = vmatprep.subr.mxu1 %v7009_v5 }
 0xbfd   : > { %2531 = vadd.xlane.f32.xlu0 %v2528_v39  ;;  %v652_v47 = vsub.s32 %v649_v44, %v7280_v32 }
 0xbff   : > { %v653_v51 = vrot.slane %v645_v46, %v652_v47 }
 0xc01   : > { %v661_v53 = vrot.slane %v653_v51, %v652_v47  ;;  %v654_v55 = vcombine.high %v653_v51, %v653_v51 }
 0xc03   : > { %v7624_v56 = vrot.slane %v661_v53, %v7286_v35  ;;  %v668_v50 = vrot.slane %v654_v55, %v652_v47 }
 0xc05   : > { %v7628_v62 = vrot.slane %v668_v50, %v7286_v35 }
 0xc86   : > { %v2530_v1 = vpop.xlane.xlu0 %2529 }
 0xc87   : > { %v2533_v52 = vmul.f32 0.0078125, %v2530_v1 }
 0xc89   : > { %v2535_v2 = vadd.f32 1e-05, %v2533_v52 }
 0xc8a   : > { %v2532_v3 = vpop.xlane.xlu0 %2531 }
 0xc8b   : > { %6892 = vrsqrt.f32 %v2535_v2  ;;  %v2534_v7 = vmul.f32 0.0078125, %v2532_v3 }
 0xc8d   : > { %v2536_v8 = vadd.f32 1e-05, %v2534_v7 }
 0xc8f   : > { %6894 = vrsqrt.f32 %v2536_v8 }
 0xc95   : > { %v6893_v54 = vpop.eup %6892 }
 0xc96   : > { %v2539_v10 = vmul.f32 %v6893_v54, %v2525_v63 }
 0xc98   : > { %v2545_v14 = vmul.f32 %v2544_v11, %v2539_v10 }
 0xc99   : > { %v6895_v13 = vpop.eup %6894 }
 0xc9a   : > { %v2540_v58 = vmul.f32 %v6895_v13, %v7520_v36  ;;  %v7565_v17 = vadd.f32 %v2550_v15, %v2545_v14 }
 0xc9c   : > { %v2546_v16 = vmul.f32 %v2544_v11, %v2540_v58 }
 0xc9e   : > { %v7567_v45 = vadd.f32 %v2550_v15, %v2546_v16 }
 0xca0   : > { %v2569_v18 = vpack.c.bf16 %v7567_v45, %v7565_v17 }
 0xca2   : > { %6550 = vmatmul.mubr.bf16.vlgmr.msra.gmra.mrb[24].mxu0 %v2569_v18 }
 0xca3   : > { %6555 = vmatprep.mubr.msk.f32.mxu0 %vm7010_vm0, %v7009_v5  ;;  %6554 = vmatpush3.xpose.msk.msra.mxu0 %vm948_vm1, %v7582_v24 }
 0xca4   : > { %6558 = vmatprep.subr.mxu0 %v7009_v5 }
 0xd75   : > { %v2656_v63 = vpop.f32.mrb[24].mxu0 }
 0xd76   : > { %v7602_v34 = vadd.f32 %v2656_v63, %v2573_v33  ;;  %v6551_v36 = vpop.f32.mrb[25].mxu0 }
 0xd77   : > { %v2659_v38 = vpop.f32.mrb[26].mxu0 }
 0xd78   : > { %v6552_v39 = vpop.f32.mrb[27].mxu0  ;;  %6556 = vmatmul.mubr.msk.f32.vlgmr.msra.gmra.mrb[28].mxu0 %vm948_vm1, %v7602_v34  ;;  %v7610_v41 = vadd.f32 %v2659_v38, %v2573_v33 }
 0xd79   : > { %6559 = vmatpush3.xpose.msk.msra.mxu0 %vm948_vm1, %v7586_v28  ;;  %6560 = vmatprep.mubr.msk.f32.mxu0 %vm7010_vm0, %v7009_v5 }
 0xd7a   : > { %6568 = vmatprep.subr.mxu0 %v7009_v5 }
 0xd7c   : > { %6561 = vmatmul.mubr.msk.f32.vlgmr.msra.gmra.mrb[30].mxu0 %vm948_vm1, %v7610_v41 }
 0xd7d   : > { %6569 = vmatpush3.msra.mxu0 %v7590_v30  ;;  %6570 = vmatprep.mubr.msk.f32.mxu0 %vm7010_vm0, %v7009_v5 }
 0xd7e   : > { %6578 = vmatprep.subr.mxu0 %v7009_v5 }
 0xe4b   : > { %v2908_v57 = vpop.f32.mrb[28].mxu0 }
 0xe4c   : > { %v2988_v59 = vmul.f32 0.17677669, %v2908_v57  ;;  %v6557_v60 = vpop.f32.mrb[29].mxu0 }
 0xe4e   : > { %v3000_v61 = vadd.f32 %v7624_v56, %v2988_v59 }
 0xe4f   : > { %v2984_v0 = vpop.f32.mrb[30].mxu0 }
 0xe50   : > { %v2989_v1 = vmul.f32 0.17677669, %v2984_v0  ;;  %v6562_v52 = vpop.f32.mrb[31].mxu0  ;;  %v3002_v2 = vsel %vm1105_vm3, %v3000_v61, -inf }
 0xe51   : > { %3003 = vmax.xlane.f32.xlu0 %v3002_v2 }
 0xe52   : > { %v3001_v3 = vadd.f32 %v7628_v62, %v2989_v1 }
 0xe54   : > { %v3005_v7 = vsel %vm1105_vm3, %v3001_v3, -inf }
 0xe55   : > { %3006 = vmax.xlane.f32.xlu0 %v3005_v7 }
 0xe6b   : > { %3173 = vrot.lane.b32.xlu0 %v7582_v24, %s7012_s17 }
 0xede   : > { %v3004_v8 = vpop.xlane.xlu0 %3003 }
 0xedf   : > { %v3008_v54 = vsub.f32 %v3000_v61, %v3004_v8 }
 0xee1   : > { %v3010_v10 = vmul.f32 1.442695, %v3008_v54 }
 0xee2   : > { %v3007_v11 = vpop.xlane.xlu0 %3006 }
 0xee3   : > { %6896 = vpow2.f32 %v3010_v10  ;;  %v3009_v13 = vsub.f32 %v3001_v3, %v3007_v11 }
 0xee5   : > { %v3012_v58 = vmul.f32 1.442695, %v3009_v13 }
 0xee6   : > { %v3174_v21 = vpop.permute.xlu0 %3173 }
 0xee7   : > { %6898 = vpow2.f32 %v3012_v58 }
 0xeed   : > { %v6897_v14 = vpop.eup %6896 }
 0xeee   : > { %v3014_v15 = vsel %vm1105_vm3, %v6897_v14, 0.0 }
 0xeef   : > { %3015 = vadd.xlane.f32.xlu0 %v3014_v15 }
 0xef1   : > { %v6899_v16 = vpop.eup %6898 }
 0xef2   : > { %v3017_v18 = vsel %vm1105_vm3, %v6899_v16, 0.0 }
 0xef3   : > { %3018 = vadd.xlane.f32.xlu1 %v3017_v18 }
 0xf04   : > { %3171 = vrot.lane.b32.xlu1 %v7602_v34, %s7012_s17 }
 0xf05   : > { %3249 = vrot.lane.b32.xlu0 %v7610_v41, %s7012_s17 }
 0xf7c   : > { %v3016_v23 = vpop.xlane.xlu0 %3015 }
 0xf7d   : > { %6900 = vrcp.f32 %v3016_v23 }
 0xf80   : > { %v3019_v25 = vpop.xlane.xlu1 %3018  ;;  %v3250_v38 = vpop.permute.xlu0 %3249 }
 0xf81   : > { %6902 = vrcp.f32 %v3019_v25  ;;  %v6791_v25 = vld [vmem:[%s8026_s29 + $0x18] sm:$0xff]  }
 0xf84   : > { %v3172_v36 = vpop.permute.xlu1 %3171 }
 0xf87   : > { %v6901_v27 = vpop.eup %6900 }
 0xf88   : > { %v3021_v29 = vmul.f32 %v6901_v27, %v6897_v14  ;;  %v6789_v27 = vld [vmem:[%s8026_s29 + $0x8] sm:$0xff]  }
 0xf8a   : > { %6566 = vmatmul.mubr.msk.f32.vlgmr.msra.gmra.mrb[36].mxu1 %vm1105_vm3, %v3021_v29 }
 0xf8b   : > { %v6903_v33 = vpop.eup %6902  ;;  %6574 = vmatpush3.xpose.msk.msra.mxu1 %vm948_vm1, %v3174_v21  ;;  %6575 = vmatprep.mubr.msk.f32.mxu1 %vm7010_vm0, %v7009_v5 }
 0xf8c   : > { %v3023_v63 = vmul.f32 %v6903_v33, %v6899_v16  ;;  %6583 = vmatprep.subr.mxu1 %v7009_v5  ;;  %v6790_v16 = vld [vmem:[%s8026_s29 + $0x10] sm:$0xff]  }
 0xf8e   : > { %6571 = vmatmul.mubr.msk.f32.vlgmr.msra.gmra.mrb[32].mxu0 %vm1105_vm3, %v3023_v63  ;;  %6576 = vmatmul.mubr.msk.f32.vlgmr.msra.gmra.mrb[38].mxu1 %vm948_vm1, %v3172_v36 }
 0xf8f   : > { %6579 = vmatpush3.xpose.msk.msra.mxu0 %vm948_vm1, %v3252_v22  ;;  %6580 = vmatprep.mubr.msk.f32.mxu0 %vm7010_vm0, %v7009_v5  ;;  %v6788_v22 = vld [vmem:[%s8026_s29] sm:$0xff]  }
 0xf90   : > { %6588 = vmatprep.subr.mxu0 %v7009_v5  ;;  %6585 = vmatprep.mubr.msk.f32.mxu1 %vm7010_vm0, %v7009_v5 }
 0xf92   : > { %6581 = vmatmul.mubr.msk.f32.vlgmr.msra.gmra.mrb[34].mxu0 %vm948_vm1, %v3250_v38 }
 0xf93   : > { %6590 = vmatprep.mubr.msk.f32.mxu0 %vm7010_vm0, %v7009_v5 }
0x105d   : > { %v7657_v39 = vpop.f32.mrb[36].mxu1 }
0x105e   : > { %v6567_v40 = vpop.f32.mrb[37].mxu1 }
0x1061   : > { %v7659_v6 = vpop.f32.mrb[32].mxu0  ;;  %v3245_v42 = vpop.f32.mrb[38].mxu1 }
0x1062   : > { %v3170_v43 = vpack.c.bf16 %v7659_v6, %v7657_v39  ;;  %v3327_v44 = vmul.f32 0.17677669, %v3245_v42  ;;  %v6572_v46 = vpop.f32.mrb[33].mxu0  ;;  %v6577_v47 = vpop.f32.mrb[39].mxu1 }
0x1064   : > { %v3329_v51 = vadd.f32 %v3327_v44, %v7624_v56 }
0x1065   : > { %v3323_v53 = vpop.f32.mrb[34].mxu0 }
0x1066   : > { %v3328_v55 = vmul.f32 0.17677669, %v3323_v53  ;;  %v6582_v50 = vpop.f32.mrb[35].mxu0  ;;  %v3331_v57 = vsel %vm1105_vm3, %v3329_v51, -inf }
0x1067   : > { %3332 = vmax.xlane.f32.xlu1 %v3331_v57 }
0x1068   : > { %v3330_v59 = vadd.f32 %v3328_v55, %v7628_v62 }
0x106a   : > { %v3334_v60 = vsel %vm1105_vm3, %v3330_v59, -inf }
0x106b   : > { %3335 = vmax.xlane.f32.xlu0 %v3334_v60 }
0x10f4   : > { %v3333_v61 = vpop.xlane.xlu1 %3332 }
0x10f5   : > { %v3337_v0 = vsub.f32 %v3329_v51, %v3333_v61 }
0x10f7   : > { %v3339_v1 = vmul.f32 1.442695, %v3337_v0 }
0x10f8   : > { %v3336_v52 = vpop.xlane.xlu0 %3335 }
0x10f9   : > { %6904 = vpow2.f32 %v3339_v1  ;;  %v3338_v2 = vsub.f32 %v3330_v59, %v3336_v52 }
0x10fb   : > { %v3341_v3 = vmul.f32 1.442695, %v3338_v2 }
0x10fd   : > { %6906 = vpow2.f32 %v3341_v3 }
0x1103   : > { %v6905_v7 = vpop.eup %6904 }
0x1104   : > { %v3343_v8 = vsel %vm1105_vm3, %v6905_v7, 0.0 }
0x1105   : > { %3344 = vadd.xlane.f32.xlu0 %v3343_v8 }
0x1107   : > { %v6907_v54 = vpop.eup %6906 }
0x1108   : > { %v3346_v10 = vsel %vm1105_vm3, %v6907_v54, 0.0 }
0x1109   : > { %3347 = vadd.xlane.f32.xlu1 %v3346_v10 }
0x111a   : > { %3431 = vrot.lane.b32.xlu1 %v7590_v30, %s7012_s17 }
0x111b   : > { %3354 = vrot.lane.b32.xlu0 %v7584_v26, %s7012_s17 }
0x111e   : > { %3700 = vrot.lane.b32.xlu1 %v7586_v28, %s7013_s15 }
0x111f   : > { %3698 = vrot.lane.b32.xlu0 %v7610_v41, %s7013_s15 }
0x1122   : > { %3622 = vrot.lane.b32.xlu1 %v7582_v24, %s7013_s15 }
0x1123   : > { %3620 = vrot.lane.b32.xlu0 %v7602_v34, %s7013_s15 }
0x1192   : > { %v3345_v11 = vpop.xlane.xlu0 %3344 }
0x1193   : > { %6908 = vrcp.f32 %v3345_v11 }
0x1196   : > { %v3348_v13 = vpop.xlane.xlu1 %3347  ;;  %v3355_v58 = vpop.permute.xlu0 %3354 }
0x1197   : > { %6910 = vrcp.f32 %v3348_v13  ;;  %6584 = vmatpush3.msra.mxu1 %v3355_v58 }
0x1198   : > { %6593 = vmatprep.subr.bf16.mxu1 %v7009_v5 }
0x119a   : > { %v3432_v14 = vpop.permute.xlu1 %3431  ;;  %v3699_v33 = vpop.permute.xlu0 %3698 }
0x119b   : > { %6589 = vmatpush3.msra.mxu0 %v3432_v14 }
0x119c   : > { %6601 = vmatprep.subr.bf16.mxu0 %v7009_v5 }
0x119d   : > { %v6909_v15 = vpop.eup %6908 }
0x119e   : > { %v3350_v18 = vmul.f32 %v6909_v15, %v6905_v7  ;;  %v3701_v29 = vpop.permute.xlu1 %3700  ;;  %v3621_v44 = vpop.permute.xlu0 %3620 }
0x11a0   : > { %6586 = vmatmul.mubr.msk.f32.vlgmr.msra.gmra.mrb[40].mxu1 %vm1105_vm3, %v3350_v18 }
0x11a1   : > { %v6911_v21 = vpop.eup %6910  ;;  %6594 = vmatpush3.bf16.msra.mxu1 %v6790_v16  ;;  %6597 = vmatprep.mubr.msk.bf16.mxu1 %vm7010_vm0, %v7009_v5 }
0x11a2   : > { %v3352_v23 = vmul.f32 %v6911_v21, %v6907_v54  ;;  %6595 = vmatprep.subr.bf16.mxu1 %v7009_v5  ;;  %v3623_v6 = vpop.permute.xlu1 %3622 }
0x11a4   : > { %6591 = vmatmul.mubr.msk.f32.vlgmr.msra.gmra.mrb[36].mxu0 %vm1105_vm3, %v3352_v23 }
0x11a5   : > { %6602 = vmatpush3.bf16.msra.mxu0 %v6788_v22  ;;  %6605 = vmatprep.mubr.msk.bf16.mxu0 %vm7010_vm0, %v7009_v5 }
0x11a6   : > { %6603 = vmatprep.subr.bf16.mxu0 %v7009_v5  ;;  %6596 = vmatpush3.bf16.msra.mxu1 %v6791_v25 }
0x11a7   : > { %6609 = vmatprep.subr.mxu1 %v7009_v5 }
0x11a9   : > { %6604 = vmatpush3.bf16.msra.mxu0 %v6789_v27 }
0x11aa   : > { %6614 = vmatprep.subr.mxu0 %v7009_v5 }
0x11ac   : > { %6606 = vmatmul.mubr.msk.bf16.vlgmr.msra.gmra.mrb[40].mxu0 %vm948_vm1, %v3170_v43 }
0x11ad   : > { %6616 = vmatprep.mubr.msk.f32.mxu0 %vm7010_vm0, %v7009_v5 }
0x11b2   : > { %6615 = vmatpush3.xpose.msk.msra.mxu0 %vm948_vm1, %v3701_v29 }
0x11b3   : > { %6624 = vmatprep.subr.mxu0 %v7009_v5 }
0x11b5   : > { %6617 = vmatmul.mubr.msk.f32.vlgmr.msra.gmra.mrb[38].mxu0 %vm948_vm1, %v3699_v33 }
0x11b6   : > { %6626 = vmatprep.mubr.msk.f32.mxu0 %vm7010_vm0, %v7009_v5 }
0x1273   : > { %v3426_v63 = vpop.f32.mrb[40].mxu1 }
0x1274   : > { %v6587_v36 = vpop.f32.mrb[41].mxu1 }
0x1277   : > { %v3503_v38 = vpop.f32.mrb[36].mxu0 }
0x1278   : > { %v3507_v39 = vpack.c.bf16 %v3503_v38, %v3426_v63  ;;  %v6592_v40 = vpop.f32.mrb[37].mxu0 }
0x127a   : > { %6598 = vmatmul.mubr.msk.bf16.vlgmr.msra.gmra.mrb[44].mxu1 %vm948_vm1, %v3507_v39 }
0x127b   : > { %6610 = vmatpush3.xpose.msk.msra.mxu1 %vm948_vm1, %v3623_v6  ;;  %6611 = vmatprep.mubr.msk.f32.mxu1 %vm7010_vm0, %v7009_v5 }
0x127c   : > { %6619 = vmatprep.subr.mxu1 %v7009_v5 }
0x127f   : > { %v3613_v42 = vpop.f32.mrb[40].mxu0 }
0x1280   : > { %v6607_v43 = vpop.f32.mrb[41].mxu0 }
0x1281   : > { %v3616_v46 = vpop.f32.mrb[42].mxu0 }
0x1282   : > { %v6608_v47 = vpop.f32.mrb[43].mxu0  ;;  %6612 = vmatmul.mubr.msk.f32.vlgmr.msra.gmra.mrb[42].mxu1 %vm948_vm1, %v3621_v44 }
0x1283   : > { %6621 = vmatprep.mubr.msk.f32.mxu1 %vm7010_vm0, %v7009_v5 }
0x1288   : > { %v3772_v51 = vpop.f32.mrb[38].mxu0 }
0x1289   : > { %v3777_v53 = vmul.f32 0.17677669, %v3772_v51  ;;  %v6618_v55 = vpop.f32.mrb[39].mxu0 }
0x128b   : > { %v3779_v50 = vadd.f32 %v3777_v53, %v7628_v62 }
0x128d   : > { %v3783_v57 = vsel %vm1105_vm3, %v3779_v50, -inf }
0x128e   : > { %3784 = vmax.xlane.f32.xlu1 %v3783_v57  ;;  %v6792_v57 = vld [vmem:[%s8026_s29 + $0x20] sm:$0xff]  }
0x129f   : > { %4015 = vrot.lane.b32.xlu1 %v7582_v24, %s7014_s21 }
0x12a3   : > { %4013 = vrot.lane.b32.xlu1 %v7602_v34, %s7014_s21 }
0x12a7   : > { %4091 = vrot.lane.b32.xlu1 %v7610_v41, %s7014_s21 }
0x131b   : > { %v3785_v59 = vpop.xlane.xlu1 %3784 }
0x131c   : > { %v3787_v60 = vsub.f32 %v3779_v50, %v3785_v59  ;;  %v6793_v59 = vld [vmem:[%s8026_s29 + $0x28] sm:$0xff]  }
0x131e   : > { %v3790_v61 = vmul.f32 1.442695, %v3787_v60 }
0x131f   : > { %v4016_v58 = vpop.permute.xlu1 %4015 }
0x1320   : > { %6912 = vpow2.f32 %v3790_v61 }
0x1323   : > { %v4014_v16 = vpop.permute.xlu1 %4013 }
0x1327   : > { %v4092_v18 = vpop.permute.xlu1 %4091 }
0x132a   : > { %v6913_v0 = vpop.eup %6912 }
0x132b   : > { %v3795_v1 = vsel %vm1105_vm3, %v6913_v0, 0.0 }
0x132c   : > { %3796 = vadd.xlane.f32.xlu0 %v3795_v1 }
0x1342   : > { %3878 = vrot.lane.b32.xlu0 %v7590_v30, %s7013_s15 }
0x1346   : > { %4093 = vrot.lane.b32.xlu0 %v7586_v28, %s7014_s21 }
0x134d   : > { %v3557_v24 = vpop.f32.mrb[44].mxu1 }
0x134e   : > { %v7729_v52 = vadd.f32 %v3613_v42, %v3557_v24  ;;  %v6599_v34 = vpop.f32.mrb[45].mxu1 }
0x134f   : > { %v3560_v2 = vpop.f32.mrb[46].mxu1 }
0x1350   : > { %v7731_v41 = vadd.f32 %v3616_v46, %v3560_v2  ;;  %v6600_v3 = vpop.f32.mrb[47].mxu1 }
0x1355   : > { %v3694_v7 = vpop.f32.mrb[42].mxu1 }
0x1356   : > { %v6613_v8 = vpop.f32.mrb[43].mxu1  ;;  %v3776_v54 = vmul.f32 0.17677669, %v3694_v7 }
0x1358   : > { %v3778_v10 = vadd.f32 %v3776_v54, %v7624_v56 }
0x135a   : > { %v3780_v11 = vsel %vm1105_vm3, %v3778_v10, -inf }
0x1365   : > { %3781 = vmax.xlane.f32.xlu0 %v3780_v11 }
0x137b   : > { %3802 = vrot.lane.b32.xlu0 %v7584_v26, %s7013_s15 }
0x137f   : > { %4195 = vrot.lane.b32.xlu0 %v7584_v26, %s7014_s21 }
0x13b9   : > { %v3797_v28 = vpop.xlane.xlu0 %3796 }
0x13ba   : > { %6914 = vrcp.f32 %v3797_v28 }
0x13bd   : > { %v3879_v13 = vpop.permute.xlu0 %3878 }
0x13be   : > { %6625 = vmatpush3.msra.mxu0 %v3879_v13 }
0x13bf   : > { %6637 = vmatprep.subr.mxu0 %v7009_v5 }
0x13c1   : > { %v4094_v26 = vpop.permute.xlu0 %4093 }
0x13c4   : > { %v6915_v14 = vpop.eup %6914 }
0x13c5   : > { %v3801_v15 = vmul.f32 %v6915_v14, %v6913_v0 }
0x13c7   : > { %6627 = vmatmul.mubr.msk.f32.vlgmr.msra.gmra.mrb[44].mxu0 %vm1105_vm3, %v3801_v15  ;;  %v6794_v15 = vld [vmem:[%s8026_s29 + $0x30] sm:$0xff]  }
0x13c8   : > { %6638 = vmatpush3.xpose.msk.msra.mxu0 %vm948_vm1, %v4016_v58  ;;  %6639 = vmatprep.mubr.msk.f32.mxu0 %vm7010_vm0, %v7009_v5 }
0x13c9   : > { %6642 = vmatprep.subr.mxu0 %v7009_v5 }
0x13cb   : > { %6640 = vmatmul.mubr.msk.f32.vlgmr.msra.gmra.mrb[46].mxu0 %vm948_vm1, %v4014_v16  ;;  %v6795_v16 = vld [vmem:[%s8026_s29 + $0x38] sm:$0xff]  }
0x13cc   : > { %6643 = vmatpush3.xpose.msk.msra.mxu0 %vm948_vm1, %v4094_v26  ;;  %6644 = vmatprep.mubr.msk.f32.mxu0 %vm7010_vm0, %v7009_v5 }
0x13cd   : > { %6647 = vmatprep.subr.mxu0 %v7009_v5 }
0x13cf   : > { %6645 = vmatmul.mubr.msk.f32.vlgmr.msra.gmra.mrb[48].mxu0 %vm948_vm1, %v4092_v18 }
0x13d0   : > { %6649 = vmatprep.mubr.msk.f32.mxu0 %vm7010_vm0, %v7009_v5 }
0x13f2   : > { %v3782_v21 = vpop.xlane.xlu0 %3781 }
0x13f3   : > { %v3786_v22 = vsub.f32 %v3778_v10, %v3782_v21 }
0x13f5   : > { %v3788_v23 = vmul.f32 1.442695, %v3786_v22 }
0x13f6   : > { %v3803_v25 = vpop.permute.xlu0 %3802 }
0x13f7   : > { %6916 = vpow2.f32 %v3788_v23  ;;  %6620 = vmatpush3.msra.mxu1 %v3803_v25 }
0x13f8   : > { %6629 = vmatprep.subr.bf16.mxu1 %v7009_v5 }
0x13fa   : > { %v4196_v27 = vpop.permute.xlu0 %4195 }
0x13fb   : > { %6648 = vmatpush3.msra.mxu0 %v4196_v27 }
0x13fc   : > { %6657 = vmatprep.subr.bf16.mxu0 %v7009_v5 }
0x1401   : > { %v6917_v29 = vpop.eup %6916 }
0x1402   : > { %v3792_v33 = vsel %vm1105_vm3, %v6917_v29, 0.0 }
0x1403   : > { %3793 = vadd.xlane.f32.xlu1 %v3792_v33 }
0x1490   : > { %v3794_v63 = vpop.xlane.xlu1 %3793 }
0x1491   : > { %6918 = vrcp.f32 %v3794_v63 }
0x149a   : > { %v3950_v36 = vpop.f32.mrb[44].mxu0 }
0x149b   : > { %v6919_v38 = vpop.eup %6918  ;;  %v6628_v39 = vpop.f32.mrb[45].mxu0 }
0x149c   : > { %v3799_v40 = vmul.f32 %v6919_v38, %v6917_v29 }
0x149e   : > { %6622 = vmatmul.mubr.msk.f32.vlgmr.msra.gmra.mrb[48].mxu1 %vm1105_vm3, %v3799_v40  ;;  %v4087_v6 = vpop.f32.mrb[46].mxu0 }
0x149f   : > { %v4169_v42 = vmul.f32 0.17677669, %v4087_v6  ;;  %v6641_v43 = vpop.f32.mrb[47].mxu0  ;;  %6633 = vmatprep.mubr.msk.bf16.mxu1 %vm7010_vm0, %v7009_v5  ;;  %6630 = vmatpush3.bf16.msra.mxu1 %v6792_v57  ;;  %v4453_v57 = vld [vmem:[%s7203_s5 + $0x28] sm:$0xff] }
0x14a0   : > { %6631 = vmatprep.subr.bf16.mxu1 %v7009_v5 }
0x14a1   : > { %v4171_v44 = vadd.f32 %v4169_v42, %v7624_v56 }
0x14a2   : > { %v4165_v46 = vpop.f32.mrb[48].mxu0 }
0x14a3   : > { %v4170_v47 = vmul.f32 0.17677669, %v4165_v46  ;;  %v6646_v51 = vpop.f32.mrb[49].mxu0  ;;  %v4173_v53 = vsel %vm1105_vm3, %v4171_v44, -inf  ;;  %6632 = vmatpush3.bf16.msra.mxu1 %v6793_v59  ;;  %v4456_v59 = vld [vmem:[%s7203_s5 + $0x40] sm:$0xff] }
0x14a4   : > { %4174 = vmax.xlane.f32.xlu1 %v4173_v53  ;;  %6652 = vmatprep.subr.mxu1 %v7009_v5  ;;  %v4452_v51 = vld [vmem:[%s7203_s5 + $0x20] sm:$0xff]  ;;  %v4449_v53 = vld [vmem:[%s7203_s5 + $0x8] sm:$0xff] }
0x14a5   : > { %v4172_v55 = vadd.f32 %v4170_v47, %v7628_v62  ;;  %v4448_v47 = vld [vmem:[%s7203_s5] sm:$0xff] }
0x14a7   : > { %v4176_v50 = vsel %vm1105_vm3, %v4172_v55, -inf }
0x14a8   : > { %4177 = vmax.xlane.f32.xlu1 %v4176_v50  ;;  %v6071_v50 = vcombine.high %v4448_v47, %v4452_v51 }
0x1531   : > { %v4175_v56 = vpop.xlane.xlu1 %4174 }
0x1532   : > { %v4179_v60 = vsub.f32 %v4171_v44, %v4175_v56  ;;  %v4460_v56 = vld [vmem:[%s7203_s5 + $0x60] sm:$0xff] }
0x1534   : > { %v4181_v61 = vmul.f32 1.442695, %v4179_v60  ;;  %v6072_v60 = vcombine.low %v4449_v53, %v4453_v57 }
0x1535   : > { %v4178_v0 = vpop.xlane.xlu1 %4177 }
0x1536   : > { %6920 = vpow2.f32 %v4181_v61  ;;  %v4180_v1 = vsub.f32 %v4172_v55, %v4178_v0  ;;  %v6070_v55 = vcombine.low %v4448_v47, %v4452_v51  ;;  %v6073_v61 = vcombine.high %v4449_v53, %v4453_v57  ;;  %v4497_v57 = vld [vmem:[%s7203_s5 + $0x188] sm:$0xff] }
0x1537   : > { %v6079_v0 = vcombine.high %v4456_v59, %v4460_v56 }
0x1538   : > { %v4183_v24 = vmul.f32 1.442695, %v4180_v1  ;;  %v4457_v1 = vld [vmem:[%s7203_s5 + $0x48] sm:$0xff] }
0x153a   : > { %6922 = vpow2.f32 %v4183_v24  ;;  %v4461_v24 = vld [vmem:[%s7203_s5 + $0x68] sm:$0xff] }
0x1540   : > { %v6921_v62 = vpop.eup %6920 }
0x1541   : > { %v4185_v34 = vsel %vm1105_vm3, %v6921_v62, 0.0 }
0x1542   : > { %4186 = vadd.xlane.f32.xlu1 %v4185_v34 }
0x1544   : > { %v6923_v2 = vpop.eup %6922 }
0x1545   : > { %v4188_v3 = vsel %vm1105_vm3, %v6923_v2, 0.0 }
0x1546   : > { %4189 = vadd.xlane.f32.xlu1 %v4188_v3 }
0x1557   : > { %4271 = vrot.lane.b32.xlu1 %v7590_v30, %s7014_s21 }
0x1571   : > { %v3874_v7 = vpop.f32.mrb[48].mxu1 }
0x1572   : > { %v3954_v8 = vpack.c.bf16 %v3950_v36, %v3874_v7  ;;  %v6623_v54 = vpop.f32.mrb[49].mxu1 }
0x1574   : > { %6634 = vmatmul.mubr.msk.bf16.vlgmr.msra.gmra.mrb[52].mxu1 %vm948_vm1, %v3954_v8 }
0x1575   : > { %6654 = vmatprep.mubr.msk.f32.mxu1 %vm7010_vm0, %v7009_v5 }
0x15cf   : > { %v4187_v10 = vpop.xlane.xlu1 %4186 }
0x15d0   : > { %6924 = vrcp.f32 %v4187_v10 }
0x15d3   : > { %v4190_v11 = vpop.xlane.xlu1 %4189 }
0x15d4   : > { %6926 = vrcp.f32 %v4190_v11 }
0x15d7   : > { %v4272_v28 = vpop.permute.xlu1 %4271 }
0x15d8   : > { %6653 = vmatpush3.msra.mxu1 %v4272_v28  ;;  %v4464_v28 = vld [vmem:[%s7203_s5 + $0x80] sm:$0xff] }
0x15d9   : > { %5003 = vmatprep.subr.bf16.mxu1 %v6071_v50  ;;  %v4500_v50 = vld [vmem:[%s7203_s5 + $0x1a0] sm:$0xff] }
0x15da   : > { %v6925_v13 = vpop.eup %6924 }
0x15db   : > { %v4192_v58 = vmul.f32 %v6925_v13, %v6921_v62  ;;  %v6078_v62 = vcombine.low %v4456_v59, %v4460_v56  ;;  %v4468_v13 = vld [vmem:[%s7203_s5 + $0xa0] sm:$0xff]  ;;  %v4501_v56 = vld [vmem:[%s7203_s5 + $0x1a8] sm:$0xff] }
0x15dd   : > { %6650 = vmatmul.mubr.msk.f32.vlgmr.msra.gmra.mrb[50].mxu0 %vm1105_vm3, %v4192_v58  ;;  %v4465_v58 = vld [vmem:[%s7203_s5 + $0x88] sm:$0xff] }
0x15de   : > { %v6927_v30 = vpop.eup %6926  ;;  %6661 = vmatprep.mubr.msk.bf16.mxu0 %vm7010_vm0, %v7009_v5  ;;  %6658 = vmatpush3.bf16.msra.mxu0 %v6794_v15  ;;  %v6086_v15 = vcombine.low %v4464_v28, %v4468_v13 }
0x15df   : > { %v4194_v14 = vmul.f32 %v6927_v30, %v6923_v2  ;;  %6659 = vmatprep.subr.bf16.mxu0 %v7009_v5  ;;  %v4409_v5 = vrot.slane %v7575_v20, %v7289_v37  ;;  %v6087_v30 = vcombine.high %v4464_v28, %v4468_v13  ;;  %v4451_v13 = vld [vmem:[%s7203_s5 + $0x18] sm:$0xff] }
0x15e1   : > { %6655 = vmatmul.mubr.msk.f32.vlgmr.msra.gmra.mrb[50].mxu1 %vm1105_vm3, %v4194_v14  ;;  %v4469_v14 = vld [vmem:[%s7203_s5 + $0xa8] sm:$0xff] }
0x15e2   : > { %5035 = vmatprep.mubr.bf16.mxu1 %v7008_v4  ;;  %6660 = vmatpush3.bf16.msra.mxu0 %v6795_v16  ;;  %v6088_v16 = vcombine.low %v4465_v58, %v4469_v14 }
0x15e3   : > { %5046 = vmatprep.subr.bf16.mxu0 %v6073_v61  ;;  %5004 = vmatpush1.bf16.msra.mxu1 %v6070_v55  ;;  %v4496_v55 = vld [vmem:[%s7203_s5 + $0x180] sm:$0xff]  ;;  %v6120_v61 = vcombine.low %v4497_v57, %v4501_v56 }
0x15e4   : > { %5005 = vmatprep.subr.bf16.mxu1 %v6079_v0  ;;  %v6119_v59 = vcombine.high %v4496_v55, %v4500_v50  ;;  %v6121_v0 = vcombine.high %v4497_v57, %v4501_v56  ;;  %v4478_v57 = vld [vmem:[%s7203_s5 + $0xf0] sm:$0xff]  ;;  %v4479_v56 = vld [vmem:[%s7203_s5 + $0xf8] sm:$0xff] }
0x15e7   : > { %5006 = vmatpush1.bf16.msra.mxu1 %v6078_v62 }
0x15e8   : > { %5007 = vmatprep.subr.bf16.mxu1 %v6087_v30 }
0x15eb   : > { %5008 = vmatpush1.bf16.msra.mxu1 %v6086_v15 }
0x1647   : > { %v4004_v26 = vpop.f32.mrb[52].mxu1 }
0x1648   : > { %v4011_v18 = vadd.f32 %v4004_v26, %v7729_v52  ;;  %v6635_v21 = vpop.f32.mrb[53].mxu1  ;;  %v6089_v26 = vcombine.high %v4465_v58, %v4469_v14  ;;  %v4455_v58 = vld [vmem:[%s7203_s5 + $0x38] sm:$0xff] }
0x1649   : > { %v4007_v22 = vpop.f32.mrb[54].mxu1  ;;  %v4476_v21 = vld [vmem:[%s7203_s5 + $0xe0] sm:$0xff]  ;;  %v6076_v30 = vcombine.low %v4451_v13, %v4455_v58  ;;  %v6077_v14 = vcombine.high %v4451_v13, %v4455_v58 }
0x164a   : > { %v4012_v23 = vadd.f32 %v4007_v22, %v7731_v41  ;;  %v6636_v25 = vpop.f32.mrb[55].mxu1  ;;  %v4473_v22 = vld [vmem:[%s7203_s5 + $0xc8] sm:$0xff] }
0x164b   : > { %v4477_v25 = vld [vmem:[%s7203_s5 + $0xe8] sm:$0xff] }
0x16b0   : > { %v4267_v27 = vpop.f32.mrb[50].mxu0 }
0x16b1   : > { %v6651_v29 = vpop.f32.mrb[51].mxu0 }
0x16b2   : > { %v6096_v29 = vcombine.low %v4473_v22, %v4477_v25 }
0x16b4   : > { %v4343_v33 = vpop.f32.mrb[50].mxu1 }
0x16b5   : > { %v4347_v63 = vpack.c.bf16 %v4343_v33, %v4267_v27  ;;  %v6656_v36 = vpop.f32.mrb[51].mxu1  ;;  %v6097_v33 = vcombine.high %v4473_v22, %v4477_v25  ;;  %v4439_v25 = vrot.slane %v7575_v20, %v7305_v48 }
0x16b6   : > { %v4484_v36 = vld [vmem:[%s7203_s5 + $0x120] sm:$0xff] }
0x16b7   : > { %6662 = vmatmul.mubr.msk.bf16.vlgmr.msra.gmra.mrb[52].mxu0 %vm948_vm1, %v4347_v63  ;;  %v4480_v63 = vld [vmem:[%s7203_s5 + $0x100] sm:$0xff] }
0x16b8   : > { %5078 = vmatprep.mubr.bf16.mxu0 %v7008_v4  ;;  %5047 = vmatpush1.bf16.msra.mxu0 %v6072_v60  ;;  %v6118_v60 = vcombine.low %v4496_v55, %v4500_v50  ;;  %v4474_v50 = vld [vmem:[%s7203_s5 + $0xd0] sm:$0xff] }
0x178a   : > { %v4397_v52 = vpop.f32.mrb[52].mxu0 }
0x178b   : > { %v4404_v38 = vadd.f32 %v4397_v52, %v4011_v18  ;;  %v6663_v41 = vpop.f32.mrb[53].mxu0  ;;  %v4472_v18 = vld [vmem:[%s7203_s5 + $0xc0] sm:$0xff]  ;;  %v6103_v52 = vcombine.high %v4480_v63, %v4484_v36 }
0x178c   : > { %v4400_v39 = vpop.f32.mrb[54].mxu0  ;;  %v6094_v27 = vcombine.low %v4472_v18, %v4476_v21  ;;  %v6102_v41 = vcombine.low %v4480_v63, %v4484_v36  ;;  %v4445_v36 = vrot.slane %v7575_v20, %v7502_v12  ;;  %v4470_v20 = vld [vmem:[%s7203_s5 + $0xb0] sm:$0xff] }
0x178d   : > { %v4410_v40 = vadd.f32 %v4409_v5, %v4404_v38  ;;  %v4405_v6 = vadd.f32 %v4400_v39, %v4012_v23  ;;  %v6664_v42 = vpop.f32.mrb[55].mxu0  ;;  %v6095_v23 = vcombine.high %v4472_v18, %v4476_v21  ;;  %v4485_v38 = vld [vmem:[%s7203_s5 + $0x128] sm:$0xff] }
0x178e   : > { %v4492_v42 = vld [vmem:[%s7203_s5 + $0x160] sm:$0xff] }
0x178f   : > { %v4411_v43 = vadd.f32 %v4409_v5, %v4405_v6  ;;  %v4412_v44 = vadd.f32 %v4410_v40, %v7565_v17  ;;  %v6081_v17 = vcombine.high %v4457_v1, %v4461_v24  ;;  %5009 = vmatprep.subr.bf16.mxu1 %v6095_v23  ;;  %v4481_v5 = vld [vmem:[%s7203_s5 + $0x108] sm:$0xff]  ;;  %v4488_v6 = vld [vmem:[%s7203_s5 + $0x140] sm:$0xff] }
0x1790   : > { %5010 = vmatpush1.bf16.msra.mxu1 %v6094_v27  ;;  %v6104_v39 = vcombine.low %v4481_v5, %v4485_v38  ;;  %v6105_v40 = vcombine.high %v4481_v5, %v4485_v38  ;;  %v6110_v47 = vcombine.low %v4488_v6, %v4492_v42  ;;  %v4462_v38 = vld [vmem:[%s7203_s5 + $0x70] sm:$0xff] }
0x1791   : > { %4414 = vadd.xlane.f32.xlu0 %v4412_v44  ;;  %v4413_v46 = vadd.f32 %v4411_v43, %v7567_v45  ;;  %v6080_v45 = vcombine.low %v4457_v1, %v4461_v24  ;;  %5048 = vmatprep.subr.bf16.mxu0 %v6081_v17  ;;  %v4489_v43 = vld [vmem:[%s7203_s5 + $0x148] sm:$0xff]  ;;  %v4504_v1 = vld [vmem:[%s7203_s5 + $0x1c0] sm:$0xff] }
0x1792   : > { %5011 = vmatprep.subr.bf16.mxu1 %v6103_v52  ;;  %v4508_v24 = vld [vmem:[%s7203_s5 + $0x1e0] sm:$0xff]  ;;  %v4505_v17 = vld [vmem:[%s7203_s5 + $0x1c8] sm:$0xff]  ;;  %v4458_v52 = vld [vmem:[%s7203_s5 + $0x50] sm:$0xff] }
0x1793   : > { %4416 = vadd.xlane.f32.xlu1 %v4413_v46  ;;  %5049 = vmatpush1.bf16.msra.mxu0 %v6080_v45  ;;  %v6126_v62 = vcombine.low %v4504_v1, %v4508_v24  ;;  %v6127_v45 = vcombine.high %v4504_v1, %v4508_v24  ;;  %v4482_v24 = vld [vmem:[%s7203_s5 + $0x110] sm:$0xff] }
0x1794   : > { %5050 = vmatprep.subr.bf16.mxu0 %v6089_v26  ;;  %5012 = vmatpush1.bf16.msra.mxu1 %v6102_v41  ;;  %v4459_v41 = vld [vmem:[%s7203_s5 + $0x58] sm:$0xff] }
0x1797   : > { %5051 = vmatpush1.bf16.msra.mxu0 %v6088_v16 }
0x1798   : > { %5052 = vmatprep.subr.bf16.mxu0 %v6097_v33 }
0x179b   : > { %5053 = vmatpush1.bf16.msra.mxu0 %v6096_v29 }
0x179c   : > { %5054 = vmatprep.subr.bf16.mxu0 %v6105_v40 }
0x179f   : > { %5055 = vmatpush1.bf16.msra.mxu0 %v6104_v39  ;;  %v4463_v39 = vld [vmem:[%s7203_s5 + $0x78] sm:$0xff] }
0x181e   : > { %v4415_v34 = vpop.xlane.xlu0 %4414 }
0x181f   : > { %v4418_v2 = vmul.f32 0.0078125, %v4415_v34  ;;  %v4509_v34 = vld [vmem:[%s7203_s5 + $0x1e8] sm:$0xff] }
0x1820   : > { %v4417_v3 = vpop.xlane.xlu1 %4416 }
0x1821   : > { %v7798_v7 = vsub.f32 %v4412_v44, %v4418_v2  ;;  %v4419_v8 = vmul.f32 0.0078125, %v4417_v3  ;;  %v6111_v44 = vcombine.high %v4488_v6, %v4492_v42  ;;  %v4450_v2 = vld [vmem:[%s7203_s5 + $0x10] sm:$0xff]  ;;  %v6083_v42 = vcombine.high %v4458_v52, %v4462_v38 }
0x1822   : > { %v4454_v3 = vld [vmem:[%s7203_s5 + $0x30] sm:$0xff] }
0x1823   : > { %v7800_v54 = vsub.f32 %v4413_v46, %v4419_v8  ;;  %v4422_v10 = vmul.f32 %v7798_v7, %v7798_v7  ;;  %v4493_v46 = vld [vmem:[%s7203_s5 + $0x168] sm:$0xff]  ;;  %5013 = vmatprep.subr.bf16.mxu1 %v6111_v44  ;;  %v6128_v8 = vcombine.low %v4505_v17, %v4509_v34  ;;  %v6075_v28 = vcombine.high %v4450_v2, %v4454_v3  ;;  %v4467_v44 = vld [vmem:[%s7203_s5 + $0x98] sm:$0xff] }
0x1824   : > { %v6112_v51 = vcombine.low %v4489_v43, %v4493_v46  ;;  %v6113_v53 = vcombine.high %v4489_v43, %v4493_v46  ;;  %5014 = vmatpush1.bf16.msra.mxu1 %v6110_v47  ;;  %v4466_v43 = vld [vmem:[%s7203_s5 + $0x90] sm:$0xff]  ;;  %v4471_v46 = vld [vmem:[%s7203_s5 + $0xb8] sm:$0xff]  ;;  %v6082_v47 = vcombine.low %v4458_v52, %v4462_v38 }
0x1825   : > { %4424 = vadd.xlane.f32.xlu0 %v4422_v10  ;;  %v4423_v11 = vmul.f32 %v7800_v54, %v7800_v54  ;;  %5015 = vmatprep.subr.bf16.mxu1 %v6119_v59  ;;  %v6129_v10 = vcombine.high %v4505_v17, %v4509_v34  ;;  %v6093_v55 = vcombine.high %v4467_v44, %v4471_v46  ;;  %v4475_v59 = vld [vmem:[%s7203_s5 + $0xd8] sm:$0xff]  ;;  %v4486_v17 = vld [vmem:[%s7203_s5 + $0x130] sm:$0xff] }
0x1826   : > { %5056 = vmatprep.subr.bf16.mxu0 %v6113_v53  ;;  %v6091_v53 = vcombine.high %v4466_v43, %v4470_v20  ;;  %v6101_v1 = vcombine.high %v4475_v59, %v4479_v56  ;;  %v6098_v34 = vcombine.low %v4474_v50, %v4478_v57  ;;  %v6106_v13 = vcombine.low %v4482_v24, %v4486_v17 }
0x1827   : > { %5057 = vmatpush1.bf16.msra.mxu0 %v6112_v51  ;;  %v6084_v51 = vcombine.low %v4459_v41, %v4463_v39 }
0x1828   : > { %5058 = vmatprep.subr.bf16.mxu0 %v6121_v0  ;;  %5016 = vmatpush1.bf16.msra.mxu1 %v6118_v60  ;;  %v6090_v60 = vcombine.low %v4466_v43, %v4470_v20  ;;  %v6099_v0 = vcombine.high %v4474_v50, %v4478_v57  ;;  %v6798_v43 = vld [vmem:[%s7213_s18] sm:$0xff]   ;;  %v6806_v50 = vld [vmem:[%s7213_s18 + $0x10] sm:$0xff]  }
0x1829   : > { %4426 = vadd.xlane.f32.xlu0 %v4423_v11  ;;  %v6074_v11 = vcombine.low %v4450_v2, %v4454_v3  ;;  %5017 = vmatprep.subr.bf16.mxu1 %v6127_v45  ;;  %v4487_v45 = vld [vmem:[%s7203_s5 + $0x138] sm:$0xff]  ;;  %v6107_v2 = vcombine.high %v4482_v24, %v4486_v17  ;;  %v6799_v20 = vld [vmem:[%s7213_s18 + $0x80] sm:$0xff]   ;;  %v6807_v57 = vld [vmem:[%s7213_s18 + $0x90] sm:$0xff]  }
0x182a   : > { %v6815_v24 = vld [vmem:[%s7213_s18 + $0xa0] sm:$0xff]   ;;  %v6816_v17 = vld [vmem:[%s7213_s18 + $0x68] sm:$0xff]  }
0x182b   : > { %5059 = vmatpush1.bf16.msra.mxu0 %v6120_v61  ;;  %v6092_v61 = vcombine.low %v4467_v44, %v4471_v46  ;;  %v6800_v44 = vld [vmem:[%s7213_s18 + $0x48] sm:$0xff]  }
0x182c   : > { %5060 = vmatprep.subr.bf16.mxu0 %v6129_v10  ;;  %5018 = vmatpush1.bf16.msra.mxu1 %v6126_v62  ;;  %v4483_v62 = vld [vmem:[%s7203_s5 + $0x118] sm:$0xff]  ;;  %v4494_v10 = vld [vmem:[%s7203_s5 + $0x170] sm:$0xff]  ;;  %v6801_v46 = vld [vmem:[%s7213_s18 + $0xc8] sm:$0xff]  }
0x182d   : > { %5089 = vmatprep.subr.bf16.mxu1 %v6075_v28  ;;  %v6109_v3 = vcombine.high %v4483_v62, %v4487_v45  ;;  %v4495_v28 = vld [vmem:[%s7203_s5 + $0x178] sm:$0xff]  ;;  %v6108_v58 = vcombine.low %v4483_v62, %v4487_v45  ;;  %v6817_v62 = vld [vmem:[%s7213_s18 + $0xe8] sm:$0xff]  }
0x182e   : > { %v6818_v45 = vld [vmem:[%s7213_s18 + $0x28] sm:$0xff]  }
0x182f   : > { %5061 = vmatpush1.bf16.msra.mxu0 %v6128_v8  ;;  %v4490_v8 = vld [vmem:[%s7203_s5 + $0x150] sm:$0xff] }
0x1830   : > { %5132 = vmatprep.subr.bf16.mxu0 %v6077_v14 }
0x18b2   : > { %v4425_v15 = vpop.xlane.xlu0 %4424 }
0x18b3   : > { %v4428_v16 = vmul.f32 0.0078125, %v4425_v15  ;;  %v4498_v15 = vld [vmem:[%s7203_s5 + $0x190] sm:$0xff] }
0x18b5   : > { %v4430_v26 = vadd.f32 1e-05, %v4428_v16  ;;  %v4502_v16 = vld [vmem:[%s7203_s5 + $0x1b0] sm:$0xff] }
0x18b6   : > { %v4427_v18 = vpop.xlane.xlu0 %4426 }
0x18b7   : > { %6928 = vrsqrt.f32 %v4430_v26  ;;  %v4429_v21 = vmul.f32 0.0078125, %v4427_v18  ;;  %v4499_v26 = vld [vmem:[%s7203_s5 + $0x198] sm:$0xff] }
0x18b8   : > { %v4503_v18 = vld [vmem:[%s7203_s5 + $0x1b8] sm:$0xff] }
0x18b9   : > { %v4431_v22 = vadd.f32 1e-05, %v4429_v21  ;;  %v6114_v21 = vcombine.low %v4490_v8, %v4494_v10 }
0x18bb   : > { %6930 = vrsqrt.f32 %v4431_v22 }
0x18c1   : > { %v6929_v23 = vpop.eup %6928 }
0x18c2   : > { %v4434_v27 = vmul.f32 %v6929_v23, %v7798_v7  ;;  %v6123_v23 = vcombine.high %v4498_v15, %v4502_v16 }
0x18c4   : > { %v4440_v63 = vmul.f32 %v4439_v25, %v4434_v27  ;;  %v4506_v27 = vld [vmem:[%s7203_s5 + $0x1d0] sm:$0xff] }
0x18c5   : > { %v6931_v29 = vpop.eup %6930 }
0x18c6   : > { %v4435_v33 = vmul.f32 %v6931_v29, %v7800_v54  ;;  %v7844_v40 = vadd.f32 %v4445_v36, %v4440_v63  ;;  %v6085_v54 = vcombine.high %v4459_v41, %v4463_v39  ;;  %v4510_v29 = vld [vmem:[%s7203_s5 + $0x1f0] sm:$0xff]  ;;  %v4511_v63 = vld [vmem:[%s7203_s5 + $0x1f8] sm:$0xff] }
0x18c7   : > { %v6131_v52 = vcombine.high %v4506_v27, %v4510_v29  ;;  %v6130_v41 = vcombine.low %v4506_v27, %v4510_v29 }
0x18c8   : > { %v4441_v5 = vmul.f32 %v4439_v25, %v4435_v33  ;;  %v6125_v25 = vcombine.high %v4499_v26, %v4503_v18  ;;  %v4507_v33 = vld [vmem:[%s7203_s5 + $0x1d8] sm:$0xff] }
0x18c9   : > { %v6133_v38 = vcombine.high %v4507_v33, %v4511_v63  ;;  %v6132_v39 = vcombine.low %v4507_v33, %v4511_v63 }
0x18ca   : > { %v7846_v6 = vadd.f32 %v4445_v36, %v4441_v5  ;;  %v6122_v36 = vcombine.low %v4498_v15, %v4502_v16  ;;  %v6124_v5 = vcombine.low %v4499_v26, %v4503_v18 }
0x18cc   : > { %v7850_v7 = vpack.c.bf16 %v7846_v6, %v7844_v40 }
0x18ce   : > { %5036 = vmatmul.mubr.bf16.vlgmr.msra.gmra.mrb[56].mxu1 %v7850_v7  ;;  %5079 = vmatmul.mubr.bf16.vlgmr.msra.gmra.mrb[56].mxu0 %v7850_v7 }
0x18cf   : > { %5090 = vmatpush1.bf16.msra.mxu1 %v6074_v11  ;;  %5133 = vmatpush1.bf16.msra.mxu0 %v6076_v30  ;;  %v4491_v11 = vld [vmem:[%s7203_s5 + $0x158] sm:$0xff]  ;;  %v6115_v30 = vcombine.high %v4490_v8, %v4494_v10  ;;  %v6823_v8 = vld [vmem:[%s7213_s18 + $0xb0] sm:$0xff]  }
0x18d0   : > { %5091 = vmatprep.subr.bf16.mxu1 %v6083_v42  ;;  %5134 = vmatprep.subr.bf16.mxu0 %v6085_v54  ;;  %v6117_v14 = vcombine.high %v4491_v11, %v4495_v28  ;;  %v6116_v22 = vcombine.low %v4491_v11, %v4495_v28  ;;  %v6796_v42 = vld [vmem:[%s7213_s18 + $0x40] sm:$0xff]   ;;  %v6824_v10 = vld [vmem:[%s7213_s18 + $0x78] sm:$0xff]  }
0x18d1   : > { %5121 = vmatprep.mubr.bf16.mxu1 %v7008_v4  ;;  %5164 = vmatprep.mubr.bf16.mxu0 %v7008_v4  ;;  %v6100_v4 = vcombine.low %v4475_v59, %v4479_v56  ;;  %v6797_v54 = vld [vmem:[%s7213_s18 + $0xc0] sm:$0xff]   ;;  %v6809_v59 = vld [vmem:[%s7213_s18 + $0xd8] sm:$0xff]  }
0x18d2   : > { %v6810_v56 = vld [vmem:[%s7213_s18 + $0x18] sm:$0xff]  }
0x18d3   : > { %5092 = vmatpush1.bf16.msra.mxu1 %v6082_v47  ;;  %5135 = vmatpush1.bf16.msra.mxu0 %v6084_v51  ;;  %v6802_v47 = vld [vmem:[%s7213_s18 + $0x8] sm:$0xff]   ;;  %v6825_v11 = vld [vmem:[%s7213_s18 + $0xf8] sm:$0xff]  }
0x18d4   : > { %5093 = vmatprep.subr.bf16.mxu1 %v6091_v53  ;;  %5136 = vmatprep.subr.bf16.mxu0 %v6093_v55  ;;  %v6803_v51 = vld [vmem:[%s7213_s18 + $0x88] sm:$0xff]   ;;  %v6804_v53 = vld [vmem:[%s7213_s18 + $0x50] sm:$0xff]   ;;  %v6826_v28 = vld [vmem:[%s7213_s18 + $0x38] sm:$0xff]  }
0x18d5   : > { %v6805_v55 = vld [vmem:[%s7213_s18 + $0xd0] sm:$0xff]  }
0x18d7   : > { %5094 = vmatpush1.bf16.msra.mxu1 %v6090_v60  ;;  %5137 = vmatpush1.bf16.msra.mxu0 %v6092_v61  ;;  %v6811_v60 = vld [vmem:[%s7213_s18 + $0x98] sm:$0xff]   ;;  %v6812_v61 = vld [vmem:[%s7213_s18 + $0x60] sm:$0xff]  }
0x18d8   : > { %5095 = vmatprep.subr.bf16.mxu1 %v6099_v0  ;;  %5138 = vmatprep.subr.bf16.mxu0 %v6101_v1  ;;  %v6813_v0 = vld [vmem:[%s7213_s18 + $0xe0] sm:$0xff]  }
0x18d9   : > { %v6814_v1 = vld [vmem:[%s7213_s18 + $0x20] sm:$0xff]  }
0x18db   : > { %5096 = vmatpush1.bf16.msra.mxu1 %v6098_v34  ;;  %5139 = vmatpush1.bf16.msra.mxu0 %v6100_v4  ;;  %v6819_v34 = vld [vmem:[%s7213_s18 + $0xa8] sm:$0xff]   ;;  %v6820_v4 = vld [vmem:[%s7213_s18 + $0x70] sm:$0xff]  }
0x18dc   : > { %5097 = vmatprep.subr.bf16.mxu1 %v6107_v2  ;;  %5140 = vmatprep.subr.bf16.mxu0 %v6109_v3  ;;  %v6821_v2 = vld [vmem:[%s7213_s18 + $0xf0] sm:$0xff]  }
0x18dd   : > { %v6822_v3 = vld [vmem:[%s7213_s18 + $0x30] sm:$0xff]  }
0x18df   : > { %5098 = vmatpush1.bf16.msra.mxu1 %v6106_v13  ;;  %5141 = vmatpush1.bf16.msra.mxu0 %v6108_v58  ;;  %v6827_v13 = vld [vmem:[%s7213_s18 + $0xb8] sm:$0xff]   ;;  %v6828_v58 = vld [vmem:[%s7213_s18 + $0x140] sm:$0xff]  }
0x18e0   : > { %5099 = vmatprep.subr.bf16.mxu1 %v6115_v30  ;;  %5142 = vmatprep.subr.bf16.mxu0 %v6117_v14  ;;  %v6829_v30 = vld [vmem:[%s7213_s18 + $0x1c0] sm:$0xff]  }
0x18e1   : > { %v7917_v14 = vld [vmem:[%s7208_s6] sm:$0xff] }
0x18e2   : > { %v4646_v15 = vrot.slane %v7917_v14, %v7286_v35  ;;  %v4654_v16 = vrot.slane %v7917_v14, %v7305_v48  ;;  %v4650_v26 = vrot.slane %v7917_v14, %v7289_v37  ;;  %v4658_v18 = vrot.slane %v7917_v14, %v7502_v12 }
0x18e3   : > { %5100 = vmatpush1.bf16.msra.mxu1 %v6114_v21  ;;  %5143 = vmatpush1.bf16.msra.mxu0 %v6116_v22 }
0x18e4   : > { %5101 = vmatprep.subr.bf16.mxu1 %v6123_v23  ;;  %5144 = vmatprep.subr.bf16.mxu0 %v6125_v25 }
0x18e7   : > { %5102 = vmatpush1.bf16.msra.mxu1 %v6122_v36  ;;  %5145 = vmatpush1.bf16.msra.mxu0 %v6124_v5 }
0x18e8   : > { %5103 = vmatprep.subr.bf16.mxu1 %v6131_v52  ;;  %5146 = vmatprep.subr.bf16.mxu0 %v6133_v38 }
0x18eb   : > { %5104 = vmatpush1.bf16.msra.mxu1 %v6130_v41  ;;  %5147 = vmatpush1.bf16.msra.mxu0 %v6132_v39 }
0x18ec   : > { %6313 = vmatprep.subr.bf16.mxu1 %v6796_v42  ;;  %6335 = vmatprep.subr.bf16.mxu0 %v6797_v54 }
0x18ee   : > { %5122 = vmatmul.mubr.bf16.vlgmr.msra.gmra.mrb[60].mxu1 %v7850_v7  ;;  %5165 = vmatmul.mubr.bf16.vlgmr.msra.gmra.mrb[60].mxu0 %v7850_v7  ;;  %v6808_v7 = vld [vmem:[%s7213_s18 + $0x58] sm:$0xff]  }
0x18ef   : > { %6314 = vmatpush3.bf16.msra.mxu1 %v6798_v43  ;;  %6336 = vmatpush3.bf16.msra.mxu0 %v6799_v20 }
0x18f0   : > { %6315 = vmatprep.subr.bf16.mxu1 %v6800_v44  ;;  %6337 = vmatprep.subr.bf16.mxu0 %v6801_v46 }
0x18f3   : > { %6316 = vmatpush3.bf16.msra.mxu1 %v6802_v47  ;;  %6338 = vmatpush3.bf16.msra.mxu0 %v6803_v51 }
0x18f4   : > { %6317 = vmatprep.subr.bf16.mxu1 %v6804_v53  ;;  %6339 = vmatprep.subr.bf16.mxu0 %v6805_v55 }
0x18f7   : > { %6318 = vmatpush3.bf16.msra.mxu1 %v6806_v50  ;;  %6340 = vmatpush3.bf16.msra.mxu0 %v6807_v57  ;;  %v6830_v50 = vld [vmem:[%s7213_s18 + $0x100] sm:$0xff]  }
0x18f8   : > { %6319 = vmatprep.subr.bf16.mxu1 %v6808_v7  ;;  %6341 = vmatprep.subr.bf16.mxu0 %v6809_v59  ;;  %v6831_v57 = vld [vmem:[%s7213_s18 + $0x180] sm:$0xff]   ;;  %v6832_v7 = vld [vmem:[%s7213_s18 + $0x148] sm:$0xff]  }
0x18f9   : > { %v6833_v59 = vld [vmem:[%s7213_s18 + $0x1c8] sm:$0xff]  }
0x18fb   : > { %6320 = vmatpush3.bf16.msra.mxu1 %v6810_v56  ;;  %6342 = vmatpush3.bf16.msra.mxu0 %v6811_v60  ;;  %v6834_v56 = vld [vmem:[%s7213_s18 + $0x108] sm:$0xff]  }
0x18fc   : > { %6321 = vmatprep.subr.bf16.mxu1 %v6812_v61  ;;  %6343 = vmatprep.subr.bf16.mxu0 %v6813_v0  ;;  %v6835_v60 = vld [vmem:[%s7213_s18 + $0x188] sm:$0xff]   ;;  %v6836_v61 = vld [vmem:[%s7213_s18 + $0x150] sm:$0xff]  }
0x18fd   : > { %v6837_v0 = vld [vmem:[%s7213_s18 + $0x1d0] sm:$0xff]  }
0x18ff   : > { %6322 = vmatpush3.bf16.msra.mxu1 %v6814_v1  ;;  %6344 = vmatpush3.bf16.msra.mxu0 %v6815_v24  ;;  %v6838_v1 = vld [vmem:[%s7213_s18 + $0x110] sm:$0xff]  }
0x1900   : > { %6323 = vmatprep.subr.bf16.mxu1 %v6816_v17  ;;  %6345 = vmatprep.subr.bf16.mxu0 %v6817_v62  ;;  %v6839_v24 = vld [vmem:[%s7213_s18 + $0x190] sm:$0xff]   ;;  %v6840_v17 = vld [vmem:[%s7213_s18 + $0x158] sm:$0xff]  }
0x1901   : > { %v6841_v62 = vld [vmem:[%s7213_s18 + $0x1d8] sm:$0xff]  }
0x1903   : > { %6324 = vmatpush3.bf16.msra.mxu1 %v6818_v45  ;;  %6346 = vmatpush3.bf16.msra.mxu0 %v6819_v34  ;;  %v6842_v45 = vld [vmem:[%s7213_s18 + $0x118] sm:$0xff]  }
0x1904   : > { %6325 = vmatprep.subr.bf16.mxu1 %v6820_v4  ;;  %6347 = vmatprep.subr.bf16.mxu0 %v6821_v2  ;;  %v6843_v34 = vld [vmem:[%s7213_s18 + $0x198] sm:$0xff]   ;;  %v6844_v4 = vld [vmem:[%s7213_s18 + $0x160] sm:$0xff]  }
0x1905   : > { %v6845_v2 = vld [vmem:[%s7213_s18 + $0x1e0] sm:$0xff]  }
0x1907   : > { %6326 = vmatpush3.bf16.msra.mxu1 %v6822_v3  ;;  %6348 = vmatpush3.bf16.msra.mxu0 %v6823_v8  ;;  %v6846_v3 = vld [vmem:[%s7213_s18 + $0x120] sm:$0xff]  }
0x1908   : > { %6327 = vmatprep.subr.bf16.mxu1 %v6824_v10  ;;  %6349 = vmatprep.subr.bf16.mxu0 %v6825_v11  ;;  %v6847_v8 = vld [vmem:[%s7213_s18 + $0x1a0] sm:$0xff]   ;;  %v6848_v10 = vld [vmem:[%s7213_s18 + $0x168] sm:$0xff]  }
0x1909   : > { %v6849_v11 = vld [vmem:[%s7213_s18 + $0x1e8] sm:$0xff]  }
0x190b   : > { %6328 = vmatpush3.bf16.msra.mxu1 %v6826_v28  ;;  %6350 = vmatpush3.bf16.msra.mxu0 %v6827_v13  ;;  %v6850_v28 = vld [vmem:[%s7213_s18 + $0x128] sm:$0xff]  }
0x190c   : > { %6357 = vmatprep.subr.bf16.mxu1 %v6828_v58  ;;  %6379 = vmatprep.subr.bf16.mxu0 %v6829_v30  ;;  %v6851_v13 = vld [vmem:[%s7213_s18 + $0x1a8] sm:$0xff]   ;;  %v4662_v58 = vrot.slane %v7917_v14, %v7555_v9  ;;  %v4670_v30 = vrot.slane %v7917_v14, %v7598_v31 }
0x19a1   : > { %v5037_v21 = vpop.f32.mrb[56].mxu1  ;;  %v5080_v22 = vpop.f32.mrb[56].mxu0 }
0x19a2   : > { %v5038_v23 = vadd.f32 %v5037_v21, %v4646_v15  ;;  %v5081_v25 = vadd.f32 %v5080_v22, %v4654_v16  ;;  %v5039_v27 = vpop.f32.mrb[57].mxu1  ;;  %v5082_v29 = vpop.f32.mrb[57].mxu0 }
0x19a3   : > { %v5040_v33 = vadd.f32 %v5039_v27, %v4650_v26  ;;  %v5083_v63 = vadd.f32 %v5082_v29, %v4658_v18  ;;  %v5041_v36 = vpop.f32.mrb[58].mxu1  ;;  %v5084_v5 = vpop.f32.mrb[58].mxu0 }
0x19a4   : > { %v5042_v35 = vadd.f32 %v5041_v36, %v4646_v15  ;;  %v5085_v52 = vadd.f32 %v5084_v5, %v4654_v16  ;;  %v5043_v38 = vpop.f32.mrb[59].mxu1  ;;  %v5086_v48 = vpop.f32.mrb[59].mxu0  ;;  %v5175_v12 = vmax.f32 %v5038_v23, 0.0  ;;  %v5177_v39 = vmax.f32 %v5081_v25, 0.0  ;;  %v6852_v15 = vld [vmem:[%s7213_s18 + $0x170] sm:$0xff]   ;;  %v6856_v36 = vld [vmem:[%s7213_s18 + $0x178] sm:$0xff]  }
0x19a5   : > { %v5044_v37 = vadd.f32 %v5043_v38, %v4650_v26  ;;  %v5087_v41 = vadd.f32 %v5086_v48, %v4658_v18  ;;  %v5176_v43 = vmax.f32 %v5040_v33, 0.0  ;;  %v5178_v20 = vmax.f32 %v5083_v63, 0.0  ;;  %v6853_v16 = vld [vmem:[%s7213_s18 + $0x1f0] sm:$0xff]   ;;  %v6857_v5 = vld [vmem:[%s7213_s18 + $0x1f8] sm:$0xff]  }
0x19a6   : > { %v5183_v42 = vmax.f32 %v5042_v35, 0.0  ;;  %v5185_v54 = vmax.f32 %v5085_v52, 0.0  ;;  %v4666_v26 = vrot.slane %v7917_v14, %v7560_v49  ;;  %v4674_v18 = vrot.slane %v7917_v14, %v2810_v19  ;;  %v6854_v23 = vld [vmem:[%s7213_s18 + $0x130] sm:$0xff]  }
0x19a7   : > { %v5184_v44 = vmax.f32 %v5044_v37, 0.0  ;;  %v5186_v46 = vmax.f32 %v5087_v41, 0.0  ;;  %v6855_v25 = vld [vmem:[%s7213_s18 + $0x1b0] sm:$0xff]  }
0x19a8   : > { %v5191_v47 = vpack.c.bf16 %v5183_v42, %v5175_v12  ;;  %v5193_v51 = vpack.c.bf16 %v5185_v54, %v5177_v39  ;;  %v6858_v39 = vld [vmem:[%s7213_s18 + $0x138] sm:$0xff]  }
0x19a9   : > { %v5192_v53 = vpack.c.bf16 %v5184_v44, %v5176_v43  ;;  %v5194_v55 = vpack.c.bf16 %v5186_v46, %v5178_v20  ;;  %v6859_v42 = vld [vmem:[%s7213_s18 + $0x1b8] sm:$0xff]  }
0x19ab   : > { %5619 = vmatprep.mubr.bf16.mxu1 %v5192_v53  ;;  %5660 = vmatprep.mubr.bf16.mxu0 %v5194_v55 }
0x19ac   : > { %5620 = vmatmul.mubr.bf16.vlgmr.msra.gmra.mrb[64].mxu1 %v5191_v47  ;;  %5661 = vmatmul.mubr.bf16.vlgmr.msra.gmra.mrb[64].mxu0 %v5193_v51 }
0x19ad   : > { %6358 = vmatpush3.bf16.msra.mxu1 %v6830_v50  ;;  %6380 = vmatpush3.bf16.msra.mxu0 %v6831_v57 }
0x19ae   : > { %6359 = vmatprep.subr.bf16.mxu1 %v6832_v7  ;;  %6381 = vmatprep.subr.bf16.mxu0 %v6833_v59 }
0x19b1   : > { %6360 = vmatpush3.bf16.msra.mxu1 %v6834_v56  ;;  %6382 = vmatpush3.bf16.msra.mxu0 %v6835_v60  ;;  %v6938_v60 = vld [vmem:[%s7218_s4 + $0x8] sm:$0x7f] }
0x19b2   : > { %6361 = vmatprep.subr.bf16.mxu1 %v6836_v61  ;;  %6383 = vmatprep.subr.bf16.mxu0 %v6837_v0  ;;  %v5202_v61 = vrot.slane %v6938_v60, %v7555_v9 }
0x19b5   : > { %6362 = vmatpush3.bf16.msra.mxu1 %v6838_v1  ;;  %6384 = vmatpush3.bf16.msra.mxu0 %v6839_v24 }
0x19b6   : > { %6363 = vmatprep.subr.bf16.mxu1 %v6840_v17  ;;  %6385 = vmatprep.subr.bf16.mxu0 %v6841_v62 }
0x19b9   : > { %6364 = vmatpush3.bf16.msra.mxu1 %v6842_v45  ;;  %6386 = vmatpush3.bf16.msra.mxu0 %v6843_v34 }
0x19ba   : > { %6365 = vmatprep.subr.bf16.mxu1 %v6844_v4  ;;  %6387 = vmatprep.subr.bf16.mxu0 %v6845_v2 }
0x19bd   : > { %6366 = vmatpush3.bf16.msra.mxu1 %v6846_v3  ;;  %6388 = vmatpush3.bf16.msra.mxu0 %v6847_v8 }
0x19be   : > { %6367 = vmatprep.subr.bf16.mxu1 %v6848_v10  ;;  %6389 = vmatprep.subr.bf16.mxu0 %v6849_v11 }
0x19c1   : > { %v5123_v21 = vpop.f32.mrb[60].mxu1  ;;  %v5166_v22 = vpop.f32.mrb[60].mxu0  ;;  %6368 = vmatpush3.bf16.msra.mxu1 %v6850_v28  ;;  %6390 = vmatpush3.bf16.msra.mxu0 %v6851_v13 }
0x19c2   : > { %v5124_v27 = vadd.f32 %v5123_v21, %v4662_v58  ;;  %v5167_v29 = vadd.f32 %v5166_v22, %v4670_v30  ;;  %v5125_v33 = vpop.f32.mrb[61].mxu1  ;;  %v5168_v63 = vpop.f32.mrb[61].mxu0  ;;  %6369 = vmatprep.subr.bf16.mxu1 %v6852_v15  ;;  %6391 = vmatprep.subr.bf16.mxu0 %v6853_v16 }
0x19c3   : > { %v5126_v35 = vadd.f32 %v5125_v33, %v4666_v26  ;;  %v5169_v32 = vadd.f32 %v5168_v63, %v4674_v18  ;;  %v5127_v52 = vpop.f32.mrb[62].mxu1  ;;  %v5170_v19 = vpop.f32.mrb[62].mxu0 }
0x19c4   : > { %v5128_v14 = vadd.f32 %v5127_v52, %v4662_v58  ;;  %v5171_v38 = vadd.f32 %v5170_v19, %v4670_v30  ;;  %v5129_v48 = vpop.f32.mrb[63].mxu1  ;;  %v5172_v37 = vpop.f32.mrb[63].mxu0  ;;  %v5179_v54 = vmax.f32 %v5124_v27, 0.0  ;;  %v5181_v43 = vmax.f32 %v5167_v29, 0.0 }
0x19c5   : > { %v5130_v41 = vadd.f32 %v5129_v48, %v4666_v26  ;;  %v5173_v12 = vadd.f32 %v5172_v37, %v4674_v18  ;;  %6370 = vmatpush3.bf16.msra.mxu1 %v6854_v23  ;;  %6392 = vmatpush3.bf16.msra.mxu0 %v6855_v25  ;;  %v5180_v46 = vmax.f32 %v5126_v35, 0.0  ;;  %v5182_v47 = vmax.f32 %v5169_v32, 0.0 }
0x19c6   : > { %v5187_v20 = vmax.f32 %v5128_v14, 0.0  ;;  %v5189_v44 = vmax.f32 %v5171_v38, 0.0  ;;  %6371 = vmatprep.subr.bf16.mxu1 %v6856_v36  ;;  %6393 = vmatprep.subr.bf16.mxu0 %v6857_v5 }
0x19c7   : > { %v5188_v51 = vmax.f32 %v5130_v41, 0.0  ;;  %v5190_v53 = vmax.f32 %v5173_v12, 0.0 }
0x19c8   : > { %v5195_v55 = vpack.c.bf16 %v5187_v20, %v5179_v54  ;;  %v5197_v50 = vpack.c.bf16 %v5189_v44, %v5181_v43  ;;  %v5784_v20 = vrot.slane %v6938_v60, %v7598_v31 }
0x19c9   : > { %v5196_v57 = vpack.c.bf16 %v5188_v51, %v5180_v46  ;;  %v5198_v7 = vpack.c.bf16 %v5190_v53, %v5182_v47  ;;  %6372 = vmatpush3.bf16.msra.mxu1 %v6858_v39  ;;  %6394 = vmatpush3.bf16.msra.mxu0 %v6859_v42 }
0x19cb   : > { %5701 = vmatprep.mubr.bf16.mxu1 %v5196_v57  ;;  %5742 = vmatprep.mubr.bf16.mxu0 %v5198_v7 }
0x19cc   : > { %5702 = vmatmul.mubr.bf16.vlgmr.msra.gmra.mrb[68].mxu1 %v5195_v55  ;;  %5743 = vmatmul.mubr.bf16.vlgmr.msra.gmra.mrb[68].mxu0 %v5197_v50 }
0x1a7f   : > { %v6329_v59 = vpop.f32.mrb[64].mxu1  ;;  %v6351_v56 = vpop.f32.mrb[64].mxu0 }
0x1a80   : > { %v6330_v0 = vpop.f32.mrb[65].mxu1  ;;  %v6352_v1 = vpop.f32.mrb[65].mxu0 }
0x1a81   : > { %v6331_v24 = vadd.f32 %v6330_v0, %v6329_v59  ;;  %v6353_v17 = vadd.f32 %v6352_v1, %v6351_v56  ;;  %v6332_v62 = vpop.f32.mrb[66].mxu1  ;;  %v6354_v45 = vpop.f32.mrb[66].mxu0 }
0x1a82   : > { %v6333_v34 = vpop.f32.mrb[67].mxu1  ;;  %v6355_v4 = vpop.f32.mrb[67].mxu0 }
0x1a83   : > { %v5622_v2 = vadd.f32 %v6331_v24, %v5202_v61  ;;  %v6334_v3 = vadd.f32 %v6333_v34, %v6332_v62  ;;  %v6356_v8 = vadd.f32 %v6355_v4, %v6354_v45 }
0x1a85   : > { %v5663_v10 = vadd.f32 %v6353_v17, %v5622_v2  ;;  %v5625_v11 = vadd.f32 %v6334_v3, %v5202_v61 }
0x1a87   : > { %v5666_v28 = vadd.f32 %v6356_v8, %v5625_v11 }
0x1a9f   : > { %v6373_v13 = vpop.f32.mrb[68].mxu1  ;;  %v6395_v58 = vpop.f32.mrb[68].mxu0 }
0x1aa0   : > { %v6374_v30 = vpop.f32.mrb[69].mxu1  ;;  %v6396_v15 = vpop.f32.mrb[69].mxu0 }
0x1aa1   : > { %v6375_v16 = vadd.f32 %v6374_v30, %v6373_v13  ;;  %v6397_v9 = vadd.f32 %v6396_v15, %v6395_v58  ;;  %v6376_v26 = vpop.f32.mrb[70].mxu1  ;;  %v6398_v18 = vpop.f32.mrb[70].mxu0 }
0x1aa2   : > { %v6377_v21 = vpop.f32.mrb[71].mxu1  ;;  %v6399_v22 = vpop.f32.mrb[71].mxu0 }
0x1aa3   : > { %v5704_v23 = vadd.f32 %v6375_v16, %v5663_v10  ;;  %v6378_v25 = vadd.f32 %v6377_v21, %v6376_v26  ;;  %v6400_v27 = vadd.f32 %v6399_v22, %v6398_v18 }
0x1aa5   : > { %v5745_v29 = vadd.f32 %v6397_v9, %v5704_v23  ;;  %v5707_v33 = vadd.f32 %v6378_v25, %v5666_v28 }
0x1aa7   : > { %v5748_v63 = vadd.f32 %v6400_v27, %v5707_v33  ;;  %v5751_v36 = vadd.f32 %v5745_v29, %v7844_v40 }
0x1aa9   : > { %5753 = vadd.xlane.f32.xlu0 %v5751_v36  ;;  %v5752_v5 = vadd.f32 %v5748_v63, %v7846_v6  ;;  %v5778_v6 = vrot.slane %v6938_v60, %v7560_v49 }
0x1aad   : > { %5755 = vadd.xlane.f32.xlu0 %v5752_v5 }
0x1b36   : > { %v5754_v35 = vpop.xlane.xlu0 %5753 }
0x1b37   : > { %v5757_v32 = vmul.f32 0.0078125, %v5754_v35 }
0x1b39   : > { %v5759_v52 = vsub.f32 %v5751_v36, %v5757_v32 }
0x1b3a   : > { %v5756_v19 = vpop.xlane.xlu0 %5755 }
0x1b3b   : > { %v5758_v14 = vmul.f32 0.0078125, %v5756_v19  ;;  %v5761_v38 = vmul.f32 %v5759_v52, %v5759_v52 }
0x1b3d   : > { %v5760_v48 = vsub.f32 %v5752_v5, %v5758_v14  ;;  %5763 = vadd.xlane.f32.xlu0 %v5761_v38 }
0x1b3f   : > { %v5762_v37 = vmul.f32 %v5760_v48, %v5760_v48 }
0x1b41   : > { %5765 = vadd.xlane.f32.xlu1 %v5762_v37 }
0x1bca   : > { %v5764_v41 = vpop.xlane.xlu0 %5763 }
0x1bcb   : > { %v5767_v12 = vmul.f32 0.0078125, %v5764_v41 }
0x1bcd   : > { %v5769_v39 = vadd.f32 1e-05, %v5767_v12 }
0x1bce   : > { %v5766_v42 = vpop.xlane.xlu1 %5765 }
0x1bcf   : > { %6932 = vrsqrt.f32 %v5769_v39  ;;  %v5768_v40 = vmul.f32 0.0078125, %v5766_v42 }
0x1bd1   : > { %v5770_v54 = vadd.f32 1e-05, %v5768_v40 }
0x1bd3   : > { %6934 = vrsqrt.f32 %v5770_v54 }
0x1bd9   : > { %v6933_v43 = vpop.eup %6932 }
0x1bda   : > { %v5773_v44 = vmul.f32 %v6933_v43, %v5759_v52 }
0x1bdc   : > { %v5779_v46 = vmul.f32 %v5778_v6, %v5773_v44 }
0x1bdd   : > { %v6935_v47 = vpop.eup %6934 }
0x1bde   : > { %v5785_v51 = vadd.f32 %v5784_v20, %v5779_v46  ;;  %v5774_v53 = vmul.f32 %v6935_v47, %v5760_v48 }
0x1be0   : > { %5787 = vst [vmem:[%s8004_s13] sm:$0xff] %v5785_v51  ;;  %v5780_v55 = vmul.f32 %v5778_v6, %v5774_v53 }
0x1be2   : > { %v5786_v50 = vadd.f32 %v5784_v20, %v5780_v55 }
0x1be4   : > { %5788 = vst [vmem:[%s8004_s13 + $0x8] sm:$0xff] %v5786_v50 }
0x1be5 PF: > { %s8027_s28 = sld [smem:[#allocation7_spill]]  ;;  %s8028_s25 = sld [smem:[#allocation5_spill]] }
0x1be6   : > { %s8029_s26 = sld [smem:[#allocation6_spill]]  ;;  %s8030_s27 = sld [smem:[#allocation8_spill]] }
0x1beb   : > { %p23_p8 = scmp.ge.s32.totalorder %s8027_s28, 4  }
0x1bed   :  { %25 = sbr.rel (!%p23_p8) target bundleno = 8 (0x8), region = 136 }
0x1bf4   :  { %5800 = vsyncpa [#allocation3], 1 }
0x1bf5   :  { %5802 = vsyncpa [#allocation3 + $0x1], 1 }

</bundles_post_ra>
